<compile_context>
chip_gen: v6e
topology: v6e:2x2x1
jax: 0.10.0
libtpu: 0.0.40
codegen_flags: <defaults>
</compile_context>

<pallas_src>
import math

import jax
import jax.numpy as jnp
import numpy as np
from jax.experimental import pallas as pl
from jax.experimental.pallas import tpu as pltpu

BN_EPS = 1e-5
KSIZE = 3


def _round_up(x, m):
    return (x + m - 1) // m * m


def _pick_tb(B):
    """Sublane-aligned batch tile (multiple of 8) with >= 2 grid steps when
    possible (v7x megacore); fall back to a single full-batch step."""
    best = None
    for cand in range(8, min(B // 2, 128) + 1, 8):
        if B % cand == 0 and B // cand >= 2:
            best = cand
    return best if best is not None else B


# ------------------------------ fused kernel --------------------------------
def make_fused_kernel(*, num_sensors, num_layers, feat, hidden, lengths,
                      lslot, p0, tb, n_params):
    r0 = p0 + tb * lslot
    l_final = lengths[-1]

    def dot(a, b):
        return jnp.dot(a, b, preferred_element_type=jnp.float32)

    def kernel(*refs):
        x_ref = refs[0]                                   # [1, S, R0, F]
        mask_refs = refs[1:1 + num_layers]                # each [R0, 1]
        param_refs = refs[1 + num_layers:1 + num_layers + n_params]
        out_ref = refs[1 + num_layers + n_params]         # [TB, out_w]
        scr = refs[2 + num_layers + n_params]             # VMEM [TB*Lslot, hidden]

        wf_ref, bf_ref, w1_ref, b1_ref, w2_ref, b2_ref = param_refs[-6:]

        fus = None
        p = 0
        for s in range(num_sensors):
            conv_w = [param_refs[p + 2 * li] for li in range(num_layers)]
            conv_b = [param_refs[p + 2 * li + 1] for li in range(num_layers)]
            wp_ref = param_refs[p + 2 * num_layers]       # [L_final*hidden, hidden]
            pb_ref = param_refs[p + 2 * num_layers + 1]   # [1, hidden]
            p += 2 * num_layers + 2

            act = x_ref[0, s]                             # [R0, F]  (slot layout)
            for li in range(num_layers):
                d = 2 ** li                               # dilation; torch pad = 2*d
                cin = feat if li == 0 else hidden
                # Gather-form dilated k=3 conv over ALL TB samples at once.
                # Rows [0, p0) of `act` are zero by construction, so an
                # aligned p0-row zero prefix lets every tap window start >= 0.
                xpad = jnp.concatenate(
                    [jnp.zeros((p0, cin), jnp.float32), act], axis=0)
                taps = jnp.concatenate(
                    [xpad[p0 - (KSIZE - 1 - t) * d:
                          p0 - (KSIZE - 1 - t) * d + r0, :]
                     for t in range(KSIZE)], axis=-1)     # [R0, 3*cin]
                y = dot(taps, conv_w[li][...]) + conv_b[li][...]
                # ReLU; eval-mode BatchNorm scale already folded into W/b.
                # TODO(synk): a trained BatchNorm with nonzero shift
                # (beta - mean*scale) would need one extra post-ReLU add here;
                # it is exactly zero for the default-initialized module.
                # Row mask keeps inter-sample slack rows (and the leading pad)
                # at exactly zero so the next layer sees PyTorch's zero pad.
                act = jnp.maximum(y, 0.0) * mask_refs[li][...]

            # Batched flatten(1): one aligned store of all valid slot rows,
            # then strided reads build [TB, L_final*hidden] for ONE projection
            # matmul (the PyTorch channel-major flatten is folded into wp).
            scr[...] = act[p0:, :]                        # [TB*Lslot, hidden]
            flat = jnp.concatenate(
                [scr[pl.ds(l, tb, stride=lslot), :] for l in range(l_final)],
                axis=-1)                                  # [TB, L_final*hidden]
            emb = dot(flat, wp_ref[...]) + pb_ref[...]    # [TB, hidden]

            # Fusion Linear: the concat over sensors is rewritten as a sum of
            # per-sensor [hidden, 128] matmuls.
            contrib = dot(emb, wf_ref[s])                 # [TB, 128]
            fus = contrib if fus is None else fus + contrib

        fused = jnp.maximum(fus + bf_ref[...], 0.0)       # ReLU (+ Dropout = id)
        h1 = jnp.maximum(dot(fused, w1_ref[...]) + b1_ref[...], 0.0)
        out = dot(h1, w2_ref[...]) + b2_ref[...]          # [TB, out_w]
        out_ref[...] = out.astype(out_ref.dtype)

    return kernel


# ------------------------------ pallas wrapper -------------------------------
def forward_pallas(params, inputs, sensors, hp, *, tb=None):
    """inputs: [B, num_sensors, seq_len, max_feature_dim] f32 -> [B, proj_dim]."""
    B, S, L, F = inputs.shape
    hidden = hp["hidden_dim"]
    proj_dim = hp["proj_dim"]
    num_layers = hp["tcn_layers"]
    lengths = params["lengths"]
    l_final = lengths[-1]

    lslot = _round_up(l_final, 8)                 # per-sample row slot
    p0 = _round_up(2 * 2 ** (num_layers - 1), 8)  # leading zero rows (>= 2*d_max)
    if tb is None:
        tb = _pick_tb(B)
    assert B % tb == 0
    n_blk = B // tb
    r0 = p0 + tb * lslot
    out_w = params["b2"].shape[-1]                # head width padded to 128 lanes

    # Wrapper-side layout prep: pack each sample into its slot (zero slack),
    # prepend p0 zero rows per block -> one dense DMA block per grid step.
    x2 = jnp.pad(inputs, ((0, 0), (0, 0), (0, lslot - L), (0, 0)))
    x3 = x2.reshape(n_blk, tb, S, lslot, F).transpose(0, 2, 1, 3, 4)
    x3 = x3.reshape(n_blk, S, tb * lslot, F)
    xp = jnp.pad(x3, ((0, 0), (0, 0), (p0, 0), (0, 0)))   # [n_blk, S, R0, F]

    # Row-validity masks, one per conv layer (valid length lengths[li+1]).
    rows = np.arange(r0)
    masks = []
    for li in range(num_layers):
        valid = (rows >= p0) & (((rows - p0) % lslot) < lengths[li + 1])
        masks.append(jnp.asarray(valid.astype(np.float32)).reshape(r0, 1))

    # Ordered operands: x, masks, per-sensor (w0,b0,...,wp,pb), head params.
    operands = [xp] + masks
    for ps in params["per_sensor"]:
        for (w_k, b_k) in ps["conv"]:
            operands += [w_k, b_k]
        operands += [ps["wp"], ps["pb"]]
    operands += [params["wf"], params["bf"], params["w1"], params["b1"],
                 params["w2"], params["b2"]]
    n_params = len(operands) - 1 - num_layers

    def const_spec(arr):
        nd = arr.ndim
        # Whole array, same block every grid step -> stays resident in VMEM.
        return pl.BlockSpec(arr.shape, lambda b, _n=nd: (0,) * _n)

    in_specs = [pl.BlockSpec((1, S, r0, F), lambda b: (b, 0, 0, 0))]
    in_specs += [const_spec(a) for a in operands[1:]]
    out_specs = pl.BlockSpec((tb, out_w), lambda b: (b, 0))

    kernel = make_fused_kernel(
        num_sensors=S, num_layers=num_layers, feat=F, hidden=hidden,
        lengths=lengths, lslot=lslot, p0=p0, tb=tb, n_params=n_params)

    out = pl.pallas_call(
        kernel,
        out_shape=jax.ShapeDtypeStruct((B, out_w), jnp.float32),
        grid=(n_blk,),
        in_specs=in_specs,
        out_specs=out_specs,
        scratch_shapes=[pltpu.VMEM((tb * lslot, hidden), jnp.float32)],
        compiler_params=pltpu.CompilerParams(
            dimension_semantics=("parallel",)),
    )(*operands)
    return out[:, :proj_dim]


# --------------------------- params (init + prep) ----------------------------
def init_and_prepare_params(key, sensors, sensor_dims, hp):
    """PyTorch-style init, then kernel-friendly prep:
       * eval-mode BatchNorm folded into conv weight/bias,
       * conv weights laid out [k*C_in, C_out] (tap-folded matmul),
       * projection weight laid out [L*C, hidden] with PyTorch's channel-major
         flatten folded into the layout at init (no runtime transpose),
       * fusion weight split per sensor [S, hidden, 128] (no runtime concat),
       * head output zero-padded to a multiple of 128 lanes."""
    max_feat = max(sensor_dims.values())
    hidden = hp["hidden_dim"]
    num_layers = hp["tcn_layers"]
    seq_len = hp["sequence_length"]
    proj_dim = hp["proj_dim"]
    S = len(sensors)

    lengths = [seq_len]
    for li in range(num_layers):
        lengths.append(lengths[-1] + 2 * (2 ** li))
    l_final = lengths[-1]

    bn_scale = 1.0 / math.sqrt(1.0 + BN_EPS)   # gamma=1, beta=0, mean=0, var=1

    def uniform(k, shape, fan_in):
        bound = 1.0 / math.sqrt(fan_in)
        return jax.random.uniform(k, shape, jnp.float32, -bound, bound)

    per_sensor = []
    for _sensor in sensors:
        conv = []
        for li in range(num_layers):
            in_ch = max_feat if li == 0 else hidden
            key, kw, kb = jax.random.split(key, 3)
            w = uniform(kw, (hidden, in_ch, KSIZE), in_ch * KSIZE)  # torch layout
            b = uniform(kb, (hidden,), in_ch * KSIZE)
            w_k = jnp.transpose(w * bn_scale, (2, 1, 0)).reshape(
                KSIZE * in_ch, hidden)                              # [k*C_in, C_out]
            b_k = (b * bn_scale).reshape(1, hidden)
            conv.append((w_k, b_k))
        key, kw, kb = jax.random.split(key, 3)
        wp = uniform(kw, (l_final * hidden, hidden), hidden * l_final)
        pb = uniform(kb, (hidden,), hidden * l_final).reshape(1, hidden)
        per_sensor.append({"conv": conv, "wp": wp, "pb": pb})

    key, kw, kb = jax.random.split(key, 3)
    wf = uniform(kw, (S, hidden, 128), hidden * S)
    bf = uniform(kb, (128,), hidden * S).reshape(1, 128)
    key, kw, kb = jax.random.split(key, 3)
    w1 = uniform(kw, (128, 128), 128)
    b1 = uniform(kb, (128,), 128).reshape(1, 128)
    key, kw, kb = jax.random.split(key, 3)
    out_w = _round_up(proj_dim, 128)
    w2 = uniform(kw, (128, proj_dim), 128)
    b2 = uniform(kb, (proj_dim,), 128)
    w2 = jnp.pad(w2, ((0, 0), (0, out_w - proj_dim)))     # lane-dense head
    b2 = jnp.pad(b2, ((0, out_w - proj_dim),)).reshape(1, out_w)

    return {"per_sensor": per_sensor, "wf": wf, "bf": bf,
            "w1": w1, "b1": b1, "w2": w2, "b2": b2, "lengths": lengths}


# ------------------------- pure-JAX reference forward ------------------------
def forward_reference(params, inputs, sensors, hp):
    """Non-Pallas forward with identical math (for the correctness check)."""
    B, S, L, F = inputs.shape
    hidden = hp["hidden_dim"]
    proj_dim = hp["proj_dim"]
    l_final = params["lengths"][-1]

    fus = params["bf"]                                    # [1, 128]
    for s in range(S):
        x = inputs[:, s]                                  # [B, L, F]
        for li, (w_k, b_k) in enumerate(params["per_sensor"][s]["conv"]):
            d = 2 ** li
            pad = 2 * d
            L_out = x.shape[1] + 2 * d
            xpd = jnp.pad(x, ((0, 0), (pad, pad), (0, 0)))
            taps = jnp.concatenate(
                [xpd[:, t * d:t * d + L_out, :] for t in range(KSIZE)], axis=-1)
            x = jnp.maximum(jnp.einsum("blc,co->blo", taps, w_k) + b_k, 0.0)
        flat = x.reshape(B, l_final * hidden)             # (l, c)-major, matches wp
        emb = flat @ params["per_sensor"][s]["wp"] + params["per_sensor"][s]["pb"]
        fus = fus + emb @ params["wf"][s]
    fused = jnp.maximum(fus, 0.0)
    h1 = jnp.maximum(fused @ params["w1"] + params["b1"], 0.0)
    out = h1 @ params["w2"] + params["b2"]
    return out[:, :proj_dim]


# ---------------------------------- main -------------------------------------
if __name__ == "__main__":
    sensors = ["acc", "gyro"]
    sensor_dims = {"acc": 4, "gyro": 3}
    hp = dict(hidden_dim=32, tcn_layers=2, dropout_rate=0.1,
              sequence_length=8, proj_dim=16)

    key = jax.random.PRNGKey(0)
    key, k_in, k_par = jax.random.split(key, 3)

    B = 16   # -> TB=8, grid=(2,): batch-tiled steps, both v7x TensorCores busy
    inputs = jax.random.normal(
        k_in,
        (B, len(sensors), hp["sequence_length"], max(sensor_dims.values())),
        dtype=jnp.float32)

    params = init_and_prepare_params(k_par, sensors, sensor_dims, hp)

    out = jax.block_until_ready(forward_pallas(params, inputs, sensors, hp))
    ref = jax.block_until_ready(forward_reference(params, inputs, sensors, hp))

    assert out.shape == (B, hp["proj_dim"])
    max_err = float(jnp.max(jnp.abs(out - ref)))
    assert jnp.allclose(out, ref, rtol=2e-2, atol=2e-2), (
        f"Pallas/JAX mismatch, max|err| = {max_err}")

    print("KERNEL_OK")
</pallas_src>

<mosaic_0001>
module attributes {stable_mosaic.version = 11 : i64} {
  func.func @kernel(%arg0: i32, %arg1: memref<1x2x136x4xf32, #tpu.memory_space<vmem>>, %arg2: memref<136x1xf32, #tpu.memory_space<vmem>>, %arg3: memref<136x1xf32, #tpu.memory_space<vmem>>, %arg4: memref<12x32xf32, #tpu.memory_space<vmem>>, %arg5: memref<1x32xf32, #tpu.memory_space<vmem>>, %arg6: memref<96x32xf32, #tpu.memory_space<vmem>>, %arg7: memref<1x32xf32, #tpu.memory_space<vmem>>, %arg8: memref<448x32xf32, #tpu.memory_space<vmem>>, %arg9: memref<1x32xf32, #tpu.memory_space<vmem>>, %arg10: memref<12x32xf32, #tpu.memory_space<vmem>>, %arg11: memref<1x32xf32, #tpu.memory_space<vmem>>, %arg12: memref<96x32xf32, #tpu.memory_space<vmem>>, %arg13: memref<1x32xf32, #tpu.memory_space<vmem>>, %arg14: memref<448x32xf32, #tpu.memory_space<vmem>>, %arg15: memref<1x32xf32, #tpu.memory_space<vmem>>, %arg16: memref<2x32x128xf32, #tpu.memory_space<vmem>>, %arg17: memref<1x128xf32, #tpu.memory_space<vmem>>, %arg18: memref<128x128xf32, #tpu.memory_space<vmem>>, %arg19: memref<1x128xf32, #tpu.memory_space<vmem>>, %arg20: memref<128x128xf32, #tpu.memory_space<vmem>>, %arg21: memref<1x128xf32, #tpu.memory_space<vmem>>, %arg22: memref<8x128xf32, #tpu.memory_space<vmem>>, %arg23: memref<128x32xf32, #tpu.memory_space<vmem>>) attributes {dimension_semantics = [#tpu.dimension_semantics<parallel>], iteration_bounds = array<i64: 2>, scalar_prefetch = 0 : i64, scratch_operands = 1 : i64, tpu.core_type = #tpu.core_type<tc>, window_params = [{transform_indices = @transform_0, window_bounds = array<i64: 1, 2, 136, 4>}, {pipeline_mode = #tpu.pipeline_mode<synchronous>, transform_indices = @transform_1, window_bounds = array<i64: 136, 1>}, {pipeline_mode = #tpu.pipeline_mode<synchronous>, transform_indices = @transform_2, window_bounds = array<i64: 136, 1>}, {pipeline_mode = #tpu.pipeline_mode<synchronous>, transform_indices = @transform_3, window_bounds = array<i64: 12, 32>}, {pipeline_mode = #tpu.pipeline_mode<synchronous>, transform_indices = @transform_4, window_bounds = array<i64: 1, 32>}, {pipeline_mode = #tpu.pipeline_mode<synchronous>, transform_indices = @transform_5, window_bounds = array<i64: 96, 32>}, {pipeline_mode = #tpu.pipeline_mode<synchronous>, transform_indices = @transform_6, window_bounds = array<i64: 1, 32>}, {pipeline_mode = #tpu.pipeline_mode<synchronous>, transform_indices = @transform_7, window_bounds = array<i64: 448, 32>}, {pipeline_mode = #tpu.pipeline_mode<synchronous>, transform_indices = @transform_8, window_bounds = array<i64: 1, 32>}, {pipeline_mode = #tpu.pipeline_mode<synchronous>, transform_indices = @transform_9, window_bounds = array<i64: 12, 32>}, {pipeline_mode = #tpu.pipeline_mode<synchronous>, transform_indices = @transform_10, window_bounds = array<i64: 1, 32>}, {pipeline_mode = #tpu.pipeline_mode<synchronous>, transform_indices = @transform_11, window_bounds = array<i64: 96, 32>}, {pipeline_mode = #tpu.pipeline_mode<synchronous>, transform_indices = @transform_12, window_bounds = array<i64: 1, 32>}, {pipeline_mode = #tpu.pipeline_mode<synchronous>, transform_indices = @transform_13, window_bounds = array<i64: 448, 32>}, {pipeline_mode = #tpu.pipeline_mode<synchronous>, transform_indices = @transform_14, window_bounds = array<i64: 1, 32>}, {pipeline_mode = #tpu.pipeline_mode<synchronous>, transform_indices = @transform_15, window_bounds = array<i64: 2, 32, 128>}, {pipeline_mode = #tpu.pipeline_mode<synchronous>, transform_indices = @transform_16, window_bounds = array<i64: 1, 128>}, {pipeline_mode = #tpu.pipeline_mode<synchronous>, transform_indices = @transform_17, window_bounds = array<i64: 128, 128>}, {pipeline_mode = #tpu.pipeline_mode<synchronous>, transform_indices = @transform_18, window_bounds = array<i64: 1, 128>}, {pipeline_mode = #tpu.pipeline_mode<synchronous>, transform_indices = @transform_19, window_bounds = array<i64: 128, 128>}, {pipeline_mode = #tpu.pipeline_mode<synchronous>, transform_indices = @transform_20, window_bounds = array<i64: 1, 128>}, {transform_indices = @transform_21, window_bounds = array<i64: 8, 128>}]} {
    %c0 = arith.constant 0 : index
    %c0_0 = arith.constant 0 : index
    %c0_1 = arith.constant 0 : index
    %c0_2 = arith.constant 0 : index
    %0 = vector.load %arg1[%c0, %c0_0, %c0_1, %c0_2] : memref<1x2x136x4xf32, #tpu.memory_space<vmem>>, vector<1x1x136x4xf32>
    %1 = vector.shape_cast %0 : vector<1x1x136x4xf32> to vector<136x4xf32>
    %cst = arith.constant 0.000000e+00 : f32
    %2 = vector.broadcast %cst : f32 to vector<8x4xf32>
    %3 = tpu.concatenate %2, %1 in 0 : vector<8x4xf32>, vector<136x4xf32> -> vector<144x4xf32>
    %4 = vector.extract_strided_slice %3 {offsets = [6, 0], sizes = [136, 4], strides = [1, 1]} : vector<144x4xf32> to vector<136x4xf32>
    %5 = vector.extract_strided_slice %3 {offsets = [7, 0], sizes = [136, 4], strides = [1, 1]} : vector<144x4xf32> to vector<136x4xf32>
    %6 = vector.extract_strided_slice %3 {offsets = [8, 0], sizes = [136, 4], strides = [1, 1]} : vector<144x4xf32> to vector<136x4xf32>
    %7 = tpu.concatenate %4, %5, %6 in 1 : vector<136x4xf32>, vector<136x4xf32>, vector<136x4xf32> -> vector<136x12xf32>
    %c0_3 = arith.constant 0 : index
    %c0_4 = arith.constant 0 : index
    %8 = vector.load %arg4[%c0_3, %c0_4] : memref<12x32xf32, #tpu.memory_space<vmem>>, vector<12x32xf32>
    %cst_5 = arith.constant dense<0.000000e+00> : vector<136x32xf32>
    %9 = tpu.matmul %7, %8, %cst_5 {dimension_numbers = #tpu.dot_dimension_numbers<[1], [0], [0], [1], [0, 0, 1, 1], [], []>} : vector<136x12xf32>, vector<12x32xf32>, vector<136x32xf32> -> vector<136x32xf32>
    %c0_6 = arith.constant 0 : index
    %c0_7 = arith.constant 0 : index
    %10 = vector.load %arg5[%c0_6, %c0_7] : memref<1x32xf32, #tpu.memory_space<vmem>>, vector<1x32xf32>
    %11 = vector.broadcast %10 : vector<1x32xf32> to vector<136x32xf32>
    %12 = arith.addf %9, %11 : vector<136x32xf32>
    %cst_8 = arith.constant 0.000000e+00 : f32
    %13 = vector.broadcast %cst_8 : f32 to vector<136x32xf32>
    %14 = arith.maximumf %12, %13 : vector<136x32xf32>
    %c0_9 = arith.constant 0 : index
    %c0_10 = arith.constant 0 : index
    %15 = vector.load %arg2[%c0_9, %c0_10] : memref<136x1xf32, #tpu.memory_space<vmem>>, vector<136x1xf32>
    %16 = vector.broadcast %15 : vector<136x1xf32> to vector<136x32xf32>
    %17 = arith.mulf %14, %16 : vector<136x32xf32>
    %cst_11 = arith.constant 0.000000e+00 : f32
    %18 = vector.broadcast %cst_11 : f32 to vector<8x32xf32>
    %19 = tpu.concatenate %18, %17 in 0 : vector<8x32xf32>, vector<136x32xf32> -> vector<144x32xf32>
    %20 = vector.extract_strided_slice %19 {offsets = [4, 0], sizes = [136, 32], strides = [1, 1]} : vector<144x32xf32> to vector<136x32xf32>
    %21 = vector.extract_strided_slice %19 {offsets = [6, 0], sizes = [136, 32], strides = [1, 1]} : vector<144x32xf32> to vector<136x32xf32>
    %22 = vector.extract_strided_slice %19 {offsets = [8, 0], sizes = [136, 32], strides = [1, 1]} : vector<144x32xf32> to vector<136x32xf32>
    %23 = tpu.concatenate %20, %21, %22 in 1 : vector<136x32xf32>, vector<136x32xf32>, vector<136x32xf32> -> vector<136x96xf32>
    %c0_12 = arith.constant 0 : index
    %c0_13 = arith.constant 0 : index
    %24 = vector.load %arg6[%c0_12, %c0_13] : memref<96x32xf32, #tpu.memory_space<vmem>>, vector<96x32xf32>
    %cst_14 = arith.constant dense<0.000000e+00> : vector<136x32xf32>
    %25 = tpu.matmul %23, %24, %cst_14 {dimension_numbers = #tpu.dot_dimension_numbers<[1], [0], [0], [1], [0, 0, 1, 1], [], []>} : vector<136x96xf32>, vector<96x32xf32>, vector<136x32xf32> -> vector<136x32xf32>
    %c0_15 = arith.constant 0 : index
    %c0_16 = arith.constant 0 : index
    %26 = vector.load %arg7[%c0_15, %c0_16] : memref<1x32xf32, #tpu.memory_space<vmem>>, vector<1x32xf32>
    %27 = vector.broadcast %26 : vector<1x32xf32> to vector<136x32xf32>
    %28 = arith.addf %25, %27 : vector<136x32xf32>
    %cst_17 = arith.constant 0.000000e+00 : f32
    %29 = vector.broadcast %cst_17 : f32 to vector<136x32xf32>
    %30 = arith.maximumf %28, %29 : vector<136x32xf32>
    %c0_18 = arith.constant 0 : index
    %c0_19 = arith.constant 0 : index
    %31 = vector.load %arg3[%c0_18, %c0_19] : memref<136x1xf32, #tpu.memory_space<vmem>>, vector<136x1xf32>
    %32 = vector.broadcast %31 : vector<136x1xf32> to vector<136x32xf32>
    %33 = arith.mulf %30, %32 : vector<136x32xf32>
    %34 = vector.extract_strided_slice %33 {offsets = [8, 0], sizes = [128, 32], strides = [1, 1]} : vector<136x32xf32> to vector<128x32xf32>
    %c0_20 = arith.constant 0 : index
    %c0_21 = arith.constant 0 : index
    %35 = vector.load %arg23[%c0_20, %c0_21] : memref<128x32xf32, #tpu.memory_space<vmem>>, vector<128x32xf32>
    tpu.vector_store %arg23[%c0_20, %c0_21], %34 {strides = array<i32>} : memref<128x32xf32, #tpu.memory_space<vmem>>, vector<128x32xf32>,
    %c0_22 = arith.constant 0 : index
    %c0_23 = arith.constant 0 : index
    %36 = tpu.strided_load %arg23[%c0_22, %c0_23] {strides = array<i32: 16, 1>} : memref<128x32xf32, #tpu.memory_space<vmem>>, vector<8x32xf32>
    %c1 = arith.constant 1 : index
    %c0_24 = arith.constant 0 : index
    %37 = tpu.strided_load %arg23[%c1, %c0_24] {strides = array<i32: 16, 1>} : memref<128x32xf32, #tpu.memory_space<vmem>>, vector<8x32xf32>
    %c2 = arith.constant 2 : index
    %c0_25 = arith.constant 0 : index
    %38 = tpu.strided_load %arg23[%c2, %c0_25] {strides = array<i32: 16, 1>} : memref<128x32xf32, #tpu.memory_space<vmem>>, vector<8x32xf32>
    %c3 = arith.constant 3 : index
    %c0_26 = arith.constant 0 : index
    %39 = tpu.strided_load %arg23[%c3, %c0_26] {strides = array<i32: 16, 1>} : memref<128x32xf32, #tpu.memory_space<vmem>>, vector<8x32xf32>
    %c4 = arith.constant 4 : index
    %c0_27 = arith.constant 0 : index
    %40 = tpu.strided_load %arg23[%c4, %c0_27] {strides = array<i32: 16, 1>} : memref<128x32xf32, #tpu.memory_space<vmem>>, vector<8x32xf32>
    %c5 = arith.constant 5 : index
    %c0_28 = arith.constant 0 : index
    %41 = tpu.strided_load %arg23[%c5, %c0_28] {strides = array<i32: 16, 1>} : memref<128x32xf32, #tpu.memory_space<vmem>>, vector<8x32xf32>
    %c6 = arith.constant 6 : index
    %c0_29 = arith.constant 0 : index
    %42 = tpu.strided_load %arg23[%c6, %c0_29] {strides = array<i32: 16, 1>} : memref<128x32xf32, #tpu.memory_space<vmem>>, vector<8x32xf32>
    %c7 = arith.constant 7 : index
    %c0_30 = arith.constant 0 : index
    %43 = tpu.strided_load %arg23[%c7, %c0_30] {strides = array<i32: 16, 1>} : memref<128x32xf32, #tpu.memory_space<vmem>>, vector<8x32xf32>
    %c8 = arith.constant 8 : index
    %c0_31 = arith.constant 0 : index
    %44 = tpu.strided_load %arg23[%c8, %c0_31] {strides = array<i32: 16, 1>} : memref<128x32xf32, #tpu.memory_space<vmem>>, vector<8x32xf32>
    %c9 = arith.constant 9 : index
    %c0_32 = arith.constant 0 : index
    %45 = tpu.strided_load %arg23[%c9, %c0_32] {strides = array<i32: 16, 1>} : memref<128x32xf32, #tpu.memory_space<vmem>>, vector<8x32xf32>
    %c10 = arith.constant 10 : index
    %c0_33 = arith.constant 0 : index
    %46 = tpu.strided_load %arg23[%c10, %c0_33] {strides = array<i32: 16, 1>} : memref<128x32xf32, #tpu.memory_space<vmem>>, vector<8x32xf32>
    %c11 = arith.constant 11 : index
    %c0_34 = arith.constant 0 : index
    %47 = tpu.strided_load %arg23[%c11, %c0_34] {strides = array<i32: 16, 1>} : memref<128x32xf32, #tpu.memory_space<vmem>>, vector<8x32xf32>
    %c12 = arith.constant 12 : index
    %c0_35 = arith.constant 0 : index
    %48 = tpu.strided_load %arg23[%c12, %c0_35] {strides = array<i32: 16, 1>} : memref<128x32xf32, #tpu.memory_space<vmem>>, vector<8x32xf32>
    %c13 = arith.constant 13 : index
    %c0_36 = arith.constant 0 : index
    %49 = tpu.strided_load %arg23[%c13, %c0_36] {strides = array<i32: 16, 1>} : memref<128x32xf32, #tpu.memory_space<vmem>>, vector<8x32xf32>
    %50 = tpu.concatenate %36, %37, %38, %39, %40, %41, %42, %43, %44, %45, %46, %47, %48, %49 in 1 : vector<8x32xf32>, vector<8x32xf32>, vector<8x32xf32>, vector<8x32xf32>, vector<8x32xf32>, vector<8x32xf32>, vector<8x32xf32>, vector<8x32xf32>, vector<8x32xf32>, vector<8x32xf32>, vector<8x32xf32>, vector<8x32xf32>, vector<8x32xf32>, vector<8x32xf32> -> vector<8x448xf32>
    %c0_37 = arith.constant 0 : index
    %c0_38 = arith.constant 0 : index
    %51 = vector.load %arg8[%c0_37, %c0_38] : memref<448x32xf32, #tpu.memory_space<vmem>>, vector<448x32xf32>
    %cst_39 = arith.constant dense<0.000000e+00> : vector<8x32xf32>
    %52 = tpu.matmul %50, %51, %cst_39 {dimension_numbers = #tpu.dot_dimension_numbers<[1], [0], [0], [1], [0, 0, 1, 1], [], []>} : vector<8x448xf32>, vector<448x32xf32>, vector<8x32xf32> -> vector<8x32xf32>
    %c0_40 = arith.constant 0 : index
    %c0_41 = arith.constant 0 : index
    %53 = vector.load %arg9[%c0_40, %c0_41] : memref<1x32xf32, #tpu.memory_space<vmem>>, vector<1x32xf32>
    %54 = vector.broadcast %53 : vector<1x32xf32> to vector<8x32xf32>
    %55 = arith.addf %52, %54 : vector<8x32xf32>
    %c0_42 = arith.constant 0 : index
    %c0_43 = arith.constant 0 : index
    %c0_44 = arith.constant 0 : index
    %56 = vector.load %arg16[%c0_42, %c0_43, %c0_44] : memref<2x32x128xf32, #tpu.memory_space<vmem>>, vector<1x32x128xf32>
    %57 = vector.shape_cast %56 : vector<1x32x128xf32> to vector<32x128xf32>
    %cst_45 = arith.constant dense<0.000000e+00> : vector<8x128xf32>
    %58 = tpu.matmul %55, %57, %cst_45 {dimension_numbers = #tpu.dot_dimension_numbers<[1], [0], [0], [1], [0, 0, 1, 1], [], []>} : vector<8x32xf32>, vector<32x128xf32>, vector<8x128xf32> -> vector<8x128xf32>
    %c0_46 = arith.constant 0 : index
    %c1_47 = arith.constant 1 : index
    %c0_48 = arith.constant 0 : index
    %c0_49 = arith.constant 0 : index
    %59 = vector.load %arg1[%c0_46, %c1_47, %c0_48, %c0_49] : memref<1x2x136x4xf32, #tpu.memory_space<vmem>>, vector<1x1x136x4xf32>
    %60 = vector.shape_cast %59 : vector<1x1x136x4xf32> to vector<136x4xf32>
    %cst_50 = arith.constant 0.000000e+00 : f32
    %61 = vector.broadcast %cst_50 : f32 to vector<8x4xf32>
    %62 = tpu.concatenate %61, %60 in 0 : vector<8x4xf32>, vector<136x4xf32> -> vector<144x4xf32>
    %63 = vector.extract_strided_slice %62 {offsets = [6, 0], sizes = [136, 4], strides = [1, 1]} : vector<144x4xf32> to vector<136x4xf32>
    %64 = vector.extract_strided_slice %62 {offsets = [7, 0], sizes = [136, 4], strides = [1, 1]} : vector<144x4xf32> to vector<136x4xf32>
    %65 = vector.extract_strided_slice %62 {offsets = [8, 0], sizes = [136, 4], strides = [1, 1]} : vector<144x4xf32> to vector<136x4xf32>
    %66 = tpu.concatenate %63, %64, %65 in 1 : vector<136x4xf32>, vector<136x4xf32>, vector<136x4xf32> -> vector<136x12xf32>
    %c0_51 = arith.constant 0 : index
    %c0_52 = arith.constant 0 : index
    %67 = vector.load %arg10[%c0_51, %c0_52] : memref<12x32xf32, #tpu.memory_space<vmem>>, vector<12x32xf32>
    %cst_53 = arith.constant dense<0.000000e+00> : vector<136x32xf32>
    %68 = tpu.matmul %66, %67, %cst_53 {dimension_numbers = #tpu.dot_dimension_numbers<[1], [0], [0], [1], [0, 0, 1, 1], [], []>} : vector<136x12xf32>, vector<12x32xf32>, vector<136x32xf32> -> vector<136x32xf32>
    %c0_54 = arith.constant 0 : index
    %c0_55 = arith.constant 0 : index
    %69 = vector.load %arg11[%c0_54, %c0_55] : memref<1x32xf32, #tpu.memory_space<vmem>>, vector<1x32xf32>
    %70 = vector.broadcast %69 : vector<1x32xf32> to vector<136x32xf32>
    %71 = arith.addf %68, %70 : vector<136x32xf32>
    %cst_56 = arith.constant 0.000000e+00 : f32
    %72 = vector.broadcast %cst_56 : f32 to vector<136x32xf32>
    %73 = arith.maximumf %71, %72 : vector<136x32xf32>
    %c0_57 = arith.constant 0 : index
    %c0_58 = arith.constant 0 : index
    %74 = vector.load %arg2[%c0_57, %c0_58] : memref<136x1xf32, #tpu.memory_space<vmem>>, vector<136x1xf32>
    %75 = vector.broadcast %74 : vector<136x1xf32> to vector<136x32xf32>
    %76 = arith.mulf %73, %75 : vector<136x32xf32>
    %cst_59 = arith.constant 0.000000e+00 : f32
    %77 = vector.broadcast %cst_59 : f32 to vector<8x32xf32>
    %78 = tpu.concatenate %77, %76 in 0 : vector<8x32xf32>, vector<136x32xf32> -> vector<144x32xf32>
    %79 = vector.extract_strided_slice %78 {offsets = [4, 0], sizes = [136, 32], strides = [1, 1]} : vector<144x32xf32> to vector<136x32xf32>
    %80 = vector.extract_strided_slice %78 {offsets = [6, 0], sizes = [136, 32], strides = [1, 1]} : vector<144x32xf32> to vector<136x32xf32>
    %81 = vector.extract_strided_slice %78 {offsets = [8, 0], sizes = [136, 32], strides = [1, 1]} : vector<144x32xf32> to vector<136x32xf32>
    %82 = tpu.concatenate %79, %80, %81 in 1 : vector<136x32xf32>, vector<136x32xf32>, vector<136x32xf32> -> vector<136x96xf32>
    %c0_60 = arith.constant 0 : index
    %c0_61 = arith.constant 0 : index
    %83 = vector.load %arg12[%c0_60, %c0_61] : memref<96x32xf32, #tpu.memory_space<vmem>>, vector<96x32xf32>
    %cst_62 = arith.constant dense<0.000000e+00> : vector<136x32xf32>
    %84 = tpu.matmul %82, %83, %cst_62 {dimension_numbers = #tpu.dot_dimension_numbers<[1], [0], [0], [1], [0, 0, 1, 1], [], []>} : vector<136x96xf32>, vector<96x32xf32>, vector<136x32xf32> -> vector<136x32xf32>
    %c0_63 = arith.constant 0 : index
    %c0_64 = arith.constant 0 : index
    %85 = vector.load %arg13[%c0_63, %c0_64] : memref<1x32xf32, #tpu.memory_space<vmem>>, vector<1x32xf32>
    %86 = vector.broadcast %85 : vector<1x32xf32> to vector<136x32xf32>
    %87 = arith.addf %84, %86 : vector<136x32xf32>
    %cst_65 = arith.constant 0.000000e+00 : f32
    %88 = vector.broadcast %cst_65 : f32 to vector<136x32xf32>
    %89 = arith.maximumf %87, %88 : vector<136x32xf32>
    %c0_66 = arith.constant 0 : index
    %c0_67 = arith.constant 0 : index
    %90 = vector.load %arg3[%c0_66, %c0_67] : memref<136x1xf32, #tpu.memory_space<vmem>>, vector<136x1xf32>
    %91 = vector.broadcast %90 : vector<136x1xf32> to vector<136x32xf32>
    %92 = arith.mulf %89, %91 : vector<136x32xf32>
    %93 = vector.extract_strided_slice %92 {offsets = [8, 0], sizes = [128, 32], strides = [1, 1]} : vector<136x32xf32> to vector<128x32xf32>
    %c0_68 = arith.constant 0 : index
    %c0_69 = arith.constant 0 : index
    %94 = vector.load %arg23[%c0_68, %c0_69] : memref<128x32xf32, #tpu.memory_space<vmem>>, vector<128x32xf32>
    tpu.vector_store %arg23[%c0_68, %c0_69], %93 {strides = array<i32>} : memref<128x32xf32, #tpu.memory_space<vmem>>, vector<128x32xf32>,
    %c0_70 = arith.constant 0 : index
    %c0_71 = arith.constant 0 : index
    %95 = tpu.strided_load %arg23[%c0_70, %c0_71] {strides = array<i32: 16, 1>} : memref<128x32xf32, #tpu.memory_space<vmem>>, vector<8x32xf32>
    %c1_72 = arith.constant 1 : index
    %c0_73 = arith.constant 0 : index
    %96 = tpu.strided_load %arg23[%c1_72, %c0_73] {strides = array<i32: 16, 1>} : memref<128x32xf32, #tpu.memory_space<vmem>>, vector<8x32xf32>
    %c2_74 = arith.constant 2 : index
    %c0_75 = arith.constant 0 : index
    %97 = tpu.strided_load %arg23[%c2_74, %c0_75] {strides = array<i32: 16, 1>} : memref<128x32xf32, #tpu.memory_space<vmem>>, vector<8x32xf32>
    %c3_76 = arith.constant 3 : index
    %c0_77 = arith.constant 0 : index
    %98 = tpu.strided_load %arg23[%c3_76, %c0_77] {strides = array<i32: 16, 1>} : memref<128x32xf32, #tpu.memory_space<vmem>>, vector<8x32xf32>
    %c4_78 = arith.constant 4 : index
    %c0_79 = arith.constant 0 : index
    %99 = tpu.strided_load %arg23[%c4_78, %c0_79] {strides = array<i32: 16, 1>} : memref<128x32xf32, #tpu.memory_space<vmem>>, vector<8x32xf32>
    %c5_80 = arith.constant 5 : index
    %c0_81 = arith.constant 0 : index
    %100 = tpu.strided_load %arg23[%c5_80, %c0_81] {strides = array<i32: 16, 1>} : memref<128x32xf32, #tpu.memory_space<vmem>>, vector<8x32xf32>
    %c6_82 = arith.constant 6 : index
    %c0_83 = arith.constant 0 : index
    %101 = tpu.strided_load %arg23[%c6_82, %c0_83] {strides = array<i32: 16, 1>} : memref<128x32xf32, #tpu.memory_space<vmem>>, vector<8x32xf32>
    %c7_84 = arith.constant 7 : index
    %c0_85 = arith.constant 0 : index
    %102 = tpu.strided_load %arg23[%c7_84, %c0_85] {strides = array<i32: 16, 1>} : memref<128x32xf32, #tpu.memory_space<vmem>>, vector<8x32xf32>
    %c8_86 = arith.constant 8 : index
    %c0_87 = arith.constant 0 : index
    %103 = tpu.strided_load %arg23[%c8_86, %c0_87] {strides = array<i32: 16, 1>} : memref<128x32xf32, #tpu.memory_space<vmem>>, vector<8x32xf32>
    %c9_88 = arith.constant 9 : index
    %c0_89 = arith.constant 0 : index
    %104 = tpu.strided_load %arg23[%c9_88, %c0_89] {strides = array<i32: 16, 1>} : memref<128x32xf32, #tpu.memory_space<vmem>>, vector<8x32xf32>
    %c10_90 = arith.constant 10 : index
    %c0_91 = arith.constant 0 : index
    %105 = tpu.strided_load %arg23[%c10_90, %c0_91] {strides = array<i32: 16, 1>} : memref<128x32xf32, #tpu.memory_space<vmem>>, vector<8x32xf32>
    %c11_92 = arith.constant 11 : index
    %c0_93 = arith.constant 0 : index
    %106 = tpu.strided_load %arg23[%c11_92, %c0_93] {strides = array<i32: 16, 1>} : memref<128x32xf32, #tpu.memory_space<vmem>>, vector<8x32xf32>
    %c12_94 = arith.constant 12 : index
    %c0_95 = arith.constant 0 : index
    %107 = tpu.strided_load %arg23[%c12_94, %c0_95] {strides = array<i32: 16, 1>} : memref<128x32xf32, #tpu.memory_space<vmem>>, vector<8x32xf32>
    %c13_96 = arith.constant 13 : index
    %c0_97 = arith.constant 0 : index
    %108 = tpu.strided_load %arg23[%c13_96, %c0_97] {strides = array<i32: 16, 1>} : memref<128x32xf32, #tpu.memory_space<vmem>>, vector<8x32xf32>
    %109 = tpu.concatenate %95, %96, %97, %98, %99, %100, %101, %102, %103, %104, %105, %106, %107, %108 in 1 : vector<8x32xf32>, vector<8x32xf32>, vector<8x32xf32>, vector<8x32xf32>, vector<8x32xf32>, vector<8x32xf32>, vector<8x32xf32>, vector<8x32xf32>, vector<8x32xf32>, vector<8x32xf32>, vector<8x32xf32>, vector<8x32xf32>, vector<8x32xf32>, vector<8x32xf32> -> vector<8x448xf32>
    %c0_98 = arith.constant 0 : index
    %c0_99 = arith.constant 0 : index
    %110 = vector.load %arg14[%c0_98, %c0_99] : memref<448x32xf32, #tpu.memory_space<vmem>>, vector<448x32xf32>
    %cst_100 = arith.constant dense<0.000000e+00> : vector<8x32xf32>
    %111 = tpu.matmul %109, %110, %cst_100 {dimension_numbers = #tpu.dot_dimension_numbers<[1], [0], [0], [1], [0, 0, 1, 1], [], []>} : vector<8x448xf32>, vector<448x32xf32>, vector<8x32xf32> -> vector<8x32xf32>
    %c0_101 = arith.constant 0 : index
    %c0_102 = arith.constant 0 : index
    %112 = vector.load %arg15[%c0_101, %c0_102] : memref<1x32xf32, #tpu.memory_space<vmem>>, vector<1x32xf32>
    %113 = vector.broadcast %112 : vector<1x32xf32> to vector<8x32xf32>
    %114 = arith.addf %111, %113 : vector<8x32xf32>
    %c1_103 = arith.constant 1 : index
    %c0_104 = arith.constant 0 : index
    %c0_105 = arith.constant 0 : index
    %115 = vector.load %arg16[%c1_103, %c0_104, %c0_105] : memref<2x32x128xf32, #tpu.memory_space<vmem>>, vector<1x32x128xf32>
    %116 = vector.shape_cast %115 : vector<1x32x128xf32> to vector<32x128xf32>
    %cst_106 = arith.constant dense<0.000000e+00> : vector<8x128xf32>
    %117 = tpu.matmul %114, %116, %cst_106 {dimension_numbers = #tpu.dot_dimension_numbers<[1], [0], [0], [1], [0, 0, 1, 1], [], []>} : vector<8x32xf32>, vector<32x128xf32>, vector<8x128xf32> -> vector<8x128xf32>
    %118 = arith.addf %58, %117 : vector<8x128xf32>
    %c0_107 = arith.constant 0 : index
    %c0_108 = arith.constant 0 : index
    %119 = vector.load %arg17[%c0_107, %c0_108] : memref<1x128xf32, #tpu.memory_space<vmem>>, vector<1x128xf32>
    %120 = vector.broadcast %119 : vector<1x128xf32> to vector<8x128xf32>
    %121 = arith.addf %118, %120 : vector<8x128xf32>
    %cst_109 = arith.constant 0.000000e+00 : f32
    %122 = vector.broadcast %cst_109 : f32 to vector<8x128xf32>
    %123 = arith.maximumf %121, %122 : vector<8x128xf32>
    %c0_110 = arith.constant 0 : index
    %c0_111 = arith.constant 0 : index
    %124 = vector.load %arg18[%c0_110, %c0_111] : memref<128x128xf32, #tpu.memory_space<vmem>>, vector<128x128xf32>
    %cst_112 = arith.constant dense<0.000000e+00> : vector<8x128xf32>
    %125 = tpu.matmul %123, %124, %cst_112 {dimension_numbers = #tpu.dot_dimension_numbers<[1], [0], [0], [1], [0, 0, 1, 1], [], []>} : vector<8x128xf32>, vector<128x128xf32>, vector<8x128xf32> -> vector<8x128xf32>
    %c0_113 = arith.constant 0 : index
    %c0_114 = arith.constant 0 : index
    %126 = vector.load %arg19[%c0_113, %c0_114] : memref<1x128xf32, #tpu.memory_space<vmem>>, vector<1x128xf32>
    %127 = vector.broadcast %126 : vector<1x128xf32> to vector<8x128xf32>
    %128 = arith.addf %125, %127 : vector<8x128xf32>
    %cst_115 = arith.constant 0.000000e+00 : f32
    %129 = vector.broadcast %cst_115 : f32 to vector<8x128xf32>
    %130 = arith.maximumf %128, %129 : vector<8x128xf32>
    %c0_116 = arith.constant 0 : index
    %c0_117 = arith.constant 0 : index
    %131 = vector.load %arg20[%c0_116, %c0_117] : memref<128x128xf32, #tpu.memory_space<vmem>>, vector<128x128xf32>
    %cst_118 = arith.constant dense<0.000000e+00> : vector<8x128xf32>
    %132 = tpu.matmul %130, %131, %cst_118 {dimension_numbers = #tpu.dot_dimension_numbers<[1], [0], [0], [1], [0, 0, 1, 1], [], []>} : vector<8x128xf32>, vector<128x128xf32>, vector<8x128xf32> -> vector<8x128xf32>
    %c0_119 = arith.constant 0 : index
    %c0_120 = arith.constant 0 : index
    %133 = vector.load %arg21[%c0_119, %c0_120] : memref<1x128xf32, #tpu.memory_space<vmem>>, vector<1x128xf32>
    %134 = vector.broadcast %133 : vector<1x128xf32> to vector<8x128xf32>
    %135 = arith.addf %132, %134 : vector<8x128xf32>
    %c0_121 = arith.constant 0 : index
    %c0_122 = arith.constant 0 : index
    %136 = vector.load %arg22[%c0_121, %c0_122] : memref<8x128xf32, #tpu.memory_space<vmem>>, vector<8x128xf32>
    tpu.vector_store %arg22[%c0_121, %c0_122], %135 {strides = array<i32>} : memref<8x128xf32, #tpu.memory_space<vmem>>, vector<8x128xf32>,
    return
  }
  func.func @transform_0(%arg0: i32) -> (i32, i32, i32, i32) {
    %c0_i32 = arith.constant 0 : i32
    %c0_i32_0 = arith.constant 0 : i32
    %c0_i32_1 = arith.constant 0 : i32
    %c0_i32_2 = arith.constant 0 : i32
    return %arg0, %c0_i32, %c0_i32_0, %c0_i32_1 : i32, i32, i32, i32
  }
  func.func @transform_1(%arg0: i32) -> (i32, i32) {
    %c0_i32 = arith.constant 0 : i32
    %c0_i32_0 = arith.constant 0 : i32
    %c0_i32_1 = arith.constant 0 : i32
    return %c0_i32, %c0_i32_0 : i32, i32
  }
  func.func @transform_2(%arg0: i32) -> (i32, i32) {
    %c0_i32 = arith.constant 0 : i32
    %c0_i32_0 = arith.constant 0 : i32
    %c0_i32_1 = arith.constant 0 : i32
    return %c0_i32, %c0_i32_0 : i32, i32
  }
  func.func @transform_3(%arg0: i32) -> (i32, i32) {
    %c0_i32 = arith.constant 0 : i32
    %c0_i32_0 = arith.constant 0 : i32
    %c0_i32_1 = arith.constant 0 : i32
    return %c0_i32, %c0_i32_0 : i32, i32
  }
  func.func @transform_4(%arg0: i32) -> (i32, i32) {
    %c0_i32 = arith.constant 0 : i32
    %c0_i32_0 = arith.constant 0 : i32
    %c0_i32_1 = arith.constant 0 : i32
    return %c0_i32, %c0_i32_0 : i32, i32
  }
  func.func @transform_5(%arg0: i32) -> (i32, i32) {
    %c0_i32 = arith.constant 0 : i32
    %c0_i32_0 = arith.constant 0 : i32
    %c0_i32_1 = arith.constant 0 : i32
    return %c0_i32, %c0_i32_0 : i32, i32
  }
  func.func @transform_6(%arg0: i32) -> (i32, i32) {
    %c0_i32 = arith.constant 0 : i32
    %c0_i32_0 = arith.constant 0 : i32
    %c0_i32_1 = arith.constant 0 : i32
    return %c0_i32, %c0_i32_0 : i32, i32
  }
  func.func @transform_7(%arg0: i32) -> (i32, i32) {
    %c0_i32 = arith.constant 0 : i32
    %c0_i32_0 = arith.constant 0 : i32
    %c0_i32_1 = arith.constant 0 : i32
    return %c0_i32, %c0_i32_0 : i32, i32
  }
  func.func @transform_8(%arg0: i32) -> (i32, i32) {
    %c0_i32 = arith.constant 0 : i32
    %c0_i32_0 = arith.constant 0 : i32
    %c0_i32_1 = arith.constant 0 : i32
    return %c0_i32, %c0_i32_0 : i32, i32
  }
  func.func @transform_9(%arg0: i32) -> (i32, i32) {
    %c0_i32 = arith.constant 0 : i32
    %c0_i32_0 = arith.constant 0 : i32
    %c0_i32_1 = arith.constant 0 : i32
    return %c0_i32, %c0_i32_0 : i32, i32
  }
  func.func @transform_10(%arg0: i32) -> (i32, i32) {
    %c0_i32 = arith.constant 0 : i32
    %c0_i32_0 = arith.constant 0 : i32
    %c0_i32_1 = arith.constant 0 : i32
    return %c0_i32, %c0_i32_0 : i32, i32
  }
  func.func @transform_11(%arg0: i32) -> (i32, i32) {
    %c0_i32 = arith.constant 0 : i32
    %c0_i32_0 = arith.constant 0 : i32
    %c0_i32_1 = arith.constant 0 : i32
    return %c0_i32, %c0_i32_0 : i32, i32
  }
  func.func @transform_12(%arg0: i32) -> (i32, i32) {
    %c0_i32 = arith.constant 0 : i32
    %c0_i32_0 = arith.constant 0 : i32
    %c0_i32_1 = arith.constant 0 : i32
    return %c0_i32, %c0_i32_0 : i32, i32
  }
  func.func @transform_13(%arg0: i32) -> (i32, i32) {
    %c0_i32 = arith.constant 0 : i32
    %c0_i32_0 = arith.constant 0 : i32
    %c0_i32_1 = arith.constant 0 : i32
    return %c0_i32, %c0_i32_0 : i32, i32
  }
  func.func @transform_14(%arg0: i32) -> (i32, i32) {
    %c0_i32 = arith.constant 0 : i32
    %c0_i32_0 = arith.constant 0 : i32
    %c0_i32_1 = arith.constant 0 : i32
    return %c0_i32, %c0_i32_0 : i32, i32
  }
  func.func @transform_15(%arg0: i32) -> (i32, i32, i32) {
    %c0_i32 = arith.constant 0 : i32
    %c0_i32_0 = arith.constant 0 : i32
    %c0_i32_1 = arith.constant 0 : i32
    %c0_i32_2 = arith.constant 0 : i32
    return %c0_i32, %c0_i32_0, %c0_i32_1 : i32, i32, i32
  }
  func.func @transform_16(%arg0: i32) -> (i32, i32) {
    %c0_i32 = arith.constant 0 : i32
    %c0_i32_0 = arith.constant 0 : i32
    %c0_i32_1 = arith.constant 0 : i32
    return %c0_i32, %c0_i32_0 : i32, i32
  }
  func.func @transform_17(%arg0: i32) -> (i32, i32) {
    %c0_i32 = arith.constant 0 : i32
    %c0_i32_0 = arith.constant 0 : i32
    %c0_i32_1 = arith.constant 0 : i32
    return %c0_i32, %c0_i32_0 : i32, i32
  }
  func.func @transform_18(%arg0: i32) -> (i32, i32) {
    %c0_i32 = arith.constant 0 : i32
    %c0_i32_0 = arith.constant 0 : i32
    %c0_i32_1 = arith.constant 0 : i32
    return %c0_i32, %c0_i32_0 : i32, i32
  }
  func.func @transform_19(%arg0: i32) -> (i32, i32) {
    %c0_i32 = arith.constant 0 : i32
    %c0_i32_0 = arith.constant 0 : i32
    %c0_i32_1 = arith.constant 0 : i32
    return %c0_i32, %c0_i32_0 : i32, i32
  }
  func.func @transform_20(%arg0: i32) -> (i32, i32) {
    %c0_i32 = arith.constant 0 : i32
    %c0_i32_0 = arith.constant 0 : i32
    %c0_i32_1 = arith.constant 0 : i32
    return %c0_i32, %c0_i32_0 : i32, i32
  }
  func.func @transform_21(%arg0: i32) -> (i32, i32) {
    %c0_i32 = arith.constant 0 : i32
    %c0_i32_0 = arith.constant 0 : i32
    return %arg0, %c0_i32 : i32, i32
  }
}

</mosaic_0001>

<bundles_post_ra>
// kernel: tpu_custom_call.1
= control target key start
LH: loop header
LB: loop body
LE: loop exit
PB: predicated region body
PF: predicated region fallthrough
CT: control target
= control target key end

     0   :  { %s7562_s0 = inlined_call_operand.vmem [shape: f32[2,2,136,4], index: 0, kind: input, shape index: {}]   ;;  %s7563_s1 = inlined_call_operand.vmem [shape: f32[136,1], index: 1, kind: input, shape index: {}]   ;;  %s7564_s2 = inlined_call_operand.vmem [shape: f32[136,1], index: 2, kind: input, shape index: {}]   ;;  %s7565_s3 = inlined_call_operand.vmem [shape: f32[12,32], index: 3, kind: input, shape index: {}]   ;;  %s7566_s4 = inlined_call_operand.vmem [shape: f32[1,32], index: 4, kind: input, shape index: {}]   ;;  %s7567_s5 = inlined_call_operand.vmem [shape: f32[96,32], index: 5, kind: input, shape index: {}]   ;;  %s7568_s6 = inlined_call_operand.vmem [shape: f32[1,32], index: 6, kind: input, shape index: {}]   ;;  %s7569_s7 = inlined_call_operand.vmem [shape: f32[448,32], index: 7, kind: input, shape index: {}]   ;;  %s7570_s8 = inlined_call_operand.vmem [shape: f32[1,32], index: 8, kind: input, shape index: {}]   ;;  %s7571_s9 = inlined_call_operand.vmem [shape: f32[12,32], index: 9, kind: input, shape index: {}]   ;;  %s7572_s10 = inlined_call_operand.vmem [shape: f32[1,32], index: 10, kind: input, shape index: {}]   ;;  %s7573_s11 = inlined_call_operand.vmem [shape: f32[96,32], index: 11, kind: input, shape index: {}]   ;;  %s7574_s12 = inlined_call_operand.vmem [shape: f32[1,32], index: 12, kind: input, shape index: {}]   ;;  %s7575_s13 = inlined_call_operand.vmem [shape: f32[448,32], index: 13, kind: input, shape index: {}]   ;;  %s7576_s14 = inlined_call_operand.vmem [shape: f32[1,32], index: 14, kind: input, shape index: {}]   ;;  %s7577_s15 = inlined_call_operand.vmem [shape: f32[2,32,128], index: 15, kind: input, shape index: {}]   ;;  %s7578_s16 = inlined_call_operand.vmem [shape: f32[1,128], index: 16, kind: input, shape index: {}]   ;;  %s7579_s17 = inlined_call_operand.vmem [shape: f32[128,128], index: 17, kind: input, shape index: {}]   ;;  %s7580_s18 = inlined_call_operand.vmem [shape: f32[1,128], index: 18, kind: input, shape index: {}]   ;;  %s7581_s19 = inlined_call_operand.vmem [shape: f32[128,128], index: 19, kind: input, shape index: {}]   ;;  %s7582_s20 = inlined_call_operand.vmem [shape: f32[1,128], index: 20, kind: input, shape index: {}]   ;;  %s7583_s21 = inlined_call_operand.hbm [shape: f32[16,128], index: 21, kind: output, shape index: {}]  }
   0x1   :  { %7607 = sst [smem:[#allocation12_spill]] %s7562_s0 }
   0x2   :  { %7608 = sst [smem:[#allocation13_spill]] %s7563_s1 }
   0x3   :  { %7609 = sst [smem:[#allocation14_spill]] %s7564_s2 }
   0x4   :  { %7610 = sst [smem:[#allocation15_spill]] %s7565_s3 }
   0x5   :  { %7611 = sst [smem:[#allocation16_spill]] %s7566_s4 }
   0x6   :  { %7612 = sst [smem:[#allocation17_spill]] %s7567_s5 }
   0x7   :  { %7613 = sst [smem:[#allocation18_spill]] %s7568_s6 }
   0x8   :  { %7614 = sst [smem:[#allocation19_spill]] %s7569_s7 }
   0x9   :  { %7615 = sst [smem:[#allocation20_spill]] %s7582_s20 }
   0xa   :  { %7616 = sst [smem:[#allocation21_spill]] %s7583_s21 }
   0xb   :  { %26 = vsyncpa [#allocation4], 0 }
   0xc   :  { %28 = vsyncpa [#allocation4 + $0x1], 0  ;;  %s5267_s2 = smov 0   ;;  %s5269_s25 = smov 0  }
   0xd   :  { %s5271_s26 = smov 0   ;;  %s5273_s27 = smov 0  }
   0xe LB: > { %7617 = sst [smem:[#allocation6_spill]] %s5134_s2  ;;  %s5288_s3 = sadd.s32 4294967295, %s5146_s27   ;;  %s5146_s27 = sphi %s5273_s27, %s7644_s27   ;;  %s5142_s26 = sphi %s5271_s26, %s7646_s26   ;;  %s5138_s25 = sphi %s5269_s25, %s7648_s25   ;;  %s5134_s2 = sphi %s5267_s2, %s7647_s2  }
   0xf   : > { %7618 = sst [smem:[#allocation7_spill]] %s5142_s26  ;;  %s4329_s28 = sadd.s32 4294967294, %s5146_s27  }
  0x10   : > { %7619 = sst [smem:[#allocation8_spill]] %s5146_s27  ;;  %s5292_s29 = sadd.s32 1, %s5146_s27  }
  0x11   : > { %7620 = sst [smem:[#allocation9_spill]] %s5292_s29  ;;  %s487_s0 = sadd.s32 1, %s5142_s26 }
  0x12   : > { %s484_s4 = ssub.s32 %s5146_s27, %s5292_s29  ;;  %p497_p0 = scmp.ne.s32.totalorder %s5142_s26, %s5138_s25 }
  0x13   : > { %p485_p1 = scmp.eq.s32.totalorder %s484_s4, 0  ;;  %p498_p2 = scmp.eq.s32.totalorder %s5288_s3, 1 }
  0x14   : > { %p503_p3 = scmp.ne.s32.totalorder %s5138_s25, %s5134_s2  ;;  %p504_p4 = scmp.eq.s32.totalorder %s4329_s28, 1 }
  0x15   : > { %s5303_s30 = scalar_select %p485_p1, %s5142_s26, %s487_s0  }
  0x16   : > { %p5305_p5 = por %p498_p2, %p497_p0  ;;  %p5309_p6 = por %p504_p4, %p503_p3 }
  0x17   : > { %7621 = sst [smem:[#allocation10_spill]] %s5303_s30  ;;  %p4332_p7 = scmp.ge.s32.totalorder %s5146_s27, 1 }
  0x18   : > { %s7623_s22 = scalar_select %p5309_p6, 1, 0 }
  0x19   : > { %p590_p8 = scmp.lt.s32.totalorder %s5146_s27, 3 }
  0x1a   : > { %7624 = sst [smem:[#allocation11_spill]] %s7623_s22 }
  0x1b   : > { %p591_p9 = pnand %p4332_p7, %p590_p8 }
  0x1c   : > { %p650_p10 = scmp.lt.s32.totalorder (!%p591_p9), %s5288_s3, 1  ;;  %s7625_s28 = sld [smem:[#allocation15_spill]] (!%p591_p9) }
  0x1d   : > { %594 = sbr.rel (%p591_p9) target bundleno = 2432 (0x980), region = 104  ;;  %s7626_s22 = sld [smem:[#allocation12_spill]] (!%p591_p9) }
  0x1e   : > { %s7595_s26 = smov (!%p591_p9), 8   ;;  %s7597_s29 = smov (!%p591_p9), 4  }
  0x1f   : > { %s7628_s27 = sld [smem:[#allocation17_spill]] (!%p591_p9)  ;;  %s7602_s4 = smov (!%p591_p9), 64  }
  0x20   : > { %s7630_s24 = sld [smem:[#allocation16_spill]] (!%p591_p9)  ;;  %s7634_s21 = smov (!%p591_p9), 4  }
  0x21   : > { %s7631_s30 = sld [smem:[#allocation14_spill]] (!%p591_p9) }
  0x22   : > { %v5148_v0 = vmov 0.0   ;;  %s651_s23 = scalar_select %p650_p10, %s5288_s3, 1  ;;  %v907_v1 = vld [vmem:[%s7625_s28 + $0x8] sm:$0xf]  ;;  %vm1004_vm0 = vcmask 1043456   ;;  %v906_v2 = vld [vmem:[%s7625_s28] sm:$0xff] }
  0x23   : > { %4653 = vmatprep.subr.mxu0 %v5148_v0  ;;  %4708 = vmatprep.subr.mxu1 %v5148_v0  ;;  %v5333_v3 = vrot.slane %v5148_v0, 1  ;;  %vm5149_vm1 = vmmov 0   ;;  %vm690_vm2 = vcmask 1046528   ;;  %vm780_vm3 = vcmask 1045504   ;;  %s7635_s6 = sld [smem:[#allocation18_spill]] }
  0x24   : > { %s5005_s0 = smul.u32 272, %s651_s23  ;;  %4654 = vmatpush3.msk.msra.mxu0 %vm1004_vm0, %v907_v1  ;;  %4657 = vmatprep.mubr.msk.f32.mxu0 %vm5149_vm1, %v5148_v0  ;;  %v5152_v1 = vmov 0   ;;  %s7627_s23 = sld [smem:[#allocation13_spill]]  ;;  %vm868_vm4 = vcmask 31744   ;;  %vm887_vm5 = vcmask 64512   ;;  %vm933_vm6 = vcmask 1041408  }
  0x25   : > { %4655 = vmatprep.subr.mxu0 %v5148_v0  ;;  %4732 = vmatprep.mubr.msk.f32.mxu1 %vm5149_vm1, %v5148_v0  ;;  %vm969_vm7 = vcmask 97280   ;;  %s7629_s28 = smov %s7628_s27  ;;  %vm1487_vm8 = vcmask 261120   ;;  %vm1506_vm9 = vcmask 523264   ;;  %vm1597_vm10 = vcmask 785408   ;;  %s7636_s7 = sld [smem:[#allocation19_spill]] }
  0x26   : > { %s5330_s2 = scalar_lea.vmem %s7626_s22, %s5005_s0  ;;  %4656 = vmatpush3.msra.mxu0 %v906_v2  ;;  %5054 = vset.pattern.permute.xlu1 %v5152_v1  ;;  %s7605_s22 = smov 96  }
  0x27   : > { %v5338_v4 = vld [vmem:[%s5330_s2] sm:$0xff]  ;;  %v5341_v5 = vld [vmem:[%s5330_s2 + $0x8] sm:$0xff]  ;;  %v5350_v10 = vld [vmem:[%s5330_s2 + $0x10] sm:$0xff]  ;;  %5053 = vset.pattern.permute.xlu0 %v5152_v1  ;;  %s7639_s1 = sld [smem:[#allocation20_spill]] }
  0x28   : > { %v692_v6 = vrot.slane %v5338_v4, 1  ;;  %v781_v7 = vrot.slane %v5338_v4, 2  ;;  %v694_v8 = vrot.slane %v5341_v5, 1  ;;  %v782_v9 = vrot.slane %v5341_v5, 2  ;;  %v5361_v16 = vld [vmem:[%s5330_s2 + $0x18] sm:$0xff]  ;;  %v5370_v21 = vld [vmem:[%s5330_s2 + $0x20] sm:$0xff] }
  0x29   : > { %v784_v13 = vrot.slane %v5350_v10, 2  ;;  %v696_v15 = vrot.slane %v5350_v10, 1  ;;  %v786_v18 = vrot.slane %v5361_v16, 2  ;;  %v698_v20 = vrot.slane %v5361_v16, 1  ;;  %v5379_v26 = vld [vmem:[%s5330_s2 + $0x28] sm:$0xff]  ;;  %v5388_v31 = vld [vmem:[%s5330_s2 + $0x30] sm:$0xff] }
  0x2a   : > { %v693_v11 = vsel %vm690_vm2, %v5333_v3, %v692_v6  ;;  %814 = vrot.lane.b32.xlu1 %v781_v7, %s7595_s26  ;;  %v783_v12 = vsel %vm780_vm3, %v781_v7, %v782_v9  ;;  %v695_v14 = vsel %vm690_vm2, %v692_v6, %v694_v8  ;;  %v788_v23 = vrot.slane %v5370_v21, 2  ;;  %v5397_v36 = vld [vmem:[%s5330_s2 + $0x38] sm:$0xff]  ;;  %v5406_v41 = vld [vmem:[%s5330_s2 + $0x40] sm:$0xff]  ;;  %v5415_v46 = vld [vmem:[%s5330_s2 + $0x48] sm:$0xff] }
  0x2b   : > { %726 = vrot.lane.b32.xlu0 %v693_v11, %s7597_s29  ;;  %v785_v17 = vsel %vm780_vm3, %v782_v9, %v784_v13  ;;  %v697_v19 = vsel %vm690_vm2, %v694_v8, %v696_v15  ;;  %v787_v22 = vsel %vm780_vm3, %v784_v13, %v786_v18  ;;  %v699_v24 = vsel %vm690_vm2, %v696_v15, %v698_v20  ;;  %v5424_v51 = vld [vmem:[%s5330_s2 + $0x50] sm:$0xff]  ;;  %v5433_v56 = vld [vmem:[%s5330_s2 + $0x58] sm:$0xff]  ;;  %v5442_v61 = vld [vmem:[%s5330_s2 + $0x60] sm:$0xff] }
  0x2c   : > { %v700_v25 = vrot.slane %v5370_v21, 1  ;;  %v789_v27 = vsel %vm780_vm3, %v786_v18, %v788_v23  ;;  %v790_v28 = vrot.slane %v5379_v26, 2  ;;  %v702_v30 = vrot.slane %v5379_v26, 1  ;;  %v5451_v7 = vld [vmem:[%s5330_s2 + $0x68] sm:$0xff]  ;;  %v5460_v13 = vld [vmem:[%s5330_s2 + $0x70] sm:$0xff] }
  0x2d   : > { %v792_v33 = vrot.slane %v5388_v31, 2  ;;  %v704_v35 = vrot.slane %v5388_v31, 1  ;;  %v794_v38 = vrot.slane %v5397_v36, 2  ;;  %v706_v40 = vrot.slane %v5397_v36, 1 }
  0x2e   : > { %816 = vrot.lane.b32.xlu1 %v783_v12, %s7595_s26  ;;  %v701_v29 = vsel %vm690_vm2, %v698_v20, %v700_v25  ;;  %v791_v32 = vsel %vm780_vm3, %v788_v23, %v790_v28  ;;  %v703_v34 = vsel %vm690_vm2, %v700_v25, %v702_v30  ;;  %v796_v43 = vrot.slane %v5406_v41, 2  ;;  %v5478_v25 = vld [vmem:[%s5330_s2 + $0x80] sm:$0xff] }
  0x2f   : > { %728 = vrot.lane.b32.xlu0 %v695_v14, %s7597_s29  ;;  %v793_v37 = vsel %vm780_vm3, %v790_v28, %v792_v33  ;;  %v705_v39 = vsel %vm690_vm2, %v702_v30, %v704_v35  ;;  %v795_v42 = vsel %vm780_vm3, %v792_v33, %v794_v38  ;;  %v707_v44 = vsel %vm690_vm2, %v704_v35, %v706_v40  ;;  %v1175_v35 = vld [vmem:[%s7627_s23] sm:$0xff] }
  0x30   : > { %v708_v45 = vrot.slane %v5406_v41, 1  ;;  %v797_v47 = vsel %vm780_vm3, %v794_v38, %v796_v43  ;;  %v798_v48 = vrot.slane %v5415_v46, 2  ;;  %v710_v50 = vrot.slane %v5415_v46, 1  ;;  %v1178_v38 = vld [vmem:[%s7627_s23 + $0x18] sm:$0xff] }
  0x31   : > { %v800_v53 = vrot.slane %v5424_v51, 2  ;;  %v712_v55 = vrot.slane %v5424_v51, 1  ;;  %v802_v58 = vrot.slane %v5433_v56, 2  ;;  %v714_v60 = vrot.slane %v5433_v56, 1 }
  0x32   : > { %818 = vrot.lane.b32.xlu1 %v785_v17, %s7595_s26  ;;  %v709_v49 = vsel %vm690_vm2, %v706_v40, %v708_v45  ;;  %v799_v52 = vsel %vm780_vm3, %v796_v43, %v798_v48  ;;  %v711_v54 = vsel %vm690_vm2, %v708_v45, %v710_v50  ;;  %v804_v63 = vrot.slane %v5442_v61, 2  ;;  %v1180_v40 = vld [vmem:[%s7627_s23 + $0x28] sm:$0xff]  ;;  %v1182_v43 = vld [vmem:[%s7627_s23 + $0x38] sm:$0xff] }
  0x33   : > { %730 = vrot.lane.b32.xlu0 %v697_v19, %s7597_s29  ;;  %v801_v57 = vsel %vm780_vm3, %v798_v48, %v800_v53  ;;  %v713_v59 = vsel %vm690_vm2, %v710_v50, %v712_v55  ;;  %v803_v62 = vsel %vm780_vm3, %v800_v53, %v802_v58  ;;  %v715_v2 = vsel %vm690_vm2, %v712_v55, %v714_v60  ;;  %v5469_v19 = vld [vmem:[%s5330_s2 + $0x78] sm:$0xff]  ;;  %v1184_v45 = vld [vmem:[%s7627_s23 + $0x48] sm:$0xff] }
  0x34   : > { %v716_v6 = vrot.slane %v5442_v61, 1  ;;  %v805_v8 = vsel %vm780_vm3, %v802_v58, %v804_v63  ;;  %v806_v9 = vrot.slane %v5451_v7, 2  ;;  %v718_v12 = vrot.slane %v5451_v7, 1  ;;  %v1186_v48 = vld [vmem:[%s7627_s23 + $0x58] sm:$0xff]  ;;  %v1188_v50 = vld [vmem:[%s7627_s23 + $0x68] sm:$0xff] }
  0x35   : > { %v808_v15 = vrot.slane %v5460_v13, 2  ;;  %v720_v18 = vrot.slane %v5460_v13, 1  ;;  %v812_v28 = vrot.slane %v5478_v25, 2  ;;  %v724_v30 = vrot.slane %v5478_v25, 1  ;;  %v1190_v53 = vld [vmem:[%s7627_s23 + $0x78] sm:$0xff] }
  0x36   : > { %820 = vrot.lane.b32.xlu1 %v787_v22, %s7595_s26  ;;  %v717_v11 = vsel %vm690_vm2, %v714_v60, %v716_v6  ;;  %v807_v14 = vsel %vm780_vm3, %v804_v63, %v806_v9  ;;  %v719_v17 = vsel %vm690_vm2, %v716_v6, %v718_v12  ;;  %v810_v22 = vrot.slane %v5469_v19, 2 }
  0x37   : > { %732 = vrot.lane.b32.xlu0 %v699_v24, %s7597_s29  ;;  %v809_v20 = vsel %vm780_vm3, %v806_v9, %v808_v15  ;;  %v721_v23 = vsel %vm690_vm2, %v718_v12, %v720_v18  ;;  %v722_v24 = vrot.slane %v5469_v19, 1 }
  0x39   : > { %v725_v33 = vsel %vm690_vm2, %v722_v24, %v724_v30 }
  0x3a   : > { %822 = vrot.lane.b32.xlu1 %v789_v27, %s7595_s26  ;;  %v811_v27 = vsel %vm780_vm3, %v808_v15, %v810_v22 }
  0x3b   : > { %734 = vrot.lane.b32.xlu0 %v701_v29, %s7597_s29  ;;  %v723_v29 = vsel %vm690_vm2, %v720_v18, %v722_v24 }
  0x3e   : > { %824 = vrot.lane.b32.xlu1 %v791_v32, %s7595_s26  ;;  %v813_v32 = vsel %vm780_vm3, %v810_v22, %v812_v28 }
  0x3f   : > { %736 = vrot.lane.b32.xlu0 %v703_v34, %s7597_s29  ;;  %v1176_v34 = vld [vmem:[%s7627_s23 + $0x8] sm:$0xff] }
  0x42   : > { %826 = vrot.lane.b32.xlu1 %v793_v37, %s7595_s26  ;;  %v1177_v37 = vld [vmem:[%s7627_s23 + $0x10] sm:$0xff] }
  0x43   : > { %738 = vrot.lane.b32.xlu0 %v705_v39, %s7597_s29  ;;  %v1179_v39 = vld [vmem:[%s7627_s23 + $0x20] sm:$0xff] }
  0x46   : > { %828 = vrot.lane.b32.xlu1 %v795_v42, %s7595_s26  ;;  %v1181_v42 = vld [vmem:[%s7627_s23 + $0x30] sm:$0xff] }
  0x47   : > { %740 = vrot.lane.b32.xlu0 %v707_v44, %s7597_s29  ;;  %v1183_v44 = vld [vmem:[%s7627_s23 + $0x40] sm:$0xff] }
  0x4a   : > { %830 = vrot.lane.b32.xlu1 %v797_v47, %s7595_s26  ;;  %v1185_v47 = vld [vmem:[%s7627_s23 + $0x50] sm:$0xff] }
  0x4b   : > { %742 = vrot.lane.b32.xlu0 %v709_v49, %s7597_s29  ;;  %v1187_v49 = vld [vmem:[%s7627_s23 + $0x60] sm:$0xff] }
  0x4e   : > { %832 = vrot.lane.b32.xlu1 %v799_v52, %s7595_s26  ;;  %v1189_v52 = vld [vmem:[%s7627_s23 + $0x70] sm:$0xff] }
  0x4f   : > { %744 = vrot.lane.b32.xlu0 %v711_v54, %s7597_s29  ;;  %v1191_v54 = vld [vmem:[%s7627_s23 + $0x80] sm:$0xff] }
  0x52   : > { %834 = vrot.lane.b32.xlu1 %v801_v57, %s7595_s26 }
  0x53   : > { %746 = vrot.lane.b32.xlu0 %v713_v59, %s7597_s29 }
  0x56   : > { %836 = vrot.lane.b32.xlu1 %v803_v62, %s7595_s26 }
  0x57   : > { %748 = vrot.lane.b32.xlu0 %v715_v2, %s7597_s29 }
  0x5a   : > { %838 = vrot.lane.b32.xlu1 %v805_v8, %s7595_s26 }
  0x5b   : > { %750 = vrot.lane.b32.xlu0 %v717_v11, %s7597_s29 }
  0x5e   : > { %840 = vrot.lane.b32.xlu1 %v807_v14, %s7595_s26 }
  0x5f   : > { %752 = vrot.lane.b32.xlu0 %v719_v17, %s7597_s29 }
  0x62   : > { %842 = vrot.lane.b32.xlu1 %v809_v20, %s7595_s26 }
  0x63   : > { %754 = vrot.lane.b32.xlu0 %v721_v23, %s7597_s29 }
  0x66   : > { %844 = vrot.lane.b32.xlu1 %v811_v27, %s7595_s26 }
  0x67   : > { %756 = vrot.lane.b32.xlu0 %v723_v29, %s7597_s29 }
  0x6a   : > { %846 = vrot.lane.b32.xlu1 %v813_v32, %s7595_s26 }
  0x6b   : > { %758 = vrot.lane.b32.xlu0 %v725_v33, %s7597_s29 }
  0x6e   : > { %848 = vrot.lane.b32.xlu1 %v812_v28, %s7595_s26  ;;  %s647_s26 = sand.u32 1, %s5138_s25  }
  0x6f   : > { %760 = vrot.lane.b32.xlu0 %v724_v30, %s7597_s29  ;;  %s7637_s29 = smov 8  }
  0x72   : > { %1199 = vperm.xlu1 %5054, %v1176_v34  }
  0x73   : > { %1194 = vperm.xlu0 %5053, %v1175_v35  }
  0x76   : > { %1204 = vperm.xlu1 %5054, %v1177_v37  }
  0x77   : > { %1209 = vperm.xlu0 %5053, %v1178_v38  }
  0x7a   : > { %1214 = vperm.xlu1 %5054, %v1179_v39  }
  0x7b   : > { %1219 = vperm.xlu0 %5053, %v1180_v40  }
  0x7e   : > { %1224 = vperm.xlu1 %5054, %v1181_v42  }
  0x7f   : > { %1229 = vperm.xlu0 %5053, %v1182_v43  }
  0x82   : > { %1234 = vperm.xlu1 %5054, %v1183_v44  }
  0x83   : > { %1239 = vperm.xlu0 %5053, %v1184_v45  }
  0x86   : > { %1244 = vperm.xlu1 %5054, %v1185_v47  }
  0x87   : > { %1249 = vperm.xlu0 %5053, %v1186_v48  }
  0x8a   : > { %1254 = vperm.xlu1 %5054, %v1187_v49  }
  0x8b   : > { %1259 = vperm.xlu0 %5053, %v1188_v50  }
  0x8e   : > { %1264 = vperm.xlu1 %5054, %v1189_v52  }
  0x8f   : > { %1269 = vperm.xlu0 %5053, %v1190_v53  }
  0x92   : > { %1274 = vperm.xlu1 %5054, %v1191_v54  }
  0x9c   : > { %v815_v55 = vpop.permute.xlu1 %814 }
  0x9d   : > { %v727_v57 = vpop.permute.xlu0 %726 }
  0x9e   : > { %v869_v58 = vsel %vm868_vm4, 0.0, %v727_v57 }
  0x9f   : > { %v888_v60 = vsel %vm887_vm5, %v869_v58, %v815_v55 }
  0xa0   : > { %v817_v59 = vpop.permute.xlu1 %816  ;;  %v934_v2 = vrot.slane %v888_v60, 6 }
  0xa1   : > { %v729_v62 = vpop.permute.xlu0 %728 }
  0xa2   : > { %v870_v63 = vsel %vm868_vm4, %v5338_v4, %v729_v62 }
  0xa3   : > { %v889_v1 = vsel %vm887_vm5, %v870_v63, %v817_v59 }
  0xa4   : > { %v935_v6 = vrot.slane %v889_v1, 6  ;;  %v819_v8 = vpop.permute.xlu1 %818 }
  0xa5   : > { %v731_v9 = vpop.permute.xlu0 %730 }
  0xa6   : > { %v871_v11 = vsel %vm868_vm4, %v5341_v5, %v731_v9  ;;  %v936_v12 = vsel %vm933_vm6, %v934_v2, %v935_v6 }
  0xa7   : > { %v890_v14 = vsel %vm887_vm5, %v871_v11, %v819_v8  ;;  %4658 = vmatmul.mubr.msk.f32.vlgmr.msra.gmra.mxu0 %vm969_vm7, %v936_v12 }
  0xa8   : > { %v937_v15 = vrot.slane %v890_v14, 6  ;;  %v821_v17 = vpop.permute.xlu1 %820  ;;  %4660 = vmatprep.mubr.msk.f32.mxu0 %vm5149_vm1, %v5148_v0 }
  0xa9   : > { %v733_v4 = vpop.permute.xlu0 %732 }
  0xaa   : > { %v872_v18 = vsel %vm868_vm4, %v5350_v10, %v733_v4  ;;  %v938_v20 = vsel %vm933_vm6, %v935_v6, %v937_v15 }
  0xab   : > { %v891_v22 = vsel %vm887_vm5, %v872_v18, %v821_v17  ;;  %4661 = vmatmul.mubr.msk.f32.gmra.mxu0 %vm969_vm7, %v938_v20 }
  0xac   : > { %v939_v5 = vrot.slane %v891_v22, 6  ;;  %v823_v23 = vpop.permute.xlu1 %822  ;;  %4663 = vmatprep.mubr.msk.f32.mxu0 %vm5149_vm1, %v5148_v0 }
  0xad   : > { %v735_v24 = vpop.permute.xlu0 %734 }
  0xae   : > { %v873_v27 = vsel %vm868_vm4, %v5361_v16, %v735_v24  ;;  %v940_v28 = vsel %vm933_vm6, %v937_v15, %v939_v5 }
  0xaf   : > { %v892_v29 = vsel %vm887_vm5, %v873_v27, %v823_v23  ;;  %4664 = vmatmul.mubr.msk.f32.gmra.mxu0 %vm969_vm7, %v940_v28 }
  0xb0   : > { %v941_v10 = vrot.slane %v892_v29, 6  ;;  %v825_v30 = vpop.permute.xlu1 %824  ;;  %4666 = vmatprep.mubr.msk.f32.mxu0 %vm5149_vm1, %v5148_v0 }
  0xb1   : > { %v737_v32 = vpop.permute.xlu0 %736 }
  0xb2   : > { %v874_v33 = vsel %vm868_vm4, %v5370_v21, %v737_v32  ;;  %v942_v34 = vsel %vm933_vm6, %v939_v5, %v941_v10 }
  0xb3   : > { %v893_v35 = vsel %vm887_vm5, %v874_v33, %v825_v30  ;;  %4667 = vmatmul.mubr.msk.f32.gmra.mxu0 %vm969_vm7, %v942_v34 }
  0xb4   : > { %v943_v16 = vrot.slane %v893_v35, 6  ;;  %v827_v37 = vpop.permute.xlu1 %826  ;;  %4669 = vmatprep.mubr.msk.f32.mxu0 %vm5149_vm1, %v5148_v0 }
  0xb5   : > { %v739_v38 = vpop.permute.xlu0 %738 }
  0xb6   : > { %v875_v39 = vsel %vm868_vm4, %v5379_v26, %v739_v38  ;;  %v944_v40 = vsel %vm933_vm6, %v941_v10, %v943_v16 }
  0xb7   : > { %v894_v42 = vsel %vm887_vm5, %v875_v39, %v827_v37  ;;  %4670 = vmatmul.mubr.msk.f32.gmra.mxu0 %vm969_vm7, %v944_v40 }
  0xb8   : > { %v945_v21 = vrot.slane %v894_v42, 6  ;;  %v829_v43 = vpop.permute.xlu1 %828  ;;  %4672 = vmatprep.mubr.msk.f32.mxu0 %vm5149_vm1, %v5148_v0 }
  0xb9   : > { %v741_v44 = vpop.permute.xlu0 %740 }
  0xba   : > { %v876_v45 = vsel %vm868_vm4, %v5388_v31, %v741_v44  ;;  %v946_v47 = vsel %vm933_vm6, %v943_v16, %v945_v21 }
  0xbb   : > { %v895_v48 = vsel %vm887_vm5, %v876_v45, %v829_v43  ;;  %4673 = vmatmul.mubr.msk.f32.gmra.mxu0 %vm969_vm7, %v946_v47 }
  0xbc   : > { %v947_v26 = vrot.slane %v895_v48, 6  ;;  %v831_v49 = vpop.permute.xlu1 %830  ;;  %4675 = vmatprep.mubr.msk.f32.mxu0 %vm5149_vm1, %v5148_v0 }
  0xbd   : > { %v743_v50 = vpop.permute.xlu0 %742 }
  0xbe   : > { %v877_v52 = vsel %vm868_vm4, %v5397_v36, %v743_v50  ;;  %v948_v53 = vsel %vm933_vm6, %v945_v21, %v947_v26  ;;  %v1534_v50 = vld [vmem:[%s7629_s28 + $0x48] sm:$0xff] }
  0xbf   : > { %v896_v54 = vsel %vm887_vm5, %v877_v52, %v831_v49  ;;  %4676 = vmatmul.mubr.msk.f32.gmra.mxu0 %vm969_vm7, %v948_v53  ;;  %v1536_v49 = vld [vmem:[%s7628_s27 + $0x58] sm:$0xff]  ;;  %v1533_v52 = vld [vmem:[%s7629_s28 + $0x40] sm:$0xff]  ;;  %s7599_s27 = smov 32  }
  0xc0   : > { %v949_v31 = vrot.slane %v896_v54, 6  ;;  %v833_v55 = vpop.permute.xlu1 %832  ;;  %4678 = vmatprep.mubr.msk.f32.mxu0 %vm5149_vm1, %v5148_v0  ;;  %4709 = vmatpush3.msra.mxu1 %v1536_v49  ;;  %v1532_v53 = vld [vmem:[%s7629_s28 + $0x38] sm:$0xff]  ;;  %v1531_v54 = vld [vmem:[%s7629_s28 + $0x30] sm:$0xff] }
  0xc1   : > { %v745_v57 = vpop.permute.xlu0 %744  ;;  %4710 = vmatprep.subr.mxu1 %v5148_v0 }
  0xc2   : > { %v878_v58 = vsel %vm868_vm4, %v5406_v41, %v745_v57  ;;  %v950_v59 = vsel %vm933_vm6, %v947_v26, %v949_v31  ;;  %v1529_v57 = vld [vmem:[%s7629_s28 + $0x20] sm:$0xff] }
  0xc3   : > { %v897_v60 = vsel %vm887_vm5, %v878_v58, %v833_v55  ;;  %4679 = vmatmul.mubr.msk.f32.gmra.mxu0 %vm969_vm7, %v950_v59  ;;  %v5694_v55 = vld [vmem:[%s7630_s24] ss:$0 sm:$0xff]  ;;  %s7638_s24 = smov 96  }
  0xc4   : > { %v951_v36 = vrot.slane %v897_v60, 6  ;;  %v835_v62 = vpop.permute.xlu1 %834  ;;  %4681 = vmatprep.mubr.msk.f32.mxu0 %vm5149_vm1, %v5148_v0  ;;  %v1528_v60 = vld [vmem:[%s7629_s28 + $0x18] sm:$0xff] }
  0xc5   : > { %v747_v63 = vpop.permute.xlu0 %746 }
  0xc6   : > { %v879_v1 = vsel %vm868_vm4, %v5415_v46, %v747_v63  ;;  %v952_v2 = vsel %vm933_vm6, %v949_v31, %v951_v36  ;;  %v1530_v31 = vld [vmem:[%s7629_s28 + $0x28] sm:$0xff] }
  0xc7   : > { %v898_v6 = vsel %vm887_vm5, %v879_v1, %v835_v62  ;;  %4682 = vmatmul.mubr.msk.f32.gmra.mxu0 %vm969_vm7, %v952_v2  ;;  %v1527_v62 = vld [vmem:[%s7629_s28 + $0x10] sm:$0xff] }
  0xc8   : > { %v953_v41 = vrot.slane %v898_v6, 6  ;;  %v837_v8 = vpop.permute.xlu1 %836  ;;  %4684 = vmatprep.mubr.msk.f32.mxu0 %vm5149_vm1, %v5148_v0 }
  0xc9   : > { %v749_v9 = vpop.permute.xlu0 %748 }
  0xca   : > { %v880_v11 = vsel %vm868_vm4, %v5424_v51, %v749_v9  ;;  %v954_v12 = vsel %vm933_vm6, %v951_v36, %v953_v41 }
  0xcb   : > { %v899_v14 = vsel %vm887_vm5, %v880_v11, %v837_v8  ;;  %4685 = vmatmul.mubr.msk.f32.gmra.mxu0 %vm969_vm7, %v954_v12  ;;  %v1526_v8 = vld [vmem:[%s7629_s28 + $0x8] sm:$0xff]  ;;  %v1525_v12 = vld [vmem:[%s7629_s28] sm:$0xff] }
  0xcc   : > { %v955_v46 = vrot.slane %v899_v14, 6  ;;  %v839_v15 = vpop.permute.xlu1 %838  ;;  %4687 = vmatprep.mubr.msk.f32.mxu0 %vm5149_vm1, %v5148_v0 }
  0xcd   : > { %v751_v17 = vpop.permute.xlu0 %750 }
  0xce   : > { %v881_v4 = vsel %vm868_vm4, %v5433_v56, %v751_v17  ;;  %v956_v18 = vsel %vm933_vm6, %v953_v41, %v955_v46  ;;  %v5722_v17 = vrot.slane %v5148_v0, 2 }
  0xcf   : > { %v900_v20 = vsel %vm887_vm5, %v881_v4, %v839_v15  ;;  %4688 = vmatmul.mubr.msk.f32.gmra.mxu0 %vm969_vm7, %v956_v18 }
  0xd0   : > { %v957_v51 = vrot.slane %v900_v20, 6  ;;  %v841_v22 = vpop.permute.xlu1 %840  ;;  %4690 = vmatprep.mubr.msk.f32.mxu0 %vm5149_vm1, %v5148_v0 }
  0xd1   : > { %v753_v5 = vpop.permute.xlu0 %752 }
  0xd2   : > { %v882_v23 = vsel %vm868_vm4, %v5442_v61, %v753_v5  ;;  %v958_v24 = vsel %vm933_vm6, %v955_v46, %v957_v51 }
  0xd3   : > { %v901_v27 = vsel %vm887_vm5, %v882_v23, %v841_v22  ;;  %4691 = vmatmul.mubr.msk.f32.gmra.mxu0 %vm969_vm7, %v958_v24 }
  0xd4   : > { %v959_v56 = vrot.slane %v901_v27, 6  ;;  %v843_v28 = vpop.permute.xlu1 %842  ;;  %4693 = vmatprep.mubr.msk.f32.mxu0 %vm5149_vm1, %v5148_v0 }
  0xd5   : > { %v755_v29 = vpop.permute.xlu0 %754 }
  0xd6   : > { %v883_v10 = vsel %vm868_vm4, %v5451_v7, %v755_v29  ;;  %v960_v30 = vsel %vm933_vm6, %v957_v51, %v959_v56 }
  0xd7   : > { %v902_v32 = vsel %vm887_vm5, %v883_v10, %v843_v28  ;;  %4694 = vmatmul.mubr.msk.f32.gmra.mxu0 %vm969_vm7, %v960_v30 }
  0xd8   : > { %v961_v61 = vrot.slane %v902_v32, 6  ;;  %v845_v33 = vpop.permute.xlu1 %844  ;;  %4696 = vmatprep.mubr.msk.f32.mxu0 %vm5149_vm1, %v5148_v0 }
  0xd9   : > { %v757_v34 = vpop.permute.xlu0 %756 }
  0xda   : > { %v884_v35 = vsel %vm868_vm4, %v5460_v13, %v757_v34  ;;  %v962_v16 = vsel %vm933_vm6, %v959_v56, %v961_v61 }
  0xdb   : > { %v903_v37 = vsel %vm887_vm5, %v884_v35, %v845_v33  ;;  %4697 = vmatmul.mubr.msk.f32.gmra.mxu0 %vm969_vm7, %v962_v16 }
  0xdc   : > { %v963_v7 = vrot.slane %v903_v37, 6  ;;  %v847_v38 = vpop.permute.xlu1 %846  ;;  %4699 = vmatprep.mubr.msk.f32.mxu0 %vm5149_vm1, %v5148_v0 }
  0xdd   : > { %v759_v39 = vpop.permute.xlu0 %758 }
  0xde   : > { %v885_v40 = vsel %vm868_vm4, %v5469_v19, %v759_v39  ;;  %v964_v42 = vsel %vm933_vm6, %v961_v61, %v963_v7 }
  0xdf   : > { %v904_v21 = vsel %vm887_vm5, %v885_v40, %v847_v38  ;;  %4700 = vmatmul.mubr.msk.f32.gmra.mxu0 %vm969_vm7, %v964_v42 }
  0xe0   : > { %v965_v13 = vrot.slane %v904_v21, 6  ;;  %v849_v43 = vpop.permute.xlu1 %848  ;;  %4702 = vmatprep.mubr.msk.f32.mxu0 %vm5149_vm1, %v5148_v0 }
  0xe1   : > { %v761_v44 = vpop.permute.xlu0 %760 }
  0xe2   : > { %v886_v45 = vsel %vm868_vm4, %v5478_v25, %v761_v44  ;;  %v966_v47 = vsel %vm933_vm6, %v963_v7, %v965_v13  ;;  %v1535_v25 = vld [vmem:[%s7629_s28 + $0x50] sm:$0xff]  ;;  %s7632_s28 = smov 32  }
  0xe3   : > { %v905_v48 = vsel %vm887_vm5, %v886_v45, %v849_v43  ;;  %4703 = vmatmul.mubr.msk.f32.gmra.mxu0 %vm969_vm7, %v966_v47  ;;  %4711 = vmatpush3.msra.mxu1 %v1535_v25 }
  0xe4   : > { %v967_v19 = vrot.slane %v905_v48, 6  ;;  %4705 = vmatprep.mubr.msk.f32.mxu0 %vm5149_vm1, %v5148_v0  ;;  %4712 = vmatprep.subr.mxu1 %v5148_v0 }
  0xe5   : > { %4713 = vmatpush3.msra.mxu1 %v1534_v50 }
  0xe6   : > { %v968_v26 = vsel %vm933_vm6, %v965_v13, %v967_v19  ;;  %4714 = vmatprep.subr.mxu1 %v5148_v0 }
  0xe7   : > { %4706 = vmatmul.mubr.msk.f32.gmra.mxu0 %vm969_vm7, %v968_v26  ;;  %4715 = vmatpush3.msra.mxu1 %v1533_v52 }
  0xe8   : > { %4716 = vmatprep.subr.mxu1 %v5148_v0 }
  0xe9   : > { %4717 = vmatpush3.msra.mxu1 %v1532_v53 }
  0xea   : > { %4718 = vmatprep.subr.mxu1 %v5148_v0 }
  0xeb   : > { %4719 = vmatpush3.msra.mxu1 %v1531_v54 }
  0xec   : > { %4720 = vmatprep.subr.mxu1 %v5148_v0 }
  0xed   : > { %4721 = vmatpush3.msra.mxu1 %v1530_v31  ;;  %v1200_v9 = vpop.permute.xlu1 %1199 }
  0xee   : > { %4722 = vmatprep.subr.mxu1 %v5148_v0  ;;  %v1195_v1 = vpop.permute.xlu0 %1194 }
  0xef   : > { %4723 = vmatpush3.msra.mxu1 %v1529_v57 }
  0xf0   : > { %4724 = vmatprep.subr.mxu1 %v5148_v0 }
  0xf1   : > { %4725 = vmatpush3.msra.mxu1 %v1528_v60  ;;  %v1205_v23 = vpop.permute.xlu1 %1204 }
  0xf2   : > { %4726 = vmatprep.subr.mxu1 %v5148_v0  ;;  %v1210_v33 = vpop.permute.xlu0 %1209 }
  0xf3   : > { %4727 = vmatpush3.msra.mxu1 %v1527_v62 }
  0xf4   : > { %4728 = vmatprep.subr.mxu1 %v5148_v0 }
  0xf5   : > { %4729 = vmatpush3.msra.mxu1 %v1526_v8  ;;  %v1215_v21 = vpop.permute.xlu1 %1214 }
  0xf6   : > { %4730 = vmatprep.subr.mxu1 %v5148_v0  ;;  %v1220_v25 = vpop.permute.xlu0 %1219 }
  0xf7   : > { %4731 = vmatpush3.msra.mxu1 %v1525_v12 }
  0xf8   : > { %2222 = vmatprep.subr.mxu1 %v5148_v0 }
 0x167   : > { %v1074_v58 = vpop.f32.mrf.mxu0 }
 0x168   : > { %v1075_v59 = vadd.f32 %v5694_v55, %v1074_v58 }
 0x169   : > { %v4659_v36 = vpop.f32.mrf.mxu0 }
 0x16a   : > { %v1158_v63 = vmax.f32 %v1075_v59, 0.0  ;;  %v1225_v36 = vpop.permute.xlu1 %1224 }
 0x16b   : > { %v1079_v2 = vpop.f32.mrf.mxu0 }
 0x16c   : > { %v5709_v6 = vmul.f32 %v1195_v1, %v1158_v63  ;;  %v1080_v41 = vadd.f32 %v5694_v55, %v1079_v2 }
 0x16d   : > { %v4662_v11 = vpop.f32.mrf.mxu0 }
 0x16e   : > { %v1159_v14 = vmax.f32 %v1080_v41, 0.0  ;;  %v1400_v46 = vrot.slane %v5709_v6, 4  ;;  %v1312_v4 = vrot.slane %v5709_v6, 2 }
 0x16f   : > { %v1084_v15 = vpop.f32.mrf.mxu0 }
 0x170   : > { %v5725_v18 = vmul.f32 %v1200_v9, %v1159_v14  ;;  %v1085_v20 = vadd.f32 %v5694_v55, %v1084_v15  ;;  %1433 = vrot.lane.b32.xlu0 %v1400_v46, %s7602_s4  ;;  %v1313_v27 = vsel %vm780_vm3, %v5722_v17, %v1312_v4  ;;  %v1230_v14 = vpop.permute.xlu0 %1229 }
 0x171   : > { %v4665_v51 = vpop.f32.mrf.mxu0 }
 0x172   : > { %v1160_v22 = vmax.f32 %v1085_v20, 0.0  ;;  %v1314_v5 = vrot.slane %v5725_v18, 2  ;;  %v1401_v56 = vrot.slane %v5725_v18, 4 }
 0x173   : > { %v1089_v24 = vpop.f32.mrf.mxu0 }
 0x174   : > { %v5734_v28 = vmul.f32 %v1205_v23, %v1160_v22  ;;  %v1090_v29 = vadd.f32 %v5694_v55, %v1089_v24  ;;  %1346 = vrot.lane.b32.xlu0 %v1313_v27, %s7599_s27  ;;  %v1315_v10 = vsel %vm780_vm3, %v1312_v4, %v1314_v5  ;;  %v1402_v35 = vsel %vm1004_vm0, %v1400_v46, %v1401_v56  ;;  %v1235_v27 = vpop.permute.xlu1 %1234 }
 0x175   : > { %v4668_v30 = vpop.f32.mrf.mxu0  ;;  %1348 = vrot.lane.b32.xlu1 %v1315_v10, %s7599_s27 }
 0x176   : > { %v1161_v32 = vmax.f32 %v1090_v29, 0.0  ;;  %v1316_v61 = vrot.slane %v5734_v28, 2  ;;  %v1403_v38 = vrot.slane %v5734_v28, 4 }
 0x177   : > { %v1094_v34 = vpop.f32.mrf.mxu0 }
 0x178   : > { %v5742_v16 = vmul.f32 %v1210_v33, %v1161_v32  ;;  %v1095_v37 = vadd.f32 %v5694_v55, %v1094_v34  ;;  %v1317_v7 = vsel %vm780_vm3, %v1314_v5, %v1316_v61  ;;  %v1404_v47 = vsel %vm1004_vm0, %v1401_v56, %v1403_v38 }
 0x179   : > { %v4671_v39 = vpop.f32.mrf.mxu0  ;;  %1435 = vrot.lane.b32.xlu1 %v1402_v35, %s7602_s4  ;;  %1350 = vrot.lane.b32.xlu0 %v1317_v7, %s7599_s27 }
 0x17a   : > { %v1162_v40 = vmax.f32 %v1095_v37, 0.0  ;;  %v1318_v42 = vrot.slane %v5742_v16, 2  ;;  %v1405_v43 = vrot.slane %v5742_v16, 4  ;;  %v1240_v37 = vpop.permute.xlu0 %1239 }
 0x17b   : > { %v1099_v13 = vpop.f32.mrf.mxu0 }
 0x17c   : > { %v5751_v44 = vmul.f32 %v1215_v21, %v1162_v40  ;;  %v1100_v45 = vadd.f32 %v5694_v55, %v1099_v13  ;;  %v1319_v48 = vsel %vm780_vm3, %v1316_v61, %v1318_v42  ;;  %v1406_v52 = vsel %vm1004_vm0, %v1403_v38, %v1405_v43 }
 0x17d   : > { %v4674_v19 = vpop.f32.mrf.mxu0  ;;  %1437 = vrot.lane.b32.xlu1 %v1404_v47, %s7602_s4  ;;  %1352 = vrot.lane.b32.xlu0 %v1319_v48, %s7599_s27  ;;  %v1245_v47 = vpop.permute.xlu1 %1244 }
 0x17e   : > { %v1163_v26 = vmax.f32 %v1100_v45, 0.0  ;;  %v1320_v49 = vrot.slane %v5751_v44, 2  ;;  %v1407_v57 = vrot.slane %v5751_v44, 4 }
 0x17f   : > { %v1104_v50 = vpop.f32.mrf.mxu0 }
 0x180   : > { %v5760_v53 = vmul.f32 %v1220_v25, %v1163_v26  ;;  %v1105_v54 = vadd.f32 %v5694_v55, %v1104_v50  ;;  %v1321_v31 = vsel %vm780_vm3, %v1318_v42, %v1320_v49  ;;  %v1408_v41 = vsel %vm1004_vm0, %v1405_v43, %v1407_v57 }
 0x181   : > { %v4677_v58 = vpop.f32.mrf.mxu0  ;;  %1439 = vrot.lane.b32.xlu1 %v1406_v52, %s7602_s4  ;;  %1354 = vrot.lane.b32.xlu0 %v1321_v31, %s7599_s27 }
 0x182   : > { %v1164_v59 = vmax.f32 %v1105_v54, 0.0  ;;  %v1322_v60 = vrot.slane %v5760_v53, 2  ;;  %v1409_v63 = vrot.slane %v5760_v53, 4 }
 0x183   : > { %v1109_v62 = vpop.f32.mrf.mxu0 }
 0x184   : > { %v5769_v1 = vmul.f32 %v1225_v36, %v1164_v59  ;;  %v1110_v2 = vadd.f32 %v5694_v55, %v1109_v62  ;;  %v1323_v8 = vsel %vm780_vm3, %v1320_v49, %v1322_v60  ;;  %v1410_v15 = vsel %vm1004_vm0, %v1407_v57, %v1409_v63  ;;  %v1250_v57 = vpop.permute.xlu0 %1249 }
 0x185   : > { %v4680_v9 = vpop.f32.mrf.mxu0  ;;  %1441 = vrot.lane.b32.xlu1 %v1408_v41, %s7602_s4  ;;  %1356 = vrot.lane.b32.xlu0 %v1323_v8, %s7599_s27 }
 0x186   : > { %v1165_v11 = vmax.f32 %v1110_v2, 0.0  ;;  %v1324_v12 = vrot.slane %v5769_v1, 2  ;;  %v1411_v22 = vrot.slane %v5769_v1, 4  ;;  %v1255_v9 = vpop.permute.xlu1 %1254 }
 0x187   : > { %v1114_v46 = vpop.f32.mrf.mxu0 }
 0x188   : > { %v5778_v4 = vmul.f32 %v1230_v14, %v1165_v11  ;;  %v1115_v20 = vadd.f32 %v5694_v55, %v1114_v46  ;;  %v1325_v51 = vsel %vm780_vm3, %v1322_v60, %v1324_v12  ;;  %v1412_v32 = vsel %vm1004_vm0, %v1409_v63, %v1411_v22 }
 0x189   : > { %v4683_v5 = vpop.f32.mrf.mxu0  ;;  %1443 = vrot.lane.b32.xlu1 %v1410_v15, %s7602_s4  ;;  %1358 = vrot.lane.b32.xlu0 %v1325_v51, %s7599_s27 }
 0x18a   : > { %v1166_v23 = vmax.f32 %v1115_v20, 0.0  ;;  %v1326_v24 = vrot.slane %v5778_v4, 2  ;;  %v1413_v29 = vrot.slane %v5778_v4, 4 }
 0x18b   : > { %v1119_v56 = vpop.f32.mrf.mxu0 }
 0x18c   : > { %v5787_v10 = vmul.f32 %v1235_v27, %v1166_v23  ;;  %v1120_v30 = vadd.f32 %v5694_v55, %v1119_v56  ;;  %v1327_v61 = vsel %vm780_vm3, %v1324_v12, %v1326_v24  ;;  %v1414_v38 = vsel %vm1004_vm0, %v1411_v22, %v1413_v29  ;;  %v1260_v23 = vpop.permute.xlu0 %1259 }
 0x18d   : > { %v4686_v33 = vpop.f32.mrf.mxu0  ;;  %1445 = vrot.lane.b32.xlu1 %v1412_v32, %s7602_s4  ;;  %1360 = vrot.lane.b32.xlu0 %v1327_v61, %s7599_s27 }
 0x18e   : > { %v1167_v34 = vmax.f32 %v1120_v30, 0.0  ;;  %v1328_v35 = vrot.slane %v5787_v10, 2  ;;  %v1415_v21 = vrot.slane %v5787_v10, 4 }
 0x18f   : > { %v1124_v7 = vpop.f32.mrf.mxu0 }
 0x190   : > { %v5796_v39 = vmul.f32 %v1240_v37, %v1167_v34  ;;  %v1125_v40 = vadd.f32 %v5694_v55, %v1124_v7  ;;  %v1329_v42 = vsel %vm780_vm3, %v1326_v24, %v1328_v35  ;;  %v1416_v25 = vsel %vm1004_vm0, %v1413_v29, %v1415_v21 }
 0x191   : > { %v4689_v13 = vpop.f32.mrf.mxu0  ;;  %1447 = vrot.lane.b32.xlu1 %v1414_v38, %s7602_s4  ;;  %1362 = vrot.lane.b32.xlu0 %v1329_v42, %s7599_s27 }
 0x192   : > { %v1168_v43 = vmax.f32 %v1125_v40, 0.0  ;;  %v1330_v45 = vrot.slane %v5796_v39, 2  ;;  %v1417_v19 = vrot.slane %v5796_v39, 4 }
 0x193   : > { %v1129_v48 = vpop.f32.mrf.mxu0 }
 0x194   : > { %v5805_v26 = vmul.f32 %v1245_v47, %v1168_v43  ;;  %v1130_v49 = vadd.f32 %v5694_v55, %v1129_v48  ;;  %v1331_v50 = vsel %vm780_vm3, %v1328_v35, %v1330_v45  ;;  %v1418_v59 = vsel %vm1004_vm0, %v1415_v21, %v1417_v19  ;;  %v1265_v35 = vpop.permute.xlu1 %1264  ;;  %v1270_v47 = vpop.permute.xlu0 %1269 }
 0x195   : > { %v4692_v52 = vpop.f32.mrf.mxu0  ;;  %1449 = vrot.lane.b32.xlu1 %v1416_v25, %s7602_s4  ;;  %1364 = vrot.lane.b32.xlu0 %v1331_v50, %s7599_s27 }
 0x196   : > { %v1169_v54 = vmax.f32 %v1130_v49, 0.0  ;;  %v1332_v31 = vrot.slane %v5805_v26, 2  ;;  %v1419_v63 = vrot.slane %v5805_v26, 4 }
 0x197   : > { %v1134_v58 = vpop.f32.mrf.mxu0 }
 0x198   : > { %v5814_v60 = vmul.f32 %v1250_v57, %v1169_v54  ;;  %v1135_v36 = vadd.f32 %v5694_v55, %v1134_v58  ;;  %v1333_v62 = vsel %vm780_vm3, %v1330_v45, %v1332_v31  ;;  %v1420_v15 = vsel %vm1004_vm0, %v1417_v19, %v1419_v63  ;;  %v1275_v58 = vpop.permute.xlu1 %1274 }
 0x199   : > { %v4695_v2 = vpop.f32.mrf.mxu0  ;;  %1451 = vrot.lane.b32.xlu1 %v1418_v59, %s7602_s4  ;;  %1366 = vrot.lane.b32.xlu0 %v1333_v62, %s7599_s27 }
 0x19a   : > { %v1170_v41 = vmax.f32 %v1135_v36, 0.0  ;;  %v1334_v8 = vrot.slane %v5814_v60, 2  ;;  %v1421_v12 = vrot.slane %v5814_v60, 4 }
 0x19b   : > { %v1139_v11 = vpop.f32.mrf.mxu0 }
 0x19c   : > { %v5823_v14 = vmul.f32 %v1255_v9, %v1170_v41  ;;  %v1140_v46 = vadd.f32 %v5694_v55, %v1139_v11  ;;  %v1335_v20 = vsel %vm780_vm3, %v1332_v31, %v1334_v8  ;;  %v1422_v27 = vsel %vm1004_vm0, %v1419_v63, %v1421_v12  ;;  %v1797_v9 = vld [vmem:[%s7631_s30 + $0x8] sm:$0xff] }
 0x19d   : > { %v4698_v51 = vpop.f32.mrf.mxu0  ;;  %1453 = vrot.lane.b32.xlu1 %v1420_v15, %s7602_s4  ;;  %1368 = vrot.lane.b32.xlu0 %v1335_v20, %s7599_s27  ;;  %v1803_v15 = vld [vmem:[%s7631_s30 + $0x38] sm:$0xff]  ;;  %v1805_v20 = vld [vmem:[%s7631_s30 + $0x48] sm:$0xff] }
 0x19e   : > { %v1171_v22 = vmax.f32 %v1140_v46, 0.0  ;;  %v1336_v5 = vrot.slane %v5823_v14, 2  ;;  %v1423_v32 = vrot.slane %v5823_v14, 4  ;;  %v1801_v46 = vld [vmem:[%s7631_s30 + $0x28] sm:$0xff]  ;;  %v1807_v51 = vld [vmem:[%s7631_s30 + $0x58] sm:$0xff] }
 0x19f   : > { %v1144_v24 = vpop.f32.mrf.mxu0 }
 0x1a0   : > { %v5832_v56 = vmul.f32 %v1260_v23, %v1171_v22  ;;  %v1145_v29 = vadd.f32 %v5694_v55, %v1144_v24  ;;  %v1337_v30 = vsel %vm780_vm3, %v1334_v8, %v1336_v5  ;;  %v1424_v42 = vsel %vm1004_vm0, %v1421_v12, %v1423_v32  ;;  %v1799_v12 = vld [vmem:[%s7631_s30 + $0x18] sm:$0xff]  ;;  %v1809_v22 = vld [vmem:[%s7631_s30 + $0x68] sm:$0xff] }
 0x1a1   : > { %v4701_v61 = vpop.f32.mrf.mxu0  ;;  %1455 = vrot.lane.b32.xlu1 %v1422_v27, %s7602_s4  ;;  %1370 = vrot.lane.b32.xlu0 %v1337_v30, %s7599_s27 }
 0x1a2   : > { %v1172_v33 = vmax.f32 %v1145_v29, 0.0  ;;  %v1338_v34 = vrot.slane %v5832_v56, 2  ;;  %v1425_v7 = vrot.slane %v5832_v56, 4 }
 0x1a3   : > { %v1149_v37 = vpop.f32.mrf.mxu0 }
 0x1a4   : > { %v5841_v38 = vmul.f32 %v1265_v35, %v1172_v33  ;;  %v1150_v40 = vadd.f32 %v5694_v55, %v1149_v37  ;;  %v1339_v21 = vsel %vm780_vm3, %v1336_v5, %v1338_v34  ;;  %v1426_v19 = vsel %vm1004_vm0, %v1423_v32, %v1425_v7  ;;  %v1811_v5 = vld [vmem:[%s7631_s30 + $0x78] sm:$0xff] }
 0x1a5   : > { %v4704_v13 = vpop.f32.mrf.mxu0  ;;  %1457 = vrot.lane.b32.xlu1 %v1424_v42, %s7602_s4  ;;  %1372 = vrot.lane.b32.xlu0 %v1339_v21, %s7599_s27 }
 0x1a6   : > { %v1173_v43 = vmax.f32 %v1150_v40, 0.0  ;;  %v1340_v45 = vrot.slane %v5841_v38, 2  ;;  %v1427_v52 = vrot.slane %v5841_v38, 4 }
 0x1a7   : > { %v1154_v48 = vpop.f32.mrf.mxu0 }
 0x1a8   : > { %v5850_v49 = vmul.f32 %v1270_v47, %v1173_v43  ;;  %v1155_v25 = vadd.f32 %v5694_v55, %v1154_v48  ;;  %v1341_v50 = vsel %vm780_vm3, %v1338_v34, %v1340_v45  ;;  %v1428_v36 = vsel %vm1004_vm0, %v1425_v7, %v1427_v52 }
 0x1a9   : > { %v4707_v54 = vpop.f32.mrf.mxu0  ;;  %1459 = vrot.lane.b32.xlu1 %v1426_v19, %s7602_s4  ;;  %1374 = vrot.lane.b32.xlu0 %v1341_v50, %s7599_s27 }
 0x1aa   : > { %v1174_v31 = vmax.f32 %v1155_v25, 0.0  ;;  %v1342_v57 = vrot.slane %v5850_v49, 2  ;;  %v1429_v55 = vrot.slane %v5850_v49, 4 }
 0x1ac   : > { %v5858_v59 = vmul.f32 %v1275_v58, %v1174_v31  ;;  %v1343_v62 = vsel %vm780_vm3, %v1340_v45, %v1342_v57  ;;  %v1430_v2 = vsel %vm1004_vm0, %v1427_v52, %v1429_v55 }
 0x1ad   : > { %1461 = vrot.lane.b32.xlu1 %v1428_v36, %s7602_s4  ;;  %1376 = vrot.lane.b32.xlu0 %v1343_v62, %s7599_s27 }
 0x1ae   : > { %v1344_v63 = vrot.slane %v5858_v59, 2  ;;  %v1431_v8 = vrot.slane %v5858_v59, 4 }
 0x1b0   : > { %v1345_v41 = vsel %vm780_vm3, %v1342_v57, %v1344_v63  ;;  %v1432_v11 = vsel %vm1004_vm0, %v1429_v55, %v1431_v8 }
 0x1b1   : > { %1463 = vrot.lane.b32.xlu1 %v1430_v2, %s7602_s4  ;;  %1378 = vrot.lane.b32.xlu0 %v1345_v41, %s7599_s27  ;;  %s7633_s27 = smov 64  }
 0x1b5   : > { %1465 = vrot.lane.b32.xlu1 %v1432_v11, %s7602_s4  ;;  %1815 = vperm.xlu0 %5053, %v1797_v9  }
 0x1b9   : > { %1825 = vperm.xlu1 %5054, %v1799_v12   ;;  %1835 = vperm.xlu0 %5053, %v1801_v46  }
 0x1bd   : > { %1845 = vperm.xlu1 %5054, %v1803_v15   ;;  %1855 = vperm.xlu0 %5053, %v1805_v20  }
 0x1c1   : > { %1865 = vperm.xlu1 %5054, %v1807_v51   ;;  %1875 = vperm.xlu0 %5053, %v1809_v22  }
 0x1c5   : > { %1885 = vperm.xlu1 %5054, %v1811_v5   ;;  %1380 = vrot.lane.b32.xlu0 %v1344_v63, %s7632_s28 }
 0x1c9   : > { %1467 = vrot.lane.b32.xlu1 %v1431_v8, %s7633_s27 }
 0x1e2   : > { %v1434_v23 = vpop.permute.xlu0 %1433 }
 0x1e6   : > { %v1347_v24 = vpop.permute.xlu0 %1346 }
 0x1e7   : > { %v1488_v27 = vsel %vm1487_vm8, 0.0, %v1347_v24  ;;  %v1349_v29 = vpop.permute.xlu1 %1348 }
 0x1e8   : > { %v1507_v30 = vsel %vm1506_vm9, %v1488_v27, %v1434_v23  ;;  %v1489_v32 = vsel %vm1487_vm8, %v5709_v6, %v1349_v29 }
 0x1e9   : > { %v1562_v35 = vrot.slane %v1507_v30, 4 }
 0x1eb   : > { %v1436_v61 = vpop.permute.xlu1 %1435  ;;  %v1351_v33 = vpop.permute.xlu0 %1350 }
 0x1ec   : > { %v1508_v34 = vsel %vm1506_vm9, %v1489_v32, %v1436_v61  ;;  %v1490_v7 = vsel %vm1487_vm8, %v5725_v18, %v1351_v33 }
 0x1ed   : > { %v1563_v37 = vrot.slane %v1508_v34, 4 }
 0x1ef   : > { %v1438_v40 = vpop.permute.xlu1 %1437  ;;  %v1353_v42 = vpop.permute.xlu0 %1352  ;;  %v1564_v21 = vsel %vm1004_vm0, %v1562_v35, %v1563_v37 }
 0x1f0   : > { %v1509_v13 = vsel %vm1506_vm9, %v1490_v7, %v1438_v40  ;;  %4733 = vmatmul.mubr.msk.f32.vlgmr.msra.gmra.mxu1 %vm1597_vm10, %v1564_v21  ;;  %v1491_v6 = vsel %vm1487_vm8, %v5734_v28, %v1353_v42 }
 0x1f1   : > { %v1565_v43 = vrot.slane %v1509_v13, 4  ;;  %4735 = vmatprep.mubr.msk.f32.mxu1 %vm5149_vm1, %v5148_v0 }
 0x1f3   : > { %v1440_v45 = vpop.permute.xlu1 %1439  ;;  %v1355_v47 = vpop.permute.xlu0 %1354  ;;  %v1566_v48 = vsel %vm1004_vm0, %v1563_v37, %v1565_v43 }
 0x1f4   : > { %v1510_v18 = vsel %vm1506_vm9, %v1491_v6, %v1440_v45  ;;  %4736 = vmatmul.mubr.msk.f32.gmra.mxu1 %vm1597_vm10, %v1566_v48  ;;  %v1492_v25 = vsel %vm1487_vm8, %v5742_v16, %v1355_v47 }
 0x1f5   : > { %v1567_v19 = vrot.slane %v1510_v18, 4  ;;  %4738 = vmatprep.mubr.msk.f32.mxu1 %vm5149_vm1, %v5148_v0 }
 0x1f7   : > { %v1442_v50 = vpop.permute.xlu1 %1441  ;;  %v1357_v52 = vpop.permute.xlu0 %1356  ;;  %v1568_v54 = vsel %vm1004_vm0, %v1565_v43, %v1567_v19 }
 0x1f8   : > { %v1511_v28 = vsel %vm1506_vm9, %v1492_v25, %v1442_v50  ;;  %4739 = vmatmul.mubr.msk.f32.gmra.mxu1 %vm1597_vm10, %v1568_v54  ;;  %v1493_v57 = vsel %vm1487_vm8, %v5751_v44, %v1357_v52 }
 0x1f9   : > { %v1569_v31 = vrot.slane %v1511_v28, 4  ;;  %4741 = vmatprep.mubr.msk.f32.mxu1 %vm5149_vm1, %v5148_v0 }
 0x1fb   : > { %v1444_v58 = vpop.permute.xlu1 %1443  ;;  %v1359_v36 = vpop.permute.xlu0 %1358  ;;  %v1570_v62 = vsel %vm1004_vm0, %v1567_v19, %v1569_v31 }
 0x1fc   : > { %v1512_v16 = vsel %vm1506_vm9, %v1493_v57, %v1444_v58  ;;  %4742 = vmatmul.mubr.msk.f32.gmra.mxu1 %vm1597_vm10, %v1570_v62  ;;  %v1494_v63 = vsel %vm1487_vm8, %v5760_v53, %v1359_v36 }
 0x1fd   : > { %v1571_v55 = vrot.slane %v1512_v16, 4  ;;  %4744 = vmatprep.mubr.msk.f32.mxu1 %vm5149_vm1, %v5148_v0 }
 0x1ff   : > { %v1446_v2 = vpop.permute.xlu1 %1445  ;;  %v1361_v41 = vpop.permute.xlu0 %1360  ;;  %v1572_v8 = vsel %vm1004_vm0, %v1569_v31, %v1571_v55 }
 0x200   : > { %v1513_v44 = vsel %vm1506_vm9, %v1494_v63, %v1446_v2  ;;  %4745 = vmatmul.mubr.msk.f32.gmra.mxu1 %vm1597_vm10, %v1572_v8  ;;  %v1495_v11 = vsel %vm1487_vm8, %v5769_v1, %v1361_v41 }
 0x201   : > { %v1573_v9 = vrot.slane %v1513_v44, 4  ;;  %4747 = vmatprep.mubr.msk.f32.mxu1 %vm5149_vm1, %v5148_v0 }
 0x203   : > { %v1448_v12 = vpop.permute.xlu1 %1447  ;;  %v1363_v46 = vpop.permute.xlu0 %1362  ;;  %v1574_v15 = vsel %vm1004_vm0, %v1571_v55, %v1573_v9 }
 0x204   : > { %v1514_v53 = vsel %vm1506_vm9, %v1495_v11, %v1448_v12  ;;  %4748 = vmatmul.mubr.msk.f32.gmra.mxu1 %vm1597_vm10, %v1574_v15  ;;  %v1496_v51 = vsel %vm1487_vm8, %v5778_v4, %v1363_v46 }
 0x205   : > { %v1575_v20 = vrot.slane %v1514_v53, 4  ;;  %4750 = vmatprep.mubr.msk.f32.mxu1 %vm5149_vm1, %v5148_v0 }
 0x207   : > { %v1450_v22 = vpop.permute.xlu1 %1449  ;;  %v1365_v5 = vpop.permute.xlu0 %1364  ;;  %v1576_v23 = vsel %vm1004_vm0, %v1573_v9, %v1575_v20 }
 0x208   : > { %v1515_v1 = vsel %vm1506_vm9, %v1496_v51, %v1450_v22  ;;  %4751 = vmatmul.mubr.msk.f32.gmra.mxu1 %vm1597_vm10, %v1576_v23  ;;  %v1497_v27 = vsel %vm1487_vm8, %v5787_v10, %v1365_v5 }
 0x209   : > { %v1577_v24 = vrot.slane %v1515_v1, 4  ;;  %4753 = vmatprep.mubr.msk.f32.mxu1 %vm5149_vm1, %v5148_v0 }
 0x20b   : > { %v1452_v29 = vpop.permute.xlu1 %1451  ;;  %v1367_v30 = vpop.permute.xlu0 %1366  ;;  %v1578_v32 = vsel %vm1004_vm0, %v1575_v20, %v1577_v24 }
 0x20c   : > { %v1516_v4 = vsel %vm1506_vm9, %v1497_v27, %v1452_v29  ;;  %4754 = vmatmul.mubr.msk.f32.gmra.mxu1 %vm1597_vm10, %v1578_v32  ;;  %v1498_v33 = vsel %vm1487_vm8, %v5796_v39, %v1367_v30  ;;  %v6031_v30 = vld [vmem:[%s5330_s2 + $0x88] sm:$0xff]  ;;  %v6034_v32 = vld [vmem:[%s5330_s2 + $0x90] sm:$0xff] }
 0x20d   : > { %v1579_v61 = vrot.slane %v1516_v4, 4  ;;  %4756 = vmatprep.mubr.msk.f32.mxu1 %vm5149_vm1, %v5148_v0  ;;  %v2331_v4 = vrot.slane %v6031_v30, 1 }
 0x20f   : > { %v1454_v34 = vpop.permute.xlu1 %1453  ;;  %v1369_v35 = vpop.permute.xlu0 %1368  ;;  %v1580_v37 = vsel %vm1004_vm0, %v1577_v24, %v1579_v61 }
 0x210   : > { %v1517_v10 = vsel %vm1506_vm9, %v1498_v33, %v1454_v34  ;;  %4757 = vmatmul.mubr.msk.f32.gmra.mxu1 %vm1597_vm10, %v1580_v37  ;;  %v1499_v40 = vsel %vm1487_vm8, %v5805_v26, %v1369_v35  ;;  %v2332_v33 = vsel %vm690_vm2, %v5333_v3, %v2331_v4  ;;  %v6048_v37 = vld [vmem:[%s7635_s6] ss:$0 sm:$0xff]  ;;  %v2117_v3 = vld [vmem:[%s7636_s7 + $0xf8] sm:$0xff] }
 0x211   : > { %v1581_v7 = vrot.slane %v1517_v10, 4  ;;  %4759 = vmatprep.mubr.msk.f32.mxu1 %vm5149_vm1, %v5148_v0  ;;  %2365 = vrot.lane.b32.xlu1 %v2332_v33, %s7634_s21  ;;  %v2093_v33 = vld [vmem:[%s7636_s7 + $0x38] sm:$0xff] }
 0x212   : > { %4491 = vmatprep.subr.mxu0 %v2117_v3  ;;  %v2108_v3 = vld [vmem:[%s7636_s7 + $0xb0] sm:$0xff] }
 0x213   : > { %v1456_v42 = vpop.permute.xlu1 %1455  ;;  %v1371_v21 = vpop.permute.xlu0 %1370  ;;  %v1582_v13 = vsel %vm1004_vm0, %v1579_v61, %v1581_v7  ;;  %v2333_v61 = vrot.slane %v6034_v32, 1 }
 0x214   : > { %v1518_v39 = vsel %vm1506_vm9, %v1499_v40, %v1456_v42  ;;  %4760 = vmatmul.mubr.msk.f32.gmra.mxu1 %vm1597_vm10, %v1582_v13  ;;  %v1500_v6 = vsel %vm1487_vm8, %v5814_v60, %v1371_v21 }
 0x215   : > { %v1583_v43 = vrot.slane %v1518_v39, 4  ;;  %4762 = vmatprep.mubr.msk.f32.mxu1 %vm5149_vm1, %v5148_v0  ;;  %v2116_v39 = vld [vmem:[%s7636_s7 + $0xf0] sm:$0xff] }
 0x217   : > { %v1458_v45 = vpop.permute.xlu1 %1457  ;;  %v1373_v47 = vpop.permute.xlu0 %1372  ;;  %v1584_v48 = vsel %vm1004_vm0, %v1581_v7, %v1583_v43  ;;  %v2101_v7 = vld [vmem:[%s7636_s7 + $0x78] sm:$0xff] }
 0x218   : > { %v1519_v26 = vsel %vm1506_vm9, %v1500_v6, %v1458_v45  ;;  %4763 = vmatmul.mubr.msk.f32.gmra.mxu1 %vm1597_vm10, %v1584_v48  ;;  %v1501_v19 = vsel %vm1487_vm8, %v5823_v14, %v1373_v47  ;;  %4492 = vmatpush3.msra.mxu0 %v2101_v7  ;;  %v2115_v48 = vld [vmem:[%s7636_s7 + $0xe8] sm:$0xff]  ;;  %v2092_v7 = vld [vmem:[%s7636_s7 + $0x30] sm:$0xff] }
 0x219   : > { %v1585_v18 = vrot.slane %v1519_v26, 4  ;;  %4765 = vmatprep.mubr.msk.f32.mxu1 %vm5149_vm1, %v5148_v0  ;;  %4493 = vmatprep.subr.mxu0 %v2116_v39  ;;  %v2099_v26 = vld [vmem:[%s7636_s7 + $0x68] sm:$0xff] }
 0x21a   : > { %v2091_v39 = vld [vmem:[%s7636_s7 + $0x28] sm:$0xff] }
 0x21b   : > { %v1460_v25 = vpop.permute.xlu1 %1459  ;;  %v1375_v50 = vpop.permute.xlu0 %1374  ;;  %v1586_v52 = vsel %vm1004_vm0, %v1583_v43, %v1585_v18  ;;  %v2100_v43 = vld [vmem:[%s7636_s7 + $0x70] sm:$0xff] }
 0x21c   : > { %v1520_v60 = vsel %vm1506_vm9, %v1501_v19, %v1460_v25  ;;  %4766 = vmatmul.mubr.msk.f32.gmra.mxu1 %vm1597_vm10, %v1586_v52  ;;  %v1502_v28 = vsel %vm1487_vm8, %v5832_v56, %v1375_v50  ;;  %4494 = vmatpush3.msra.mxu0 %v2100_v43  ;;  %v2114_v52 = vld [vmem:[%s7636_s7 + $0xe0] sm:$0xff] }
 0x21d   : > { %v1587_v54 = vrot.slane %v1520_v60, 4  ;;  %4768 = vmatprep.mubr.msk.f32.mxu1 %vm5149_vm1, %v5148_v0  ;;  %4495 = vmatprep.subr.mxu0 %v2115_v48  ;;  %v2098_v60 = vld [vmem:[%s7636_s7 + $0x60] sm:$0xff] }
 0x21e   : > { %4496 = vmatpush3.msra.mxu0 %v2099_v26  ;;  %v2090_v48 = vld [vmem:[%s7636_s7 + $0x20] sm:$0xff] }
 0x21f   : > { %v1462_v31 = vpop.permute.xlu1 %1461  ;;  %v1377_v57 = vpop.permute.xlu0 %1376  ;;  %v1588_v58 = vsel %vm1004_vm0, %v1585_v18, %v1587_v54  ;;  %4497 = vmatprep.subr.mxu0 %v2114_v52  ;;  %v2089_v52 = vld [vmem:[%s7636_s7 + $0x18] sm:$0xff] }
 0x220   : > { %v1521_v14 = vsel %vm1506_vm9, %v1502_v28, %v1462_v31  ;;  %4769 = vmatmul.mubr.msk.f32.gmra.mxu1 %vm1597_vm10, %v1588_v58  ;;  %v1503_v62 = vsel %vm1487_vm8, %v5841_v38, %v1377_v57  ;;  %4498 = vmatpush3.msra.mxu0 %v2098_v60  ;;  %v2113_v57 = vld [vmem:[%s7636_s7 + $0xd8] sm:$0xff] }
 0x221   : > { %v1589_v36 = vrot.slane %v1521_v14, 4  ;;  %4771 = vmatprep.mubr.msk.f32.mxu1 %vm5149_vm1, %v5148_v0  ;;  %v2097_v58 = vld [vmem:[%s7636_s7 + $0x58] sm:$0xff]  ;;  %4499 = vmatprep.subr.mxu0 %v2113_v57  ;;  %v2104_v57 = vld [vmem:[%s7636_s7 + $0x90] sm:$0xff] }
 0x222   : > { %4500 = vmatpush3.msra.mxu0 %v2097_v58  ;;  %v2088_v58 = vld [vmem:[%s7636_s7 + $0x10] sm:$0xff] }
 0x223   : > { %v1464_v16 = vpop.permute.xlu1 %1463  ;;  %v1590_v55 = vsel %vm1004_vm0, %v1587_v54, %v1589_v36  ;;  %v1379_v63 = vpop.permute.xlu0 %1378 }
 0x224   : > { %v1522_v56 = vsel %vm1506_vm9, %v1503_v62, %v1464_v16  ;;  %4772 = vmatmul.mubr.msk.f32.gmra.mxu1 %vm1597_vm10, %v1590_v55  ;;  %v1504_v41 = vsel %vm1487_vm8, %v5850_v49, %v1379_v63  ;;  %v2112_v55 = vld [vmem:[%s7636_s7 + $0xd0] sm:$0xff] }
 0x225   : > { %v1591_v2 = vrot.slane %v1522_v56, 4  ;;  %4774 = vmatprep.mubr.msk.f32.mxu1 %vm5149_vm1, %v5148_v0  ;;  %4501 = vmatprep.subr.mxu0 %v2112_v55 }
 0x227   : > { %v1466_v8 = vpop.permute.xlu1 %1465  ;;  %v1592_v44 = vsel %vm1004_vm0, %v1589_v36, %v1591_v2 }
 0x228   : > { %v1523_v38 = vsel %vm1506_vm9, %v1504_v41, %v1466_v8  ;;  %4775 = vmatmul.mubr.msk.f32.gmra.mxu1 %vm1597_vm10, %v1592_v44  ;;  %v2096_v8 = vld [vmem:[%s7636_s7 + $0x50] sm:$0xff]  ;;  %v2111_v44 = vld [vmem:[%s7636_s7 + $0xc8] sm:$0xff] }
 0x229   : > { %v1593_v9 = vrot.slane %v1523_v38, 4  ;;  %4777 = vmatprep.mubr.msk.f32.mxu1 %vm5149_vm1, %v5148_v0  ;;  %4502 = vmatpush3.msra.mxu0 %v2096_v8 }
 0x22a   : > { %4503 = vmatprep.subr.mxu0 %v2111_v44 }
 0x22b   : > { %v1594_v11 = vsel %vm1004_vm0, %v1591_v2, %v1593_v9 }
 0x22c   : > { %4778 = vmatmul.mubr.msk.f32.gmra.mxu1 %vm1597_vm10, %v1594_v11 }
 0x22d   : > { %4780 = vmatprep.mubr.msk.f32.mxu1 %vm5149_vm1, %v5148_v0 }
 0x230   : > { %v1816_v49 = vpop.permute.xlu0 %1815 }
 0x234   : > { %v1826_v12 = vpop.permute.xlu1 %1825  ;;  %v6013_v46 = vpop.permute.xlu0 %1835 }
 0x238   : > { %v6015_v15 = vpop.permute.xlu1 %1845  ;;  %v6017_v53 = vpop.permute.xlu0 %1855 }
 0x23c   : > { %v6019_v20 = vpop.permute.xlu1 %1865  ;;  %v6021_v51 = vpop.permute.xlu0 %1875 }
 0x240   : > { %v6023_v22 = vpop.permute.xlu1 %1885  ;;  %v1381_v5 = vpop.permute.xlu0 %1380 }
 0x241   : > { %v1505_v23 = vsel %vm1487_vm8, %v5858_v59, %v1381_v5  ;;  %v2334_v59 = vsel %vm690_vm2, %v2331_v4, %v2333_v61 }
 0x242   : > { %2367 = vrot.lane.b32.xlu0 %v2334_v59, %s7634_s21 }
 0x244   : > { %v1468_v1 = vpop.permute.xlu1 %1467 }
 0x245   : > { %v1524_v24 = vsel %vm1506_vm9, %v1505_v23, %v1468_v1  ;;  %v2094_v1 = vld [vmem:[%s7636_s7 + $0x40] sm:$0xff] }
 0x246   : > { %v1595_v27 = vrot.slane %v1524_v24, 4  ;;  %v2109_v24 = vld [vmem:[%s7636_s7 + $0xb8] sm:$0xff] }
 0x248   : > { %v1596_v29 = vsel %vm1004_vm0, %v1593_v9, %v1595_v27 }
 0x249   : > { %4781 = vmatmul.mubr.msk.f32.gmra.mxu1 %vm1597_vm10, %v1596_v29 }
 0x2b0   : > { %v1698_v34 = vpop.f32.mrf.mxu1 }
 0x2b2   : > { %v4734_v35 = vpop.f32.mrf.mxu1 }
 0x2b4   : > { %v1702_v10 = vpop.f32.mrf.mxu1 }
 0x2b5   : > { %v1703_v40 = vadd.f32 %v6048_v37, %v1702_v10 }
 0x2b6   : > { %v4737_v42 = vpop.f32.mrf.mxu1 }
 0x2b7   : > { %v1781_v21 = vmax.f32 %v1703_v40, 0.0 }
 0x2b8   : > { %v6057_v13 = vpop.f32.mrf.mxu1 }
 0x2b9   : > { %v1893_v6 = vmul.f32 %v1816_v49, %v1781_v21  ;;  %v2095_v49 = vld [vmem:[%s7636_s7 + $0x48] sm:$0xff] }
 0x2ba   : > { %v4740_v45 = vpop.f32.mrf.mxu1  ;;  %4504 = vmatpush3.msra.mxu0 %v2095_v49  ;;  %v2107_v21 = vld [vmem:[%s7636_s7 + $0xa8] sm:$0xff] }
 0x2bb   : > { %1909 = vst.msk [vmem:[#allocation2] sm:$0xff] %vm1487_vm8, %v1893_v6 }
 0x2bc   : > { %v1712_v47 = vpop.f32.mrf.mxu1 }
 0x2bd   : > { %v1713_v18 = vadd.f32 %v6048_v37, %v1712_v47  ;;  %v2106_v47 = vld [vmem:[%s7636_s7 + $0xa0] sm:$0xff] }
 0x2be   : > { %v4743_v19 = vpop.f32.mrf.mxu1 }
 0x2bf   : > { %v1783_v25 = vmax.f32 %v1713_v18, 0.0 }
 0x2c0   : > { %v6073_v50 = vpop.f32.mrf.mxu1 }
 0x2c1   : > { %v1895_v54 = vmul.f32 %v1826_v12, %v1783_v25  ;;  %v2110_v12 = vld [vmem:[%s7636_s7 + $0xc0] sm:$0xff]  ;;  %v2105_v25 = vld [vmem:[%s7636_s7 + $0x98] sm:$0xff] }
 0x2c2   : > { %v4746_v28 = vpop.f32.mrf.mxu1  ;;  %4505 = vmatprep.subr.mxu0 %v2110_v12  ;;  %v2087_v12 = vld [vmem:[%s7636_s7 + $0x8] sm:$0xff] }
 0x2c3   : > { %1911 = vst.msk [vmem:[#allocation2 + $0x10] sm:$0xff] %vm1487_vm8, %v1895_v54  ;;  %4506 = vmatpush3.msra.mxu0 %v2094_v1 }
 0x2c4   : > { %v1722_v31 = vpop.f32.mrf.mxu1  ;;  %4507 = vmatprep.subr.mxu0 %v2109_v24 }
 0x2c5   : > { %v1723_v14 = vadd.f32 %v6048_v37, %v1722_v31  ;;  %4508 = vmatpush3.msra.mxu0 %v2093_v33 }
 0x2c6   : > { %v4749_v36 = vpop.f32.mrf.mxu1  ;;  %4509 = vmatprep.subr.mxu0 %v2108_v3 }
 0x2c7   : > { %v1785_v62 = vmax.f32 %v1723_v14, 0.0  ;;  %4510 = vmatpush3.msra.mxu0 %v2092_v7 }
 0x2c8   : > { %v6089_v16 = vpop.f32.mrf.mxu1  ;;  %4511 = vmatprep.subr.mxu0 %v2107_v21 }
 0x2c9   : > { %v1897_v56 = vmul.f32 %v6013_v46, %v1785_v62  ;;  %4512 = vmatpush3.msra.mxu0 %v2091_v39 }
 0x2ca   : > { %v4752_v63 = vpop.f32.mrf.mxu1  ;;  %4513 = vmatprep.subr.mxu0 %v2106_v47  ;;  %v1933_v44 = vld [vmem:[#allocation2 + $0x1] ss:$16 sm:$0x3]  ;;  %v1949_v33 = vld [vmem:[#allocation2 + $0x3] ss:$16 sm:$0x3] }
 0x2cb   : > { %1913 = vst.msk [vmem:[#allocation2 + $0x20] sm:$0xff] %vm1487_vm8, %v1897_v56  ;;  %4514 = vmatpush3.msra.mxu0 %v2090_v48  ;;  %v1941_v56 = vld [vmem:[#allocation2 + $0x2] ss:$16 sm:$0x3] }
 0x2cc   : > { %v1732_v2 = vpop.f32.mrf.mxu1  ;;  %4515 = vmatprep.subr.mxu0 %v2105_v25  ;;  %v1973_v63 = vld [vmem:[#allocation2 + $0x6] ss:$16 sm:$0x3] }
 0x2cd   : > { %v1733_v41 = vadd.f32 %v6048_v37, %v1732_v2  ;;  %4516 = vmatpush3.msra.mxu0 %v2089_v52 }
 0x2ce   : > { %v4755_v38 = vpop.f32.mrf.mxu1  ;;  %4517 = vmatprep.subr.mxu0 %v2104_v57 }
 0x2cf   : > { %v1787_v9 = vmax.f32 %v1733_v41, 0.0  ;;  %4518 = vmatpush3.msra.mxu0 %v2088_v58  ;;  %v1965_v38 = vld [vmem:[#allocation2 + $0x5] ss:$16 sm:$0x3] }
 0x2d0   : > { %v6103_v11 = vpop.f32.mrf.mxu1 }
 0x2d1   : > { %v1899_v46 = vmul.f32 %v6015_v15, %v1787_v9 }
 0x2d2   : > { %v4758_v5 = vpop.f32.mrf.mxu1 }
 0x2d3   : > { %1915 = vst.msk [vmem:[#allocation2 + $0x30] sm:$0xff] %vm1487_vm8, %v1899_v46 }
 0x2d4   : > { %v1742_v23 = vpop.f32.mrf.mxu1 }
 0x2d5   : > { %v1743_v27 = vadd.f32 %v6048_v37, %v1742_v23 }
 0x2d6   : > { %v4761_v29 = vpop.f32.mrf.mxu1 }
 0x2d7   : > { %v1789_v15 = vmax.f32 %v1743_v27, 0.0  ;;  %v2086_v27 = vld [vmem:[%s7636_s7] sm:$0xff] }
 0x2d8   : > { %v6120_v4 = vpop.f32.mrf.mxu1 }
 0x2d9   : > { %v1901_v59 = vmul.f32 %v6017_v53, %v1789_v15 }
 0x2da   : > { %v4764_v34 = vpop.f32.mrf.mxu1  ;;  %v1974_v55 = vld [vmem:[#allocation2 + $0x6] ss:$16 sm:$0xc]  ;;  %v1934_v2 = vld [vmem:[#allocation2 + $0x1] ss:$16 sm:$0xc] }
 0x2db   : > { %1917 = vst.msk [vmem:[#allocation2 + $0x40] sm:$0xff] %vm1487_vm8, %v1901_v59  ;;  %v1966_v41 = vld [vmem:[#allocation2 + $0x5] ss:$16 sm:$0xc]  ;;  %v1975_v1 = vor.u32 %v1974_v55, %v1973_v63  ;;  %v1935_v29 = vor.u32 %v1934_v2, %v1933_v44 }
 0x2dc   : > { %v1752_v35 = vpop.f32.mrf.mxu1  ;;  %v1950_v9 = vld [vmem:[#allocation2 + $0x3] ss:$16 sm:$0xc]  ;;  %v1982_v49 = vld [vmem:[#allocation2 + $0x7] ss:$16 sm:$0xc]  ;;  %v1967_v15 = vor.u32 %v1966_v41, %v1965_v38 }
 0x2dd   : > { %v1753_v10 = vadd.f32 %v6048_v37, %v1752_v35  ;;  %v1981_v59 = vld [vmem:[#allocation2 + $0x7] ss:$16 sm:$0x3]  ;;  %v1951_v39 = vor.u32 %v1950_v9, %v1949_v33  ;;  %v6203_v41 = vld [vmem:[%s5330_s2 + $0xa8] sm:$0xff] }
 0x2de   : > { %v4767_v40 = vpop.f32.mrf.mxu1  ;;  %v2339_v44 = vrot.slane %v6203_v41, 1  ;;  %v6232_v33 = vld [vmem:[%s5330_s2 + $0xc0] sm:$0xff] }
 0x2df   : > { %v1791_v42 = vmax.f32 %v1753_v10, 0.0 }
 0x2e0   : > { %v6134_v53 = vpop.f32.mrf.mxu1 }
 0x2e1   : > { %v1903_v43 = vmul.f32 %v6019_v20, %v1791_v42 }
 0x2e2   : > { %v4770_v6 = vpop.f32.mrf.mxu1 }
 0x2e3   : > { %1919 = vst.msk [vmem:[#allocation2 + $0x50] sm:$0xff] %vm1487_vm8, %v1903_v43  ;;  %v1983_v43 = vor.u32 %v1982_v49, %v1981_v59  ;;  %v6214_v49 = vld [vmem:[%s5330_s2 + $0xb0] sm:$0xff] }
 0x2e4   : > { %v1762_v45 = vpop.f32.mrf.mxu1 }
 0x2e5   : > { %v1763_v26 = vadd.f32 %v6048_v37, %v1762_v45 }
 0x2e6   : > { %v4773_v18 = vpop.f32.mrf.mxu1 }
 0x2e7   : > { %v1793_v20 = vmax.f32 %v1763_v26, 0.0 }
 0x2e8   : > { %v6151_v19 = vpop.f32.mrf.mxu1 }
 0x2e9   : > { %v1905_v60 = vmul.f32 %v6021_v51, %v1793_v20  ;;  %v2103_v51 = vld [vmem:[%s7636_s7 + $0x88] sm:$0xff] }
 0x2ea   : > { %v4776_v54 = vpop.f32.mrf.mxu1  ;;  %4519 = vmatprep.subr.mxu0 %v2103_v51  ;;  %v1944_v8 = vld [vmem:[#allocation2 + $0x2] ss:$16 sm:$0x30]  ;;  %v1976_v46 = vld [vmem:[#allocation2 + $0x6] ss:$16 sm:$0x30] }
 0x2eb   : > { %1921 = vst.msk [vmem:[#allocation2 + $0x60] sm:$0xff] %vm1487_vm8, %v1905_v60  ;;  %v1936_v5 = vld [vmem:[#allocation2 + $0x1] ss:$16 sm:$0x30]  ;;  %4520 = vmatpush3.msra.mxu0 %v2087_v12  ;;  %v1977_v35 = vor.u32 %v1976_v46, %v1975_v1  ;;  %v2420_v51 = vrot.slane %v6034_v32, 2  ;;  %v2341_v46 = vrot.slane %v6214_v49, 1 }
 0x2ec   : > { %v1772_v28 = vpop.f32.mrf.mxu1  ;;  %v1968_v24 = vld [vmem:[#allocation2 + $0x5] ss:$16 sm:$0x30]  ;;  %v1952_v10 = vld [vmem:[#allocation2 + $0x3] ss:$16 sm:$0x30]  ;;  %v1937_v42 = vor.u32 %v1936_v5, %v1935_v29 }
 0x2ed   : > { %v1773_v31 = vadd.f32 %v6048_v37, %v1772_v28  ;;  %v1942_v37 = vld [vmem:[#allocation2 + $0x2] ss:$16 sm:$0xc]  ;;  %v1984_v3 = vld [vmem:[#allocation2 + $0x7] ss:$16 sm:$0x30]  ;;  %v1969_v21 = vor.u32 %v1968_v24, %v1967_v15  ;;  %v1953_v20 = vor.u32 %v1952_v10, %v1951_v39  ;;  %v2342_v24 = vsel %vm690_vm2, %v2339_v44, %v2341_v46 }
 0x2ee   : > { %v4779_v14 = vpop.f32.mrf.mxu1  ;;  %v1943_v23 = vor.u32 %v1942_v37, %v1941_v56  ;;  %v1985_v52 = vor.u32 %v1984_v3, %v1983_v43  ;;  %v6184_v28 = vld [vmem:[%s5330_s2 + $0x98] sm:$0xff]  ;;  %v2428_v15 = vrot.slane %v6214_v49, 2  ;;  %v6241_v3 = vld [vmem:[%s5330_s2 + $0xc8] sm:$0xff]  ;;  %v6250_v39 = vld [vmem:[%s5330_s2 + $0xd0] sm:$0xff] }
 0x2ef   : > { %v1795_v36 = vmax.f32 %v1773_v31, 0.0  ;;  %v2419_v14 = vrot.slane %v6031_v30, 2  ;;  %v2422_v2 = vrot.slane %v6184_v28, 2  ;;  %v6223_v1 = vld [vmem:[%s5330_s2 + $0xb8] sm:$0xff] }
 0x2f0   : > { %v1945_v34 = vor.u32 %v1944_v8, %v1943_v23  ;;  %v2426_v23 = vrot.slane %v6203_v41, 2  ;;  %v2430_v10 = vrot.slane %v6223_v1, 2 }
 0x2f1   : > { %v1907_v62 = vmul.f32 %v6023_v22, %v1795_v36  ;;  %v2102_v22 = vld [vmem:[%s7636_s7 + $0x80] sm:$0xff]  ;;  %v2335_v36 = vrot.slane %v6184_v28, 1  ;;  %v2421_v63 = vsel %vm780_vm3, %v2419_v14, %v2420_v51 }
 0x2f2   : > { %4521 = vmatprep.subr.mxu0 %v2102_v22 }
 0x2f3   : > { %1923 = vst.msk [vmem:[#allocation2 + $0x70] sm:$0xff] %vm1487_vm8, %v1907_v62  ;;  %4522 = vmatpush3.msra.mxu0 %v2086_v27  ;;  %v6192_v62 = vld [vmem:[%s5330_s2 + $0xa0] sm:$0xff]  ;;  %v2336_v55 = vsel %vm690_vm2, %v2333_v61, %v2335_v36  ;;  %v2423_v61 = vsel %vm780_vm3, %v2420_v51, %v2422_v2  ;;  %v2343_v27 = vrot.slane %v6223_v1, 1 }
 0x2f4   : > { %4783 = vmatprep.subr.mxu0 %v5148_v0  ;;  %v2337_v56 = vrot.slane %v6192_v62, 1  ;;  %v2424_v9 = vrot.slane %v6192_v62, 2 }
 0x2f5   : > { %v2344_v59 = vsel %vm690_vm2, %v2341_v46, %v2343_v27  ;;  %v6304_v46 = vld [vmem:[%s5330_s2 + $0x100] sm:$0xff] }
 0x2f6   : > { %v2338_v8 = vsel %vm690_vm2, %v2335_v36, %v2337_v56  ;;  %v2340_v22 = vsel %vm690_vm2, %v2337_v56, %v2339_v44  ;;  %v2425_v5 = vsel %vm780_vm3, %v2422_v2, %v2424_v9  ;;  %v2427_v29 = vsel %vm780_vm3, %v2424_v9, %v2426_v23  ;;  %v6295_v44 = vld [vmem:[%s5330_s2 + $0xf8] sm:$0xff] }
 0x2f7   : > { %v2359_v9 = vrot.slane %v6295_v44, 1 }
 0x2fa   : > { %v1946_v7 = vld [vmem:[#allocation2 + $0x2] ss:$16 sm:$0xc0]  ;;  %v1978_v40 = vld [vmem:[#allocation2 + $0x6] ss:$16 sm:$0xc0] }
 0x2fb   : > { %v1947_v6 = vor.u32 %v1946_v7, %v1945_v34  ;;  %v1979_v45 = vor.u32 %v1978_v40, %v1977_v35  ;;  %v1938_v47 = vld [vmem:[#allocation2 + $0x1] ss:$16 sm:$0xc0]  ;;  %v1970_v48 = vld [vmem:[#allocation2 + $0x5] ss:$16 sm:$0xc0]  ;;  %v2429_v35 = vsel %vm780_vm3, %v2426_v23, %v2428_v15 }
 0x2fc   : > { %v1939_v26 = vor.u32 %v1938_v47, %v1937_v42  ;;  %v1971_v18 = vor.u32 %v1970_v48, %v1969_v21  ;;  %v1954_v25 = vld [vmem:[#allocation2 + $0x3] ss:$16 sm:$0xc0]  ;;  %v1986_v60 = vld [vmem:[#allocation2 + $0x7] ss:$16 sm:$0xc0]  ;;  %v2431_v42 = vsel %vm780_vm3, %v2428_v15, %v2430_v10 }
 0x2fd   : > { %v5060_v54 = vpack.i.bf16 %v1947_v6, %v1979_v45  ;;  %v1955_v57 = vor.u32 %v1954_v25, %v1953_v20  ;;  %v1987_v58 = vor.u32 %v1986_v60, %v1985_v52  ;;  %v2345_v34 = vrot.slane %v6232_v33, 1  ;;  %v6259_v48 = vld [vmem:[%s5330_s2 + $0xd8] sm:$0xff]  ;;  %v6268_v52 = vld [vmem:[%s5330_s2 + $0xe0] sm:$0xff] }
 0x2fe   : > { %v5055_v31 = vpack.i.bf16 %v1939_v26, %v1971_v18  ;;  %v2347_v40 = vrot.slane %v6241_v3, 1  ;;  %v2432_v21 = vrot.slane %v6232_v33, 2  ;;  %v2349_v6 = vrot.slane %v6250_v39, 1 }
 0x2ff   : > { %5061 = vrot.lane.b32.xlu1 %v5060_v54, %s7633_s27  ;;  %v5065_v37 = vpack.i.bf16 %v1955_v57, %v1987_v58  ;;  %v2346_v7 = vsel %vm690_vm2, %v2343_v27, %v2345_v34  ;;  %v2434_v47 = vrot.slane %v6241_v3, 2  ;;  %v2351_v18 = vrot.slane %v6259_v48, 1  ;;  %v6277_v58 = vld [vmem:[%s5330_s2 + $0xe8] sm:$0xff] }
 0x300   : > { %5056 = vrot.lane.b32.xlu0 %v5055_v31, %s7632_s28  ;;  %v2348_v43 = vsel %vm690_vm2, %v2345_v34, %v2347_v40  ;;  %v2433_v45 = vsel %vm780_vm3, %v2430_v10, %v2432_v21  ;;  %v2350_v26 = vsel %vm690_vm2, %v2347_v40, %v2349_v6  ;;  %v2436_v25 = vrot.slane %v6250_v39, 2 }
 0x301   : > { %v2435_v20 = vsel %vm780_vm3, %v2432_v21, %v2434_v47  ;;  %v2352_v60 = vsel %vm690_vm2, %v2349_v6, %v2351_v18  ;;  %v2353_v54 = vrot.slane %v6268_v52, 1  ;;  %v2438_v57 = vrot.slane %v6259_v48, 2  ;;  %v1798_v21 = vld [vmem:[%s7631_s30 + $0x10] sm:$0xff]  ;;  %v1800_v6 = vld [vmem:[%s7631_s30 + $0x20] sm:$0xff] }
 0x302   : > { %v2437_v31 = vsel %vm780_vm3, %v2434_v47, %v2436_v25  ;;  %v2355_v36 = vrot.slane %v6277_v58, 1  ;;  %v2361_v23 = vrot.slane %v6304_v46, 1  ;;  %v2446_v27 = vrot.slane %v6295_v44, 2  ;;  %v1804_v47 = vld [vmem:[%s7631_s30 + $0x40] sm:$0xff] }
 0x303   : > { %2452 = vrot.lane.b32.xlu1 %v2419_v14, %s7637_s29  ;;  %v2354_v14 = vsel %vm690_vm2, %v2351_v18, %v2353_v54  ;;  %v2439_v51 = vsel %vm780_vm3, %v2436_v25, %v2438_v57  ;;  %v1808_v18 = vld [vmem:[%s7631_s30 + $0x60] sm:$0xff] }
 0x304   : > { %5066 = vrot.lane.b32.xlu0 %v5065_v37, %s7605_s22  ;;  %v2440_v37 = vrot.slane %v6268_v52, 2  ;;  %v2356_v56 = vsel %vm690_vm2, %v2353_v54, %v2355_v36  ;;  %v2362_v15 = vsel %vm690_vm2, %v2359_v9, %v2361_v23  ;;  %v1812_v25 = vld [vmem:[%s7631_s30 + $0x80] sm:$0xff]  ;;  %v2809_v54 = vld [vmem:[%s7627_s23 + $0x8] sm:$0xff]  ;;  %s4333_s22 = sshll.u32 %s647_s26, 3 }
 0x306   : > { %v2441_v2 = vsel %vm780_vm3, %v2438_v57, %v2440_v37  ;;  %v2811_v57 = vld [vmem:[%s7627_s23 + $0x18] sm:$0xff] }
 0x307   : > { %2369 = vrot.lane.b32.xlu1 %v2336_v55, %s7634_s21  ;;  %v6286_v55 = vld [vmem:[%s5330_s2 + $0xf0] sm:$0xff] }
 0x308   : > { %2454 = vrot.lane.b32.xlu0 %v2421_v63, %s7637_s29  ;;  %v2357_v63 = vrot.slane %v6286_v55, 1 }
 0x309   : > { %v6209_v38 = vpop.f32.mrf.mxu1 }
 0x30b   : > { %2371 = vrot.lane.b32.xlu1 %v2338_v8, %s7634_s21  ;;  %v4782_v12 = vpop.f32.mrf.mxu1  ;;  %v2442_v8 = vrot.slane %v6277_v58, 2 }
 0x30c   : > { %2456 = vrot.lane.b32.xlu0 %v2423_v61, %s7637_s29  ;;  %v2358_v61 = vsel %vm690_vm2, %v2355_v36, %v2357_v63  ;;  %v2813_v36 = vld [vmem:[%s7627_s23 + $0x28] sm:$0xff] }
 0x30d   : > { %v2443_v12 = vsel %vm780_vm3, %v2440_v37, %v2442_v8  ;;  %v2815_v37 = vld [vmem:[%s7627_s23 + $0x38] sm:$0xff] }
 0x30f   : > { %2373 = vrot.lane.b32.xlu1 %v2340_v22, %s7634_s21  ;;  %v2444_v22 = vrot.slane %v6286_v55, 2 }
 0x310   : > { %2458 = vrot.lane.b32.xlu0 %v2425_v5, %s7637_s29  ;;  %v2360_v5 = vsel %vm690_vm2, %v2357_v63, %v2359_v9  ;;  %v2817_v63 = vld [vmem:[%s7627_s23 + $0x48] sm:$0xff]  ;;  %v2820_v9 = vld [vmem:[%s7627_s23 + $0x60] sm:$0xff] }
 0x311   : > { %v2447_v34 = vsel %vm780_vm3, %v2444_v22, %v2446_v27 }
 0x313   : > { %2375 = vrot.lane.b32.xlu1 %v2342_v24, %s7634_s21  ;;  %v2445_v24 = vsel %vm780_vm3, %v2442_v8, %v2444_v22  ;;  %v1926_v8 = vld [vmem:[#allocation2] ss:$16 sm:$0xc]  ;;  %v1957_v22 = vld [vmem:[#allocation2 + $0x4] ss:$16 sm:$0x3] }
 0x314   : > { %2460 = vrot.lane.b32.xlu0 %v2427_v29, %s7637_s29  ;;  %v6313_v29 = vld [vmem:[%s5330_s2 + $0x108] sm:$0xff]  ;;  %s5156_s2 = smov [#allocation3]  }
 0x315   : > { %v2450_v40 = vrot.slane %v6313_v29, 2 }
 0x317   : > { %2377 = vrot.lane.b32.xlu1 %v2344_v59, %s7634_s21  ;;  %v2363_v59 = vrot.slane %v6313_v29, 1 }
 0x318   : > { %2462 = vrot.lane.b32.xlu0 %v2429_v35, %s7637_s29  ;;  %v2448_v35 = vrot.slane %v6304_v46, 2 }
 0x319   : > { %v2364_v10 = vsel %vm690_vm2, %v2361_v23, %v2363_v59  ;;  %v2819_v23 = vld [vmem:[%s7627_s23 + $0x58] sm:$0xff] }
 0x31b   : > { %2379 = vrot.lane.b32.xlu1 %v2346_v7, %s7634_s21  ;;  %v2449_v7 = vsel %vm780_vm3, %v2446_v27, %v2448_v35  ;;  %v1960_v27 = vld [vmem:[#allocation2 + $0x4] ss:$16 sm:$0x30] }
 0x31c   : > { %2464 = vrot.lane.b32.xlu0 %v2431_v42, %s7637_s29  ;;  %v2451_v42 = vsel %vm780_vm3, %v2448_v35, %v2450_v40  ;;  %v1930_v35 = vld [vmem:[#allocation2] ss:$16 sm:$0xc0] }
 0x31f   : > { %2381 = vrot.lane.b32.xlu1 %v2348_v43, %s7634_s21  ;;  %v1802_v43 = vld [vmem:[%s7631_s30 + $0x30] sm:$0xff] }
 0x320   : > { %2466 = vrot.lane.b32.xlu0 %v2433_v45, %s7637_s29  ;;  %v1806_v45 = vld [vmem:[%s7631_s30 + $0x50] sm:$0xff] }
 0x323   : > { %2383 = vrot.lane.b32.xlu1 %v2350_v26, %s7634_s21  ;;  %v1810_v26 = vld [vmem:[%s7631_s30 + $0x70] sm:$0xff] }
 0x324   : > { %2468 = vrot.lane.b32.xlu0 %v2435_v20, %s7637_s29  ;;  %v2808_v20 = vld [vmem:[%s7627_s23] sm:$0xff] }
 0x327   : > { %2385 = vrot.lane.b32.xlu1 %v2352_v60, %s7634_s21  ;;  %v2810_v60 = vld [vmem:[%s7627_s23 + $0x10] sm:$0xff] }
 0x328   : > { %2470 = vrot.lane.b32.xlu0 %v2437_v31, %s7637_s29  ;;  %v2812_v31 = vld [vmem:[%s7627_s23 + $0x20] sm:$0xff] }
 0x32b   : > { %2387 = vrot.lane.b32.xlu1 %v2354_v14, %s7634_s21  ;;  %v2814_v14 = vld [vmem:[%s7627_s23 + $0x30] sm:$0xff] }
 0x32c   : > { %2472 = vrot.lane.b32.xlu0 %v2439_v51, %s7637_s29  ;;  %v2816_v51 = vld [vmem:[%s7627_s23 + $0x40] sm:$0xff] }
 0x32f   : > { %2389 = vrot.lane.b32.xlu1 %v2356_v56, %s7634_s21  ;;  %v2818_v56 = vld [vmem:[%s7627_s23 + $0x50] sm:$0xff] }
 0x330   : > { %2474 = vrot.lane.b32.xlu0 %v2441_v2, %s7637_s29  ;;  %v2366_v2 = vpop.permute.xlu1 %2365 }
 0x333   : > { %2391 = vrot.lane.b32.xlu1 %v2358_v61, %s7634_s21  ;;  %v2368_v61 = vpop.permute.xlu0 %2367 }
 0x334   : > { %2476 = vrot.lane.b32.xlu0 %v2443_v12, %s7637_s29  ;;  %v1925_v12 = vld [vmem:[#allocation2] ss:$16 sm:$0x3] }
 0x337   : > { %2393 = vrot.lane.b32.xlu1 %v2360_v5, %s7634_s21  ;;  %v1958_v5 = vld [vmem:[#allocation2 + $0x4] ss:$16 sm:$0xc] }
 0x338   : > { %2478 = vrot.lane.b32.xlu0 %v2445_v24, %s7637_s29  ;;  %v1928_v24 = vld [vmem:[#allocation2] ss:$16 sm:$0x30] }
 0x33b   : > { %2395 = vrot.lane.b32.xlu1 %v2362_v15, %s7634_s21  ;;  %v2133_v15 = vld [vmem:[%s7636_s7 + $0x178] sm:$0xff] }
 0x33c   : > { %2480 = vrot.lane.b32.xlu0 %v2447_v34, %s7637_s29  ;;  %v1927_v34 = vor.u32 %v1926_v8, %v1925_v12  ;;  %2223 = vmatpush1.msra.mxu1 %v2133_v15  ;;  %v2506_v8 = vsel %vm868_vm4, 0.0, %v2366_v2  ;;  %v2543_v2 = vld [vmem:[%s7571_s9 + $0x8] sm:$0xf]  ;;  %v2507_v15 = vsel %vm868_vm4, %v6031_v30, %v2368_v61 }
 0x33d   : > { %2224 = vmatprep.subr.mxu1 %v5148_v0 }
 0x33f   : > { %2397 = vrot.lane.b32.xlu1 %v2364_v10, %s7634_s21  ;;  %v1959_v10 = vor.u32 %v1958_v5, %v1957_v22  ;;  %v2127_v22 = vld [vmem:[%s7636_s7 + $0x148] sm:$0xff] }
 0x340   : > { %2482 = vrot.lane.b32.xlu0 %v2449_v7, %s7637_s29  ;;  %v2821_v7 = vld [vmem:[%s7627_s23 + $0x68] sm:$0xff] }
 0x343   : > { %2399 = vrot.lane.b32.xlu1 %v2363_v59, %s7634_s21  ;;  %v2132_v59 = vld [vmem:[%s7636_s7 + $0x170] sm:$0xff]  ;;  %s4257_s21 = scalar_lea.sflag [#allocation4], %s647_s26 }
 0x344   : > { %2484 = vrot.lane.b32.xlu0 %v2451_v42, %s7637_s29  ;;  %v2131_v42 = vld [vmem:[%s7636_s7 + $0x168] sm:$0xff]  ;;  %2225 = vmatpush1.msra.mxu1 %v2132_v59 }
 0x345   : > { %2226 = vmatprep.subr.mxu1 %v5148_v0 }
 0x346   : > { %2227 = vmatpush1.msra.mxu1 %v2131_v42 }
 0x347   : > { %1820 = vperm.xlu1 %5054, %v1798_v21   ;;  %2228 = vmatprep.subr.mxu1 %v5148_v0 }
 0x348   : > { %2486 = vrot.lane.b32.xlu0 %v2450_v40, %s7637_s29  ;;  %v1962_v40 = vld [vmem:[#allocation2 + $0x4] ss:$16 sm:$0xc0] }
 0x34b   : > { %1840 = vperm.xlu1 %5054, %v1802_v43   ;;  %v1929_v43 = vor.u32 %v1928_v24, %v1927_v34 }
 0x34c   : > { %1830 = vperm.xlu0 %5053, %v1800_v6   ;;  %v1961_v6 = vor.u32 %v1960_v27, %v1959_v10 }
 0x34f   : > { %1860 = vperm.xlu1 %5054, %v1806_v45  }
 0x350   : > { %1850 = vperm.xlu0 %5053, %v1804_v47   ;;  %v2130_v47 = vld [vmem:[%s7636_s7 + $0x160] sm:$0xff] }
 0x351   : > { %2229 = vmatpush1.msra.mxu1 %v2130_v47 }
 0x352   : > { %2230 = vmatprep.subr.mxu1 %v5148_v0 }
 0x353   : > { %1880 = vperm.xlu1 %5054, %v1810_v26   ;;  %v1931_v26 = vor.u32 %v1930_v35, %v1929_v43  ;;  %v2542_v35 = vld [vmem:[%s7571_s9] sm:$0xff] }
 0x354   : > { %1870 = vperm.xlu0 %5053, %v1808_v18  }
 0x357   : > { %2827 = vperm.xlu1 %5054, %v2808_v20  }
 0x358   : > { %1890 = vperm.xlu0 %5053, %v1812_v25   ;;  %v1963_v25 = vor.u32 %v1962_v40, %v1961_v6 }
 0x35b   : > { %2837 = vperm.xlu1 %5054, %v2810_v60  }
 0x35c   : > { %2832 = vperm.xlu0 %5053, %v2809_v54  }
 0x35f   : > { %2847 = vperm.xlu1 %5054, %v2812_v31   ;;  %v2129_v31 = vld [vmem:[%s7636_s7 + $0x158] sm:$0xff] }
 0x360   : > { %2842 = vperm.xlu0 %5053, %v2811_v57   ;;  %2231 = vmatpush1.msra.mxu1 %v2129_v31 }
 0x361   : > { %2232 = vmatprep.subr.mxu1 %v5148_v0 }
 0x363   : > { %2857 = vperm.xlu1 %5054, %v2814_v14  }
 0x364   : > { %2852 = vperm.xlu0 %5053, %v2813_v36  }
 0x367   : > { %2867 = vperm.xlu1 %5054, %v2816_v51  }
 0x368   : > { %2862 = vperm.xlu0 %5053, %v2815_v37   ;;  %v2128_v37 = vld [vmem:[%s7636_s7 + $0x150] sm:$0xff] }
 0x369   : > { %2233 = vmatpush1.msra.mxu1 %v2128_v37 }
 0x36a   : > { %2234 = vmatprep.subr.mxu1 %v5148_v0 }
 0x36b   : > { %2877 = vperm.xlu1 %5054, %v2818_v56   ;;  %2235 = vmatpush1.msra.mxu1 %v2127_v22 }
 0x36c   : > { %2872 = vperm.xlu0 %5053, %v2817_v63   ;;  %2236 = vmatprep.subr.mxu1 %v5148_v0 }
 0x36f   : > { %2887 = vperm.xlu1 %5054, %v2820_v9  }
 0x370   : > { %2882 = vperm.xlu0 %5053, %v2819_v23  }
 0x371   : > { %v5062_v21 = vpop.permute.xlu1 %5061 }
 0x372   : > { %v5057_v45 = vpop.permute.xlu0 %5056  ;;  %v5064_v60 = vunpack.i.h.bf16 %v5062_v21  ;;  %v5063_v54 = vunpack.i.l.bf16 %v5062_v21 }
 0x373   : > { %v5059_v18 = vunpack.i.h.bf16 %v5057_v45  ;;  %v5058_v20 = vunpack.i.l.bf16 %v5057_v45  ;;  %2892 = vperm.xlu1 %5054, %v2821_v7  }
 0x375   : > { %v2076_v57 = vsel %vm1487_vm8, %v1931_v26, %v5059_v18  ;;  %v2453_v14 = vpop.permute.xlu1 %2452  ;;  %v2079_v36 = vsel %vm1487_vm8, %v1963_v25, %v5058_v20 }
 0x376   : > { %v5067_v51 = vpop.permute.xlu0 %5066  ;;  %v2080_v9 = vsel %vm1506_vm9, %v2079_v36, %v5063_v54  ;;  %v2077_v12 = vsel %vm1506_vm9, %v2076_v57, %v5064_v60  ;;  %v2524_v5 = vsel %vm887_vm5, %v2506_v8, %v2453_v14 }
 0x377   : > { %v5069_v56 = vunpack.i.h.bf16 %v5067_v51  ;;  %v5068_v63 = vunpack.i.l.bf16 %v5067_v51  ;;  %v2569_v10 = vrot.slane %v2524_v5, 6 }
 0x379   : > { %v2081_v23 = vsel %vm1597_vm10, %v2080_v9, %v5068_v63  ;;  %v2078_v24 = vsel %vm1597_vm10, %v2077_v12, %v5069_v56  ;;  %v2370_v27 = vpop.permute.xlu1 %2369 }
 0x37a   : > { %v2455_v59 = vpop.permute.xlu0 %2454  ;;  %2216 = vmatprep.mubr.f32.mxu0 %v2081_v23  ;;  %v2508_v40 = vsel %vm868_vm4, %v6034_v32, %v2370_v27 }
 0x37b   : > { %v2525_v34 = vsel %vm887_vm5, %v2507_v15, %v2455_v59  ;;  %2217 = vmatmul.mubr.f32.vlgmr.msra.gmra.mxu0 %v2078_v24 }
 0x37c   : > { %v2570_v7 = vrot.slane %v2525_v34, 6  ;;  %4784 = vmatpush3.msk.msra.mxu0 %vm1004_vm0, %v2543_v2  ;;  %4787 = vmatprep.mubr.msk.f32.mxu0 %vm5149_vm1, %v5148_v0 }
 0x37d   : > { %4785 = vmatprep.subr.mxu0 %v5148_v0  ;;  %v2372_v30 = vpop.permute.xlu1 %2371 }
 0x37e   : > { %4786 = vmatpush3.msra.mxu0 %v2542_v35  ;;  %v2457_v61 = vpop.permute.xlu0 %2456  ;;  %v2571_v42 = vsel %vm933_vm6, %v2569_v10, %v2570_v7  ;;  %v2509_v32 = vsel %vm868_vm4, %v6184_v28, %v2372_v30 }
 0x37f   : > { %v2526_v21 = vsel %vm887_vm5, %v2508_v40, %v2457_v61  ;;  %4788 = vmatmul.mubr.msk.f32.vlgmr.msra.gmra.mxu0 %vm969_vm7, %v2571_v42 }
 0x380   : > { %v2572_v43 = vrot.slane %v2526_v21, 6  ;;  %4790 = vmatprep.mubr.msk.f32.mxu0 %vm5149_vm1, %v5148_v0 }
 0x381   : > { %v2374_v6 = vpop.permute.xlu1 %2373 }
 0x382   : > { %v2459_v45 = vpop.permute.xlu0 %2458  ;;  %v2573_v47 = vsel %vm933_vm6, %v2570_v7, %v2572_v43  ;;  %v2510_v20 = vsel %vm868_vm4, %v6192_v62, %v2374_v6 }
 0x383   : > { %v2527_v26 = vsel %vm887_vm5, %v2509_v32, %v2459_v45  ;;  %4791 = vmatmul.mubr.msk.f32.gmra.mxu0 %vm969_vm7, %v2573_v47 }
 0x384   : > { %v2574_v18 = vrot.slane %v2527_v26, 6  ;;  %4793 = vmatprep.mubr.msk.f32.mxu0 %vm5149_vm1, %v5148_v0 }
 0x385   : > { %v2376_v25 = vpop.permute.xlu1 %2375 }
 0x386   : > { %v2461_v28 = vpop.permute.xlu0 %2460  ;;  %v2575_v60 = vsel %vm933_vm6, %v2572_v43, %v2574_v18  ;;  %v2511_v57 = vsel %vm868_vm4, %v6203_v41, %v2376_v25 }
 0x387   : > { %v2528_v54 = vsel %vm887_vm5, %v2510_v20, %v2461_v28  ;;  %4794 = vmatmul.mubr.msk.f32.gmra.mxu0 %vm969_vm7, %v2575_v60 }
 0x388   : > { %v2576_v31 = vrot.slane %v2528_v54, 6  ;;  %4796 = vmatprep.mubr.msk.f32.mxu0 %vm5149_vm1, %v5148_v0 }
 0x389   : > { %v2378_v14 = vpop.permute.xlu1 %2377 }
 0x38a   : > { %v2463_v62 = vpop.permute.xlu0 %2462  ;;  %v2577_v36 = vsel %vm933_vm6, %v2574_v18, %v2576_v31  ;;  %v2512_v56 = vsel %vm868_vm4, %v6214_v49, %v2378_v14 }
 0x38b   : > { %v2529_v51 = vsel %vm887_vm5, %v2511_v57, %v2463_v62  ;;  %4797 = vmatmul.mubr.msk.f32.gmra.mxu0 %vm969_vm7, %v2577_v36 }
 0x38c   : > { %v2578_v37 = vrot.slane %v2529_v51, 6  ;;  %4799 = vmatprep.mubr.msk.f32.mxu0 %vm5149_vm1, %v5148_v0 }
 0x38d   : > { %v2380_v63 = vpop.permute.xlu1 %2379 }
 0x38e   : > { %v2465_v41 = vpop.permute.xlu0 %2464  ;;  %v2579_v8 = vsel %vm933_vm6, %v2576_v31, %v2578_v37  ;;  %v2513_v22 = vsel %vm868_vm4, %v6223_v1, %v2380_v63 }
 0x38f   : > { %v2530_v9 = vsel %vm887_vm5, %v2512_v56, %v2465_v41  ;;  %4800 = vmatmul.mubr.msk.f32.gmra.mxu0 %vm969_vm7, %v2579_v8 }
 0x390   : > { %v2580_v12 = vrot.slane %v2530_v9, 6  ;;  %4802 = vmatprep.mubr.msk.f32.mxu0 %vm5149_vm1, %v5148_v0 }
 0x391   : > { %v2382_v5 = vpop.permute.xlu1 %2381 }
 0x392   : > { %v2467_v49 = vpop.permute.xlu0 %2466  ;;  %v2581_v23 = vsel %vm933_vm6, %v2578_v37, %v2580_v12  ;;  %v2514_v27 = vsel %vm868_vm4, %v6232_v33, %v2382_v5 }
 0x393   : > { %v2531_v24 = vsel %vm887_vm5, %v2513_v22, %v2467_v49  ;;  %4803 = vmatmul.mubr.msk.f32.gmra.mxu0 %vm969_vm7, %v2581_v23 }
 0x394   : > { %v2582_v2 = vrot.slane %v2531_v24, 6  ;;  %4805 = vmatprep.mubr.msk.f32.mxu0 %vm5149_vm1, %v5148_v0 }
 0x395   : > { %v2384_v15 = vpop.permute.xlu1 %2383 }
 0x396   : > { %v2469_v1 = vpop.permute.xlu0 %2468  ;;  %v2583_v59 = vsel %vm933_vm6, %v2580_v12, %v2582_v2  ;;  %v2515_v10 = vsel %vm868_vm4, %v6241_v3, %v2384_v15 }
 0x397   : > { %v2532_v34 = vsel %vm887_vm5, %v2514_v27, %v2469_v1  ;;  %4806 = vmatmul.mubr.msk.f32.gmra.mxu0 %vm969_vm7, %v2583_v59 }
 0x398   : > { %v2584_v35 = vrot.slane %v2532_v34, 6  ;;  %4808 = vmatprep.mubr.msk.f32.mxu0 %vm5149_vm1, %v5148_v0 }
 0x399   : > { %v2386_v7 = vpop.permute.xlu1 %2385 }
 0x39a   : > { %v2471_v33 = vpop.permute.xlu0 %2470  ;;  %v2585_v40 = vsel %vm933_vm6, %v2582_v2, %v2584_v35  ;;  %v2516_v42 = vsel %vm868_vm4, %v6250_v39, %v2386_v7 }
 0x39b   : > { %v2533_v30 = vsel %vm887_vm5, %v2515_v10, %v2471_v33  ;;  %4809 = vmatmul.mubr.msk.f32.gmra.mxu0 %vm969_vm7, %v2585_v40  ;;  %v2125_v40 = vld [vmem:[%s7636_s7 + $0x138] sm:$0xff] }
 0x39c   : > { %v2586_v61 = vrot.slane %v2533_v30, 6  ;;  %4811 = vmatprep.mubr.msk.f32.mxu0 %vm5149_vm1, %v5148_v0  ;;  %v2124_v30 = vld [vmem:[%s7636_s7 + $0x130] sm:$0xff] }
 0x39d   : > { %v2388_v21 = vpop.permute.xlu1 %2387 }
 0x39e   : > { %v2473_v3 = vpop.permute.xlu0 %2472  ;;  %v2587_v43 = vsel %vm933_vm6, %v2584_v35, %v2586_v61  ;;  %v2517_v45 = vsel %vm868_vm4, %v6259_v48, %v2388_v21  ;;  %v2126_v35 = vld [vmem:[%s7636_s7 + $0x140] sm:$0xff] }
 0x39f   : > { %v2534_v32 = vsel %vm887_vm5, %v2516_v42, %v2473_v3  ;;  %4812 = vmatmul.mubr.msk.f32.gmra.mxu0 %vm969_vm7, %v2587_v43  ;;  %2237 = vmatpush1.msra.mxu1 %v2126_v35  ;;  %v2123_v43 = vld [vmem:[%s7636_s7 + $0x128] sm:$0xff]  ;;  %v2136_v35 = vld [vmem:[%s7636_s7 + $0x190] sm:$0xff] }
 0x3a0   : > { %v2588_v6 = vrot.slane %v2534_v32, 6  ;;  %4814 = vmatprep.mubr.msk.f32.mxu0 %vm5149_vm1, %v5148_v0  ;;  %2238 = vmatprep.subr.mxu1 %v5148_v0 }
 0x3a1   : > { %v2390_v47 = vpop.permute.xlu1 %2389  ;;  %2239 = vmatpush1.msra.mxu1 %v2125_v40 }
 0x3a2   : > { %v2475_v39 = vpop.permute.xlu0 %2474  ;;  %v2589_v26 = vsel %vm933_vm6, %v2586_v61, %v2588_v6  ;;  %v2518_v25 = vsel %vm868_vm4, %v6268_v52, %v2390_v47  ;;  %2240 = vmatprep.subr.mxu1 %v5148_v0 }
 0x3a3   : > { %v2535_v18 = vsel %vm887_vm5, %v2517_v45, %v2475_v39  ;;  %4815 = vmatmul.mubr.msk.f32.gmra.mxu0 %vm969_vm7, %v2589_v26  ;;  %2241 = vmatpush1.msra.mxu1 %v2124_v30 }
 0x3a4   : > { %v2590_v20 = vrot.slane %v2535_v18, 6  ;;  %4817 = vmatprep.mubr.msk.f32.mxu0 %vm5149_vm1, %v5148_v0  ;;  %2242 = vmatprep.subr.mxu1 %v5148_v0 }
 0x3a5   : > { %v2392_v28 = vpop.permute.xlu1 %2391  ;;  %2243 = vmatpush1.msra.mxu1 %v2123_v43 }
 0x3a6   : > { %v2477_v48 = vpop.permute.xlu0 %2476  ;;  %v2591_v60 = vsel %vm933_vm6, %v2588_v6, %v2590_v20  ;;  %v2519_v57 = vsel %vm868_vm4, %v6277_v58, %v2392_v28  ;;  %2244 = vmatprep.subr.mxu1 %v5148_v0 }
 0x3a7   : > { %v2536_v54 = vsel %vm887_vm5, %v2518_v25, %v2477_v48  ;;  %4818 = vmatmul.mubr.msk.f32.gmra.mxu0 %vm969_vm7, %v2591_v60  ;;  %v2120_v60 = vld [vmem:[%s7636_s7 + $0x110] sm:$0xff] }
 0x3a8   : > { %v2592_v31 = vrot.slane %v2536_v54, 6  ;;  %4820 = vmatprep.mubr.msk.f32.mxu0 %vm5149_vm1, %v5148_v0 }
 0x3a9   : > { %v2394_v14 = vpop.permute.xlu1 %2393 }
 0x3aa   : > { %v2479_v52 = vpop.permute.xlu0 %2478  ;;  %v2593_v62 = vsel %vm933_vm6, %v2590_v20, %v2592_v31  ;;  %v2520_v37 = vsel %vm868_vm4, %v6286_v55, %v2394_v14 }
 0x3ab   : > { %v2537_v36 = vsel %vm887_vm5, %v2519_v57, %v2479_v52  ;;  %4821 = vmatmul.mubr.msk.f32.gmra.mxu0 %vm969_vm7, %v2593_v62 }
 0x3ac   : > { %v2594_v51 = vrot.slane %v2537_v36, 6  ;;  %4823 = vmatprep.mubr.msk.f32.mxu0 %vm5149_vm1, %v5148_v0  ;;  %v2118_v36 = vld [vmem:[%s7636_s7 + $0x100] sm:$0xff] }
 0x3ad   : > { %v2396_v56 = vpop.permute.xlu1 %2395 }
 0x3ae   : > { %v2481_v58 = vpop.permute.xlu0 %2480  ;;  %v2595_v63 = vsel %vm933_vm6, %v2592_v31, %v2594_v51  ;;  %v2521_v9 = vsel %vm868_vm4, %v6295_v44, %v2396_v56 }
 0x3af   : > { %v2538_v41 = vsel %vm887_vm5, %v2520_v37, %v2481_v58  ;;  %4824 = vmatmul.mubr.msk.f32.gmra.mxu0 %vm969_vm7, %v2595_v63  ;;  %v2141_v58 = vld [vmem:[%s7636_s7 + $0x1b8] sm:$0xff] }
 0x3b0   : > { %v2596_v8 = vrot.slane %v2538_v41, 6  ;;  %4826 = vmatprep.mubr.msk.f32.mxu0 %vm5149_vm1, %v5148_v0  ;;  %v2140_v41 = vld [vmem:[%s7636_s7 + $0x1b0] sm:$0xff] }
 0x3b1   : > { %v2398_v12 = vpop.permute.xlu1 %2397 }
 0x3b2   : > { %v2483_v55 = vpop.permute.xlu0 %2482  ;;  %v2597_v22 = vsel %vm933_vm6, %v2594_v51, %v2596_v8  ;;  %v2522_v23 = vsel %vm868_vm4, %v6304_v46, %v2398_v12 }
 0x3b3   : > { %v2539_v5 = vsel %vm887_vm5, %v2521_v9, %v2483_v55  ;;  %4827 = vmatmul.mubr.msk.f32.gmra.mxu0 %vm969_vm7, %v2597_v22  ;;  %v2139_v9 = vld [vmem:[%s7636_s7 + $0x1a8] sm:$0xff] }
 0x3b4   : > { %v2598_v49 = vrot.slane %v2539_v5, 6  ;;  %4829 = vmatprep.mubr.msk.f32.mxu0 %vm5149_vm1, %v5148_v0  ;;  %v2138_v5 = vld [vmem:[%s7636_s7 + $0x1a0] sm:$0xff] }
 0x3b5   : > { %v2400_v24 = vpop.permute.xlu1 %2399 }
 0x3b6   : > { %v2485_v44 = vpop.permute.xlu0 %2484  ;;  %v2599_v2 = vsel %vm933_vm6, %v2596_v8, %v2598_v49  ;;  %v2523_v1 = vsel %vm868_vm4, %v6313_v29, %v2400_v24  ;;  %v5085_v29 = vld [vmem:[%s7635_s6] ss:$0 sm:$0xff]  ;;  %s7640_s6 = sld [smem:[#allocation21_spill]] }
 0x3b7   : > { %v2540_v27 = vsel %vm887_vm5, %v2522_v23, %v2485_v44  ;;  %4830 = vmatmul.mubr.msk.f32.gmra.mxu0 %vm969_vm7, %v2599_v2  ;;  %v1708_v7 = vadd.f32 %v5085_v29, %v6057_v13  ;;  %v1728_v13 = vadd.f32 %v5085_v29, %v6089_v16  ;;  %v1718_v42 = vadd.f32 %v5085_v29, %v6073_v50  ;;  %v2122_v50 = vld [vmem:[%s7636_s7 + $0x120] sm:$0xff]  ;;  %v2137_v23 = vld [vmem:[%s7636_s7 + $0x198] sm:$0xff] }
 0x3b8   : > { %v2600_v15 = vrot.slane %v2540_v27, 6  ;;  %4832 = vmatprep.mubr.msk.f32.mxu0 %vm5149_vm1, %v5148_v0  ;;  %v1748_v6 = vadd.f32 %v5085_v29, %v6120_v4  ;;  %v1738_v16 = vadd.f32 %v5085_v29, %v6103_v11  ;;  %2245 = vmatpush1.msra.mxu1 %v2122_v50  ;;  %v2121_v4 = vld [vmem:[%s7636_s7 + $0x118] sm:$0xff]  ;;  %v1768_v11 = vadd.f32 %v5085_v29, %v6151_v19  ;;  %v2119_v19 = vld [vmem:[%s7636_s7 + $0x108] sm:$0xff]  ;;  %v2824_v50 = vld [vmem:[%s7627_s23 + $0x80] sm:$0xff] }
 0x3b9   : > { %v1782_v61 = vmax.f32 %v1708_v7, 0.0  ;;  %v1786_v32 = vmax.f32 %v1728_v13, 0.0  ;;  %v1784_v45 = vmax.f32 %v1718_v42, 0.0  ;;  %2246 = vmatprep.subr.mxu1 %v5148_v0  ;;  %v1758_v28 = vadd.f32 %v5085_v29, %v6134_v53  ;;  %v2822_v42 = vld [vmem:[%s7627_s23 + $0x70] sm:$0xff] }
 0x3ba   : > { %v2487_v59 = vpop.permute.xlu0 %2486  ;;  %v2601_v46 = vsel %vm933_vm6, %v2598_v49, %v2600_v15  ;;  %v1790_v20 = vmax.f32 %v1748_v6, 0.0  ;;  %2247 = vmatpush1.msra.mxu1 %v2121_v4  ;;  %v1788_v25 = vmax.f32 %v1738_v16, 0.0  ;;  %v1794_v53 = vmax.f32 %v1768_v11, 0.0 }
 0x3bb   : > { %v2541_v34 = vsel %vm887_vm5, %v2523_v1, %v2487_v59  ;;  %4833 = vmatmul.mubr.msk.f32.gmra.mxu0 %vm969_vm7, %v2601_v46  ;;  %2248 = vmatprep.subr.mxu1 %v5148_v0  ;;  %v1792_v14 = vmax.f32 %v1758_v28, 0.0  ;;  %v1778_v52 = vadd.f32 %v5085_v29, %v6209_v38 }
 0x3bc   : > { %v2602_v10 = vrot.slane %v2541_v34, 6  ;;  %4835 = vmatprep.mubr.msk.f32.mxu0 %vm5149_vm1, %v5148_v0  ;;  %2249 = vmatpush1.msra.mxu1 %v2120_v60 }
 0x3bd   : > { %2250 = vmatprep.subr.mxu1 %v5148_v0  ;;  %v1796_v38 = vmax.f32 %v1778_v52, 0.0 }
 0x3be   : > { %v2603_v33 = vsel %vm933_vm6, %v2600_v15, %v2602_v10  ;;  %2251 = vmatpush1.msra.mxu1 %v2119_v19  ;;  %v2135_v10 = vld [vmem:[%s7636_s7 + $0x188] sm:$0xff] }
 0x3bf   : > { %4836 = vmatmul.mubr.msk.f32.gmra.mxu0 %vm969_vm7, %v2603_v33  ;;  %2252 = vmatprep.subr.mxu1 %v5148_v0 }
 0x3c0   : > { %2253 = vmatpush1.msra.mxu1 %v2118_v36 }
 0x3c1   : > { %2270 = vmatprep.subr.mxu1 %v5148_v0 }
 0x3c2   : > { %v1821_v21 = vpop.permute.xlu1 %1820  ;;  %2271 = vmatpush2.msra.mxu1 %v2141_v58 }
 0x3c3   : > { %v1894_v3 = vmul.f32 %v1821_v21, %v1782_v61  ;;  %2272 = vmatprep.subr.mxu1 %v5148_v0 }
 0x3c4   : > { %2273 = vmatpush2.msra.mxu1 %v2140_v41 }
 0x3c5   : > { %1910 = vst.msk [vmem:[#allocation2 + $0x8] sm:$0xff] %vm1487_vm8, %v1894_v3  ;;  %2274 = vmatprep.subr.mxu1 %v5148_v0  ;;  %v2134_v3 = vld [vmem:[%s7636_s7 + $0x180] sm:$0xff] }
 0x3c6   : > { %v1841_v47 = vpop.permute.xlu1 %1840  ;;  %2275 = vmatpush2.msra.mxu1 %v2139_v9 }
 0x3c7   : > { %v1898_v39 = vmul.f32 %v1841_v47, %v1786_v32  ;;  %v1831_v26 = vpop.permute.xlu0 %1830  ;;  %2276 = vmatprep.subr.mxu1 %v5148_v0 }
 0x3c8   : > { %v1896_v18 = vmul.f32 %v1831_v26, %v1784_v45  ;;  %2277 = vmatpush2.msra.mxu1 %v2138_v5  ;;  %v2823_v26 = vld [vmem:[%s7627_s23 + $0x78] sm:$0xff] }
 0x3c9   : > { %1914 = vst.msk [vmem:[#allocation2 + $0x28] sm:$0xff] %vm1487_vm8, %v1898_v39  ;;  %2278 = vmatprep.subr.mxu1 %v5148_v0 }
 0x3ca   : > { %1912 = vst.msk [vmem:[#allocation2 + $0x18] sm:$0xff] %vm1487_vm8, %v1896_v18  ;;  %v1861_v48 = vpop.permute.xlu1 %1860  ;;  %2279 = vmatpush2.msra.mxu1 %v2137_v23 }
 0x3cb   : > { %v1902_v54 = vmul.f32 %v1861_v48, %v1790_v20  ;;  %v1851_v31 = vpop.permute.xlu0 %1850  ;;  %2280 = vmatprep.subr.mxu1 %v5148_v0 }
 0x3cc   : > { %v1900_v57 = vmul.f32 %v1851_v31, %v1788_v25  ;;  %2281 = vmatpush2.msra.mxu1 %v2136_v35  ;;  %v6670_v31 = vld [vmem:[%s7572_s10] ss:$0 sm:$0xff] }
 0x3cd   : > { %1918 = vst.msk [vmem:[#allocation2 + $0x48] sm:$0xff] %vm1487_vm8, %v1902_v54  ;;  %2282 = vmatprep.subr.mxu1 %v5148_v0 }
 0x3ce   : > { %1916 = vst.msk [vmem:[#allocation2 + $0x38] sm:$0xff] %vm1487_vm8, %v1900_v57  ;;  %v1881_v62 = vpop.permute.xlu1 %1880  ;;  %2283 = vmatpush2.msra.mxu1 %v2135_v10 }
 0x3cf   : > { %v1906_v51 = vmul.f32 %v1881_v62, %v1794_v53  ;;  %v1871_v37 = vpop.permute.xlu0 %1870  ;;  %2284 = vmatprep.subr.mxu1 %v5148_v0 }
 0x3d0   : > { %v1904_v56 = vmul.f32 %v1871_v37, %v1792_v14  ;;  %2285 = vmatpush2.msra.mxu1 %v2134_v3 }
 0x3d1   : > { %1922 = vst.msk [vmem:[#allocation2 + $0x68] sm:$0xff] %vm1487_vm8, %v1906_v51  ;;  %v2005_v55 = vld [vmem:[#allocation2 + $0xa] ss:$16 sm:$0x3]  ;;  %4838 = vmatprep.subr.mxu1 %v5148_v0 }
 0x3d2   : > { %1920 = vst.msk [vmem:[#allocation2 + $0x58] sm:$0xff] %vm1487_vm8, %v1904_v56  ;;  %v1997_v49 = vld [vmem:[#allocation2 + $0x9] ss:$16 sm:$0x3]  ;;  %v2828_v18 = vpop.permute.xlu1 %2827 }
 0x3d3   : > { %v1891_v63 = vpop.permute.xlu0 %1890  ;;  %v2029_v15 = vld [vmem:[#allocation2 + $0xd] ss:$16 sm:$0x3]  ;;  %v2013_v43 = vld [vmem:[#allocation2 + $0xb] ss:$16 sm:$0x3] }
 0x3d4   : > { %v1908_v8 = vmul.f32 %v1891_v63, %v1796_v38 }
 0x3d5   : > { %v2006_v12 = vld [vmem:[#allocation2 + $0xa] ss:$16 sm:$0xc]  ;;  %v1998_v22 = vld [vmem:[#allocation2 + $0x9] ss:$16 sm:$0xc] }
 0x3d6   : > { %1924 = vst.msk [vmem:[#allocation2 + $0x78] sm:$0xff] %vm1487_vm8, %v1908_v8  ;;  %v2007_v2 = vor.u32 %v2006_v12, %v2005_v55  ;;  %v1999_v27 = vor.u32 %v1998_v22, %v1997_v49  ;;  %v2030_v1 = vld [vmem:[#allocation2 + $0xd] ss:$16 sm:$0xc]  ;;  %v2838_v4 = vpop.permute.xlu1 %2837 }
 0x3d7   : > { %v2031_v30 = vor.u32 %v2030_v1, %v2029_v15  ;;  %v2014_v13 = vld [vmem:[#allocation2 + $0xb] ss:$16 sm:$0xc]  ;;  %v2833_v20 = vpop.permute.xlu0 %2832 }
 0x3d8   : > { %v2015_v45 = vor.u32 %v2014_v13, %v2013_v43 }
 0x3d9   : > { %v2008_v24 = vld [vmem:[#allocation2 + $0xa] ss:$16 sm:$0x30]  ;;  %v2000_v44 = vld [vmem:[#allocation2 + $0x9] ss:$16 sm:$0x30] }
 0x3da   : > { %v2009_v59 = vor.u32 %v2008_v24, %v2007_v2  ;;  %v2001_v46 = vor.u32 %v2000_v44, %v1999_v27  ;;  %v2032_v34 = vld [vmem:[#allocation2 + $0xd] ss:$16 sm:$0x30]  ;;  %v2016_v32 = vld [vmem:[#allocation2 + $0xb] ss:$16 sm:$0x30]  ;;  %v6661_v11 = vpop.permute.xlu1 %2847 }
 0x3db   : > { %v2033_v21 = vor.u32 %v2032_v34, %v2031_v30  ;;  %v2017_v47 = vor.u32 %v2016_v32, %v2015_v45  ;;  %v2843_v25 = vpop.permute.xlu0 %2842  ;;  %v1990_v34 = vld [vmem:[#allocation2 + $0x8] ss:$16 sm:$0xc]  ;;  %v2024_v43 = vld [vmem:[#allocation2 + $0xc] ss:$16 sm:$0x30] }
 0x3dc   : > { %v1992_v30 = vld [vmem:[#allocation2 + $0x8] ss:$16 sm:$0x30] }
 0x3dd   : > { %v2010_v29 = vld [vmem:[#allocation2 + $0xa] ss:$16 sm:$0xc0]  ;;  %v2002_v7 = vld [vmem:[#allocation2 + $0x9] ss:$16 sm:$0xc0] }
 0x3de   : > { %v2011_v33 = vor.u32 %v2010_v29, %v2009_v59  ;;  %v2003_v40 = vor.u32 %v2002_v7, %v2001_v46  ;;  %v2034_v61 = vld [vmem:[#allocation2 + $0xd] ss:$16 sm:$0xc0]  ;;  %v2018_v16 = vld [vmem:[#allocation2 + $0xb] ss:$16 sm:$0xc0]  ;;  %v6663_v28 = vpop.permute.xlu1 %2857 }
 0x3df   : > { %v2035_v6 = vor.u32 %v2034_v61, %v2033_v21  ;;  %v2019_v39 = vor.u32 %v2018_v16, %v2017_v47  ;;  %v6665_v60 = vpop.permute.xlu0 %2852  ;;  %v2022_v7 = vld [vmem:[#allocation2 + $0xc] ss:$16 sm:$0xc]  ;;  %v1994_v45 = vld [vmem:[#allocation2 + $0x8] ss:$16 sm:$0xc0] }
 0x3e0   : > { %2065 = vrot.lane.b32.xlu1 %v2011_v33, %s7633_s27  ;;  %2061 = vrot.lane.b32.xlu0 %v2003_v40, %s7632_s28  ;;  %v2021_v61 = vld [vmem:[#allocation2 + $0xc] ss:$16 sm:$0x3] }
 0x3e1   : > { %v2023_v16 = vor.u32 %v2022_v7, %v2021_v61 }
 0x3e2   : > { %v6675_v14 = vpop.permute.xlu1 %2867 }
 0x3e3   : > { %v6677_v62 = vpop.permute.xlu0 %2862 }
 0x3e4   : > { %2897 = vperm.xlu1 %5054, %v2822_v42   ;;  %2073 = vrot.lane.b32.xlu0 %v2035_v6, %s7632_s28 }
 0x3e6   : > { %v6683_v41 = vpop.permute.xlu1 %2877 }
 0x3e7   : > { %v6686_v12 = vpop.permute.xlu0 %2872 }
 0x3e8   : > { %2907 = vperm.xlu1 %5054, %v2824_v50   ;;  %2069 = vrot.lane.b32.xlu0 %v2019_v39, %s7638_s24 }
 0x3ea   : > { %v6701_v59 = vpop.permute.xlu1 %2887 }
 0x3eb   : > { %v6704_v35 = vpop.permute.xlu0 %2882 }
 0x3ec   : > { %2902 = vperm.xlu0 %5053, %v2823_v26   ;;  %v2026_v26 = vld [vmem:[#allocation2 + $0xc] ss:$16 sm:$0xc0] }
 0x43b   : > { %v4523_v48 = vpop.f32.mrf.mxu0 }
 0x43d   : > { %v4524_v54 = vpop.f32.mrf.mxu0 }
 0x43e   : > { %v6672_v57 = vadd.f32 %v4524_v54, %v4523_v48  ;;  %v2025_v48 = vor.u32 %v2024_v43, %v2023_v16 }
 0x43f   : > { %v2707_v19 = vpop.f32.mrf.mxu0 }
 0x440   : > { %v2708_v53 = vadd.f32 %v6670_v31, %v2707_v19 }
 0x441   : > { %v4789_v52 = vpop.f32.mrf.mxu0 }
 0x442   : > { %v2791_v36 = vmax.f32 %v2708_v53, 0.0 }
 0x443   : > { %v2712_v51 = vpop.f32.mrf.mxu0 }
 0x444   : > { %v6679_v37 = vmul.f32 %v2828_v18, %v2791_v36  ;;  %v2713_v56 = vadd.f32 %v6670_v31, %v2712_v51  ;;  %v6716_v18 = vpop.permute.xlu1 %2892 }
 0x445   : > { %v4792_v58 = vpop.f32.mrf.mxu0 }
 0x446   : > { %v2792_v38 = vmax.f32 %v2713_v56, 0.0  ;;  %v3032_v63 = vrot.slane %v6679_v37, 4  ;;  %v2944_v8 = vrot.slane %v6679_v37, 2  ;;  %v2027_v56 = vor.u32 %v2026_v26, %v2025_v48 }
 0x447   : > { %v2717_v9 = vpop.f32.mrf.mxu0 }
 0x448   : > { %v6688_v55 = vmul.f32 %v2833_v20, %v2792_v38  ;;  %v2718_v22 = vadd.f32 %v6670_v31, %v2717_v9  ;;  %3065 = vrot.lane.b32.xlu0 %v3032_v63, %s7633_s27  ;;  %v2945_v2 = vsel %vm780_vm3, %v5722_v17, %v2944_v8  ;;  %v1989_v17 = vld [vmem:[#allocation2 + $0x8] ss:$16 sm:$0x3] }
 0x449   : > { %v4795_v5 = vpop.f32.mrf.mxu0  ;;  %v1991_v6 = vor.u32 %v1990_v34, %v1989_v17  ;;  %v3166_v17 = vld [vmem:[%s7573_s11 + $0x58] sm:$0xff] }
 0x44a   : > { %v2946_v49 = vrot.slane %v6688_v55, 2  ;;  %v2793_v23 = vmax.f32 %v2718_v22, 0.0  ;;  %v3033_v24 = vrot.slane %v6688_v55, 4 }
 0x44b   : > { %v2722_v44 = vpop.f32.mrf.mxu0  ;;  %v1993_v20 = vor.u32 %v1992_v30, %v1991_v6 }
 0x44c   : > { %v6696_v27 = vmul.f32 %v2838_v4, %v2793_v23  ;;  %v2723_v15 = vadd.f32 %v6670_v31, %v2722_v44  ;;  %2978 = vrot.lane.b32.xlu0 %v2945_v2, %s7632_s28  ;;  %v2947_v1 = vsel %vm780_vm3, %v2944_v8, %v2946_v49  ;;  %v3034_v40 = vsel %vm1004_vm0, %v3032_v63, %v3033_v24 }
 0x44d   : > { %2980 = vrot.lane.b32.xlu1 %v2947_v1, %s7632_s28  ;;  %v4798_v46 = vpop.f32.mrf.mxu0  ;;  %v1995_v36 = vor.u32 %v1994_v45, %v1993_v20  ;;  %v3163_v20 = vld [vmem:[%s7573_s11 + $0x40] sm:$0xff] }
 0x44e   : > { %v2948_v10 = vrot.slane %v6696_v27, 2  ;;  %v2794_v29 = vmax.f32 %v2723_v15, 0.0  ;;  %v3035_v13 = vrot.slane %v6696_v27, 4 }
 0x44f   : > { %v2727_v33 = vpop.f32.mrf.mxu0 }
 0x450   : > { %v6709_v42 = vmul.f32 %v2843_v25, %v2794_v29  ;;  %v2728_v21 = vadd.f32 %v6670_v31, %v2727_v33  ;;  %v2949_v3 = vsel %vm780_vm3, %v2946_v49, %v2948_v10  ;;  %v3036_v53 = vsel %vm1004_vm0, %v3033_v24, %v3035_v13 }
 0x451   : > { %3067 = vrot.lane.b32.xlu1 %v3034_v40, %s7633_s27  ;;  %2982 = vrot.lane.b32.xlu0 %v2949_v3, %s7632_s28  ;;  %v4801_v32 = vpop.f32.mrf.mxu0 }
 0x452   : > { %v2950_v47 = vrot.slane %v6709_v42, 2  ;;  %v2795_v50 = vmax.f32 %v2728_v21, 0.0  ;;  %v2062_v39 = vpop.permute.xlu0 %2061  ;;  %v3037_v4 = vrot.slane %v6709_v42, 4  ;;  %v2066_v8 = vpop.permute.xlu1 %2065 }
 0x453   : > { %v2732_v25 = vpop.f32.mrf.mxu0 }
 0x454   : > { %v6720_v54 = vmul.f32 %v6661_v11, %v2795_v50  ;;  %v2733_v19 = vadd.f32 %v6670_v31, %v2732_v25  ;;  %v2951_v52 = vsel %vm780_vm3, %v2948_v10, %v2950_v47  ;;  %v2082_v11 = vsel %vm1487_vm8, %v1995_v36, %v2062_v39  ;;  %v3162_v36 = vld [vmem:[%s7573_s11 + $0x38] sm:$0xff] }
 0x455   : > { %3069 = vrot.lane.b32.xlu1 %v3036_v53, %s7633_s27  ;;  %2984 = vrot.lane.b32.xlu0 %v2951_v52, %s7632_s28  ;;  %v4804_v51 = vpop.f32.mrf.mxu0  ;;  %v3038_v5 = vsel %vm1004_vm0, %v3035_v13, %v3037_v4  ;;  %v2083_v46 = vsel %vm1506_vm9, %v2082_v11, %v2066_v8  ;;  %v3165_v13 = vld [vmem:[%s7573_s11 + $0x50] sm:$0xff] }
 0x456   : > { %v2952_v58 = vrot.slane %v6720_v54, 2  ;;  %v2796_v38 = vmax.f32 %v2733_v19, 0.0  ;;  %v2074_v63 = vpop.permute.xlu0 %2073  ;;  %v3039_v49 = vrot.slane %v6720_v54, 4 }
 0x457   : > { %v2085_v9 = vsel %vm1487_vm8, %v2027_v56, %v2074_v63  ;;  %v2737_v22 = vpop.f32.mrf.mxu0 }
 0x458   : > { %v6733_v23 = vmul.f32 %v6665_v60, %v2796_v38  ;;  %v2738_v24 = vadd.f32 %v6670_v31, %v2737_v22  ;;  %4373 = vmatprep.mubr.msk.f32.mxu1 %vm1506_vm9, %v2085_v9  ;;  %v2953_v44 = vsel %vm780_vm3, %v2950_v47, %v2952_v58  ;;  %v3040_v40 = vsel %vm1004_vm0, %v3037_v4, %v3039_v49  ;;  %v3164_v47 = vld [vmem:[%s7573_s11 + $0x48] sm:$0xff]  ;;  %v3161_v9 = vld [vmem:[%s7573_s11 + $0x30] sm:$0xff] }
 0x459   : > { %3071 = vrot.lane.b32.xlu1 %v3038_v5, %s7633_s27  ;;  %2986 = vrot.lane.b32.xlu0 %v2953_v44, %s7632_s28  ;;  %v4807_v2 = vpop.f32.mrf.mxu0  ;;  %v3160_v44 = vld [vmem:[%s7573_s11 + $0x28] sm:$0xff] }
 0x45a   : > { %v2954_v15 = vrot.slane %v6733_v23, 2  ;;  %v2797_v1 = vmax.f32 %v2738_v24, 0.0  ;;  %v2070_v34 = vpop.permute.xlu0 %2069  ;;  %v3041_v60 = vrot.slane %v6733_v23, 4 }
 0x45b   : > { %v2084_v10 = vsel %vm1597_vm10, %v2083_v46, %v2070_v34  ;;  %v2742_v29 = vpop.f32.mrf.mxu0 }
 0x45c   : > { %v6748_v7 = vmul.f32 %v6663_v28, %v2797_v1  ;;  %v2743_v33 = vadd.f32 %v6670_v31, %v2742_v29  ;;  %2287 = vmatmul.mubr.f32.vlgmr.msra.gmra.mxu1 %v2084_v10  ;;  %v2955_v30 = vsel %vm780_vm3, %v2952_v58, %v2954_v15  ;;  %v3042_v43 = vsel %vm1004_vm0, %v3039_v49, %v3041_v60 }
 0x45d   : > { %3073 = vrot.lane.b32.xlu1 %v3040_v40, %s7633_s27  ;;  %2988 = vrot.lane.b32.xlu0 %v2955_v30, %s7632_s28  ;;  %v4810_v61 = vpop.f32.mrf.mxu0 }
 0x45e   : > { %v2956_v21 = vrot.slane %v6748_v7, 2  ;;  %v2798_v28 = vmax.f32 %v2743_v33, 0.0  ;;  %4839 = vmatpush3.msra.mxu1 %v3166_v17  ;;  %4862 = vmatprep.mubr.msk.f32.mxu1 %vm5149_vm1, %v5148_v0  ;;  %v3043_v32 = vrot.slane %v6748_v7, 4 }
 0x45f   : > { %v2747_v3 = vpop.f32.mrf.mxu0  ;;  %4840 = vmatprep.subr.mxu1 %v5148_v0 }
 0x460   : > { %v6765_v6 = vmul.f32 %v6677_v62, %v2798_v28  ;;  %v2748_v45 = vadd.f32 %v6670_v31, %v2747_v3  ;;  %v2957_v16 = vsel %vm780_vm3, %v2954_v15, %v2956_v21  ;;  %4841 = vmatpush3.msra.mxu1 %v3165_v13  ;;  %v3044_v19 = vsel %vm1004_vm0, %v3041_v60, %v3043_v32  ;;  %v3159_v60 = vld [vmem:[%s7573_s11 + $0x20] sm:$0xff]  ;;  %v3158_v13 = vld [vmem:[%s7573_s11 + $0x18] sm:$0xff] }
 0x461   : > { %3075 = vrot.lane.b32.xlu1 %v3042_v43, %s7633_s27  ;;  %2990 = vrot.lane.b32.xlu0 %v2957_v16, %s7632_s28  ;;  %v4813_v50 = vpop.f32.mrf.mxu0 }
 0x462   : > { %v2958_v39 = vrot.slane %v6765_v6, 2  ;;  %v2799_v26 = vmax.f32 %v2748_v45, 0.0  ;;  %4842 = vmatprep.subr.mxu1 %v5148_v0  ;;  %v3045_v62 = vrot.slane %v6765_v6, 4 }
 0x463   : > { %v2752_v4 = vpop.f32.mrf.mxu0  ;;  %4843 = vmatpush3.msra.mxu1 %v3164_v47 }
 0x464   : > { %v6781_v25 = vmul.f32 %v6675_v14, %v2799_v26  ;;  %v2753_v48 = vadd.f32 %v6670_v31, %v2752_v4  ;;  %v2959_v53 = vsel %vm780_vm3, %v2956_v21, %v2958_v39  ;;  %4844 = vmatprep.subr.mxu1 %v5148_v0  ;;  %v3046_v58 = vsel %vm1004_vm0, %v3043_v32, %v3045_v62  ;;  %v3157_v32 = vld [vmem:[%s7573_s11 + $0x10] sm:$0xff]  ;;  %v3156_v26 = vld [vmem:[%s7573_s11 + $0x8] sm:$0xff] }
 0x465   : > { %3077 = vrot.lane.b32.xlu1 %v3044_v19, %s7633_s27  ;;  %2992 = vrot.lane.b32.xlu0 %v2959_v53, %s7632_s28  ;;  %v4816_v52 = vpop.f32.mrf.mxu0 }
 0x466   : > { %v2960_v14 = vrot.slane %v6781_v25, 2  ;;  %v2800_v51 = vmax.f32 %v2753_v48, 0.0  ;;  %4845 = vmatpush3.msra.mxu1 %v3163_v20  ;;  %v3047_v38 = vrot.slane %v6781_v25, 4 }
 0x467   : > { %v2757_v56 = vpop.f32.mrf.mxu0  ;;  %4846 = vmatprep.subr.mxu1 %v5148_v0 }
 0x468   : > { %v6797_v63 = vmul.f32 %v6686_v12, %v2800_v51  ;;  %v2758_v8 = vadd.f32 %v6670_v31, %v2757_v56  ;;  %v2961_v11 = vsel %vm780_vm3, %v2958_v39, %v2960_v14  ;;  %4847 = vmatpush3.msra.mxu1 %v3162_v36  ;;  %v3048_v1 = vsel %vm1004_vm0, %v3045_v62, %v3047_v38  ;;  %v3155_v36 = vld [vmem:[%s7573_s11] sm:$0xff] }
 0x469   : > { %3079 = vrot.lane.b32.xlu1 %v3046_v58, %s7633_s27  ;;  %2994 = vrot.lane.b32.xlu0 %v2961_v11, %s7632_s28  ;;  %v4819_v22 = vpop.f32.mrf.mxu0 }
 0x46a   : > { %v2962_v5 = vrot.slane %v6797_v63, 2  ;;  %v2801_v49 = vmax.f32 %v2758_v8, 0.0  ;;  %4848 = vmatprep.subr.mxu1 %v5148_v0  ;;  %v3049_v12 = vrot.slane %v6797_v63, 4 }
 0x46b   : > { %v2762_v24 = vpop.f32.mrf.mxu0  ;;  %4849 = vmatpush3.msra.mxu1 %v3161_v9 }
 0x46c   : > { %v6813_v2 = vmul.f32 %v6683_v41, %v2801_v49  ;;  %v2763_v15 = vadd.f32 %v6670_v31, %v2762_v24  ;;  %v2963_v46 = vsel %vm780_vm3, %v2960_v14, %v2962_v5  ;;  %4850 = vmatprep.subr.mxu1 %v5148_v0  ;;  %v3050_v17 = vsel %vm1004_vm0, %v3047_v38, %v3049_v12  ;;  %v2903_v24 = vpop.permute.xlu0 %2902 }
 0x46d   : > { %3081 = vrot.lane.b32.xlu1 %v3048_v1, %s7633_s27  ;;  %2996 = vrot.lane.b32.xlu0 %v2963_v46, %s7632_s28  ;;  %v4822_v34 = vpop.f32.mrf.mxu0 }
 0x46e   : > { %v2964_v41 = vrot.slane %v6813_v2, 2  ;;  %v2802_v10 = vmax.f32 %v2763_v15, 0.0  ;;  %4851 = vmatpush3.msra.mxu1 %v3160_v44  ;;  %v3051_v33 = vrot.slane %v6813_v2, 4 }
 0x46f   : > { %v2767_v29 = vpop.f32.mrf.mxu0  ;;  %4852 = vmatprep.subr.mxu1 %v5148_v0 }
 0x470   : > { %v6829_v40 = vmul.f32 %v6704_v35, %v2802_v10  ;;  %v2768_v30 = vadd.f32 %v6670_v31, %v2767_v29  ;;  %v2965_v61 = vsel %vm780_vm3, %v2962_v5, %v2964_v41  ;;  %4853 = vmatpush3.msra.mxu1 %v3159_v60  ;;  %v3052_v47 = vsel %vm1004_vm0, %v3049_v12, %v3051_v33 }
 0x471   : > { %3083 = vrot.lane.b32.xlu1 %v3050_v17, %s7633_s27  ;;  %2998 = vrot.lane.b32.xlu0 %v2965_v61, %s7632_s28  ;;  %v4825_v21 = vpop.f32.mrf.mxu0 }
 0x472   : > { %v2966_v28 = vrot.slane %v6829_v40, 2  ;;  %v2803_v3 = vmax.f32 %v2768_v30, 0.0  ;;  %4854 = vmatprep.subr.mxu1 %v5148_v0  ;;  %v3053_v35 = vrot.slane %v6829_v40, 4 }
 0x473   : > { %v2772_v43 = vpop.f32.mrf.mxu0  ;;  %4855 = vmatpush3.msra.mxu1 %v3158_v13 }
 0x474   : > { %v6845_v45 = vmul.f32 %v6701_v59, %v2803_v3  ;;  %v2773_v16 = vadd.f32 %v6670_v31, %v2772_v43  ;;  %v2967_v50 = vsel %vm780_vm3, %v2964_v41, %v2966_v28  ;;  %4856 = vmatprep.subr.mxu1 %v5148_v0  ;;  %v3054_v20 = vsel %vm1004_vm0, %v3051_v33, %v3053_v35  ;;  %v3426_v43 = vld [vmem:[%s7631_s30 + $0x8] sm:$0xff] }
 0x475   : > { %3085 = vrot.lane.b32.xlu1 %v3052_v47, %s7633_s27  ;;  %3000 = vrot.lane.b32.xlu0 %v2967_v50, %s7632_s28  ;;  %v4828_v39 = vpop.f32.mrf.mxu0  ;;  %v3432_v47 = vld [vmem:[%s7631_s30 + $0x38] sm:$0xff]  ;;  %v3434_v50 = vld [vmem:[%s7631_s30 + $0x48] sm:$0xff] }
 0x476   : > { %v2968_v59 = vrot.slane %v6845_v45, 2  ;;  %v2804_v62 = vmax.f32 %v2773_v16, 0.0  ;;  %4857 = vmatpush3.msra.mxu1 %v3157_v32  ;;  %v3055_v48 = vrot.slane %v6845_v45, 4  ;;  %v3428_v32 = vld [vmem:[%s7631_s30 + $0x18] sm:$0xff]  ;;  %v3430_v16 = vld [vmem:[%s7631_s30 + $0x28] sm:$0xff] }
 0x477   : > { %v2777_v4 = vpop.f32.mrf.mxu0  ;;  %4858 = vmatprep.subr.mxu1 %v5148_v0  ;;  %v3436_v39 = vld [vmem:[%s7631_s30 + $0x58] sm:$0xff] }
 0x478   : > { %v6861_v19 = vmul.f32 %v6716_v18, %v2804_v62  ;;  %v2778_v53 = vadd.f32 %v6670_v31, %v2777_v4  ;;  %v2969_v52 = vsel %vm780_vm3, %v2966_v28, %v2968_v59  ;;  %4859 = vmatpush3.msra.mxu1 %v3156_v26  ;;  %v2898_v18 = vpop.permute.xlu1 %2897  ;;  %v3056_v9 = vsel %vm1004_vm0, %v3053_v35, %v3055_v48  ;;  %v3438_v26 = vld [vmem:[%s7631_s30 + $0x68] sm:$0xff]  ;;  %v3427_v62 = vld [vmem:[%s7631_s30 + $0x10] sm:$0xff]  ;;  %v3429_v4 = vld [vmem:[%s7631_s30 + $0x20] sm:$0xff] }
 0x479   : > { %3087 = vrot.lane.b32.xlu1 %v3054_v20, %s7633_s27  ;;  %3002 = vrot.lane.b32.xlu0 %v2969_v52, %s7632_s28  ;;  %v4831_v14 = vpop.f32.mrf.mxu0  ;;  %v3431_v20 = vld [vmem:[%s7631_s30 + $0x30] sm:$0xff]  ;;  %v3437_v52 = vld [vmem:[%s7631_s30 + $0x60] sm:$0xff] }
 0x47a   : > { %v2970_v51 = vrot.slane %v6861_v19, 2  ;;  %v2805_v56 = vmax.f32 %v2778_v53, 0.0  ;;  %4860 = vmatprep.subr.mxu1 %v5148_v0  ;;  %v3057_v58 = vrot.slane %v6861_v19, 4  ;;  %v3435_v53 = vld [vmem:[%s7631_s30 + $0x50] sm:$0xff]  ;;  %v3441_v14 = vld [vmem:[%s7631_s30 + $0x80] sm:$0xff] }
 0x47b   : > { %v2782_v38 = vpop.f32.mrf.mxu0  ;;  %4861 = vmatpush3.msra.mxu1 %v3155_v36  ;;  %v3439_v36 = vld [vmem:[%s7631_s30 + $0x70] sm:$0xff] }
 0x47c   : > { %v6873_v8 = vmul.f32 %v2898_v18, %v2805_v56  ;;  %v2783_v11 = vadd.f32 %v6670_v31, %v2782_v38  ;;  %v2971_v22 = vsel %vm780_vm3, %v2968_v59, %v2970_v51  ;;  %3838 = vmatprep.subr.mxu1 %v5148_v0  ;;  %v3058_v15 = vsel %vm1004_vm0, %v3055_v48, %v3057_v58  ;;  %v2908_v17 = vpop.permute.xlu1 %2907  ;;  %v3440_v59 = vld [vmem:[%s7631_s30 + $0x78] sm:$0xff]  ;;  %v3433_v48 = vld [vmem:[%s7631_s30 + $0x40] sm:$0xff] }
 0x47d   : > { %3089 = vrot.lane.b32.xlu1 %v3056_v9, %s7633_s27  ;;  %3004 = vrot.lane.b32.xlu0 %v2971_v22, %s7632_s28  ;;  %v4834_v5 = vpop.f32.mrf.mxu0 }
 0x47e   : > { %v2972_v49 = vrot.slane %v6873_v8, 2  ;;  %v2806_v12 = vmax.f32 %v2783_v11, 0.0  ;;  %v3059_v1 = vrot.slane %v6873_v8, 4 }
 0x47f   : > { %v2787_v44 = vpop.f32.mrf.mxu0 }
 0x480   : > { %v6884_v46 = vmul.f32 %v2903_v24, %v2806_v12  ;;  %v2788_v34 = vadd.f32 %v6670_v31, %v2787_v44  ;;  %v2973_v60 = vsel %vm780_vm3, %v2970_v51, %v2972_v49  ;;  %v3060_v61 = vsel %vm1004_vm0, %v3057_v58, %v3059_v1 }
 0x481   : > { %3091 = vrot.lane.b32.xlu1 %v3058_v15, %s7633_s27  ;;  %3006 = vrot.lane.b32.xlu0 %v2973_v60, %s7632_s28  ;;  %v4837_v41 = vpop.f32.mrf.mxu0 }
 0x482   : > { %v2974_v10 = vrot.slane %v6884_v46, 2  ;;  %v2807_v29 = vmax.f32 %v2788_v34, 0.0  ;;  %v3061_v33 = vrot.slane %v6884_v46, 4 }
 0x484   : > { %v6892_v30 = vmul.f32 %v2908_v17, %v2807_v29  ;;  %v2975_v13 = vsel %vm780_vm3, %v2972_v49, %v2974_v10  ;;  %v3062_v28 = vsel %vm1004_vm0, %v3059_v1, %v3061_v33 }
 0x485   : > { %3093 = vrot.lane.b32.xlu1 %v3060_v61, %s7633_s27  ;;  %3008 = vrot.lane.b32.xlu0 %v2975_v13, %s7632_s28 }
 0x486   : > { %v2976_v31 = vrot.slane %v6892_v30, 2  ;;  %v3063_v21 = vrot.slane %v6892_v30, 4 }
 0x488   : > { %v2977_v3 = vsel %vm780_vm3, %v2974_v10, %v2976_v31  ;;  %v3064_v35 = vsel %vm1004_vm0, %v3061_v33, %v3063_v21 }
 0x489   : > { %3095 = vrot.lane.b32.xlu1 %v3062_v28, %s7633_s27  ;;  %3010 = vrot.lane.b32.xlu0 %v2977_v3, %s7632_s28 }
 0x48d   : > { %3097 = vrot.lane.b32.xlu1 %v3064_v35, %s7633_s27  ;;  %3012 = vrot.lane.b32.xlu0 %v2976_v31, %s7632_s28 }
 0x491   : > { %3099 = vrot.lane.b32.xlu1 %v3063_v21, %s7633_s27  ;;  %3444 = vperm.xlu0 %5053, %v3426_v43  }
 0x495   : > { %3454 = vperm.xlu1 %5054, %v3428_v32   ;;  %3464 = vperm.xlu0 %5053, %v3430_v16  }
 0x499   : > { %3474 = vperm.xlu1 %5054, %v3432_v47   ;;  %3484 = vperm.xlu0 %5053, %v3434_v50  }
 0x49d   : > { %3494 = vperm.xlu1 %5054, %v3436_v39   ;;  %3504 = vperm.xlu0 %5053, %v3438_v26  }
 0x4a1   : > { %3514 = vperm.xlu1 %5054, %v3440_v59   ;;  %3449 = vperm.xlu0 %5053, %v3427_v62  }
 0x4a5   : > { %3459 = vperm.xlu1 %5054, %v3429_v4   ;;  %3469 = vperm.xlu0 %5053, %v3431_v20  }
 0x4a9   : > { %3479 = vperm.xlu1 %5054, %v3433_v48   ;;  %3489 = vperm.xlu0 %5053, %v3435_v53  }
 0x4ad   : > { %3499 = vperm.xlu1 %5054, %v3437_v52   ;;  %3509 = vperm.xlu0 %5053, %v3439_v36  }
 0x4b1   : > { %3519 = vperm.xlu1 %5054, %v3441_v14  }
 0x4ba   : > { %v3066_v51 = vpop.permute.xlu0 %3065 }
 0x4be   : > { %v2979_v56 = vpop.permute.xlu0 %2978 }
 0x4bf   : > { %v3119_v18 = vsel %vm1487_vm8, 0.0, %v2979_v56  ;;  %v2981_v58 = vpop.permute.xlu1 %2980 }
 0x4c0   : > { %v3137_v38 = vsel %vm1506_vm9, %v3119_v18, %v3066_v51  ;;  %v3120_v11 = vsel %vm1487_vm8, %v6679_v37, %v2981_v58 }
 0x4c1   : > { %v3192_v49 = vrot.slane %v3137_v38, 4 }
 0x4c3   : > { %v3068_v9 = vpop.permute.xlu1 %3067  ;;  %v2983_v22 = vpop.permute.xlu0 %2982 }
 0x4c4   : > { %v3138_v5 = vsel %vm1506_vm9, %v3120_v11, %v3068_v9  ;;  %v3121_v24 = vsel %vm1487_vm8, %v6688_v55, %v2983_v22 }
 0x4c5   : > { %v3193_v12 = vrot.slane %v3138_v5, 4 }
 0x4c7   : > { %v3070_v44 = vpop.permute.xlu1 %3069  ;;  %v2985_v15 = vpop.permute.xlu0 %2984  ;;  %v3194_v1 = vsel %vm1004_vm0, %v3192_v49, %v3193_v12 }
 0x4c8   : > { %v3139_v34 = vsel %vm1506_vm9, %v3121_v24, %v3070_v44  ;;  %4863 = vmatmul.mubr.msk.f32.vlgmr.msra.gmra.mxu1 %vm1597_vm10, %v3194_v1  ;;  %v3122_v37 = vsel %vm1487_vm8, %v6696_v27, %v2985_v15 }
 0x4c9   : > { %v3195_v60 = vrot.slane %v3139_v34, 4  ;;  %4865 = vmatprep.mubr.msk.f32.mxu1 %vm5149_vm1, %v5148_v0 }
 0x4cb   : > { %v3072_v41 = vpop.permute.xlu1 %3071  ;;  %v2987_v10 = vpop.permute.xlu0 %2986  ;;  %v3196_v29 = vsel %vm1004_vm0, %v3193_v12, %v3195_v60 }
 0x4cc   : > { %v3140_v55 = vsel %vm1506_vm9, %v3122_v37, %v3072_v41  ;;  %4866 = vmatmul.mubr.msk.f32.gmra.mxu1 %vm1597_vm10, %v3196_v29  ;;  %v3123_v33 = vsel %vm1487_vm8, %v6709_v42, %v2987_v10 }
 0x4cd   : > { %v3197_v17 = vrot.slane %v3140_v55, 4  ;;  %4868 = vmatprep.mubr.msk.f32.mxu1 %vm5149_vm1, %v5148_v0 }
 0x4cf   : > { %v3074_v61 = vpop.permute.xlu1 %3073  ;;  %v2989_v13 = vpop.permute.xlu0 %2988  ;;  %v3198_v31 = vsel %vm1004_vm0, %v3195_v60, %v3197_v17 }
 0x4d0   : > { %v3141_v27 = vsel %vm1506_vm9, %v3123_v33, %v3074_v61  ;;  %4869 = vmatmul.mubr.msk.f32.gmra.mxu1 %vm1597_vm10, %v3198_v31  ;;  %v3124_v28 = vsel %vm1487_vm8, %v6720_v54, %v2989_v13 }
 0x4d1   : > { %v3199_v21 = vrot.slane %v3141_v27, 4  ;;  %4871 = vmatprep.mubr.msk.f32.mxu1 %vm5149_vm1, %v5148_v0 }
 0x4d3   : > { %v3076_v3 = vpop.permute.xlu1 %3075  ;;  %v2991_v35 = vpop.permute.xlu0 %2990  ;;  %v3200_v43 = vsel %vm1004_vm0, %v3197_v17, %v3199_v21 }
 0x4d4   : > { %v3142_v42 = vsel %vm1506_vm9, %v3124_v28, %v3076_v3  ;;  %4872 = vmatmul.mubr.msk.f32.gmra.mxu1 %vm1597_vm10, %v3200_v43  ;;  %v3125_v16 = vsel %vm1487_vm8, %v6733_v23, %v2991_v35 }
 0x4d5   : > { %v3201_v32 = vrot.slane %v3142_v42, 4  ;;  %4874 = vmatprep.mubr.msk.f32.mxu1 %vm5149_vm1, %v5148_v0 }
 0x4d7   : > { %v3078_v47 = vpop.permute.xlu1 %3077  ;;  %v2993_v50 = vpop.permute.xlu0 %2992  ;;  %v3202_v39 = vsel %vm1004_vm0, %v3199_v21, %v3201_v32 }
 0x4d8   : > { %v3143_v54 = vsel %vm1506_vm9, %v3125_v16, %v3078_v47  ;;  %4875 = vmatmul.mubr.msk.f32.gmra.mxu1 %vm1597_vm10, %v3202_v39  ;;  %v3126_v59 = vsel %vm1487_vm8, %v6748_v7, %v2993_v50 }
 0x4d9   : > { %v3203_v26 = vrot.slane %v3143_v54, 4  ;;  %4877 = vmatprep.mubr.msk.f32.mxu1 %vm5149_vm1, %v5148_v0 }
 0x4db   : > { %v3080_v62 = vpop.permute.xlu1 %3079  ;;  %v2995_v4 = vpop.permute.xlu0 %2994  ;;  %v3204_v20 = vsel %vm1004_vm0, %v3201_v32, %v3203_v26 }
 0x4dc   : > { %v3144_v23 = vsel %vm1506_vm9, %v3126_v59, %v3080_v62  ;;  %4878 = vmatmul.mubr.msk.f32.gmra.mxu1 %vm1597_vm10, %v3204_v20  ;;  %v3127_v53 = vsel %vm1487_vm8, %v6765_v6, %v2995_v4 }
 0x4dd   : > { %v3205_v48 = vrot.slane %v3144_v23, 4  ;;  %4880 = vmatprep.mubr.msk.f32.mxu1 %vm5149_vm1, %v5148_v0 }
 0x4df   : > { %v3082_v52 = vpop.permute.xlu1 %3081  ;;  %v2997_v36 = vpop.permute.xlu0 %2996  ;;  %v3206_v14 = vsel %vm1004_vm0, %v3203_v26, %v3205_v48 }
 0x4e0   : > { %v3145_v7 = vsel %vm1506_vm9, %v3127_v53, %v3082_v52  ;;  %4881 = vmatmul.mubr.msk.f32.gmra.mxu1 %vm1597_vm10, %v3206_v14  ;;  %v3128_v56 = vsel %vm1487_vm8, %v6781_v25, %v2997_v36  ;;  %v3733_v14 = vld [vmem:[%s7575_s13 + $0xf8] sm:$0xff] }
 0x4e1   : > { %v3207_v51 = vrot.slane %v3145_v7, 4  ;;  %4883 = vmatprep.mubr.msk.f32.mxu1 %vm5149_vm1, %v5148_v0  ;;  %v3717_v7 = vld [vmem:[%s7575_s13 + $0x78] sm:$0xff]  ;;  %4574 = vmatprep.subr.mxu0 %v3733_v14 }
 0x4e2   : > { %4575 = vmatpush3.msra.mxu0 %v3717_v7 }
 0x4e3   : > { %v3084_v18 = vpop.permute.xlu1 %3083  ;;  %v2999_v58 = vpop.permute.xlu0 %2998  ;;  %v3208_v38 = vsel %vm1004_vm0, %v3205_v48, %v3207_v51  ;;  %v4372_v48 = vld [vmem:[%s7570_s8] ss:$0 sm:$0xff] }
 0x4e4   : > { %v3146_v6 = vsel %vm1506_vm9, %v3128_v56, %v3084_v18  ;;  %4884 = vmatmul.mubr.msk.f32.gmra.mxu1 %vm1597_vm10, %v3208_v38  ;;  %v3129_v9 = vsel %vm1487_vm8, %v6797_v63, %v2999_v58  ;;  %v3749_v56 = vld [vmem:[%s7575_s13 + $0x178] sm:$0xff]  ;;  %v3731_v18 = vld [vmem:[%s7575_s13 + $0xe8] sm:$0xff]  ;;  %v3748_v58 = vld [vmem:[%s7575_s13 + $0x170] sm:$0xff] }
 0x4e5   : > { %v3209_v11 = vrot.slane %v3146_v6, 4  ;;  %4886 = vmatprep.mubr.msk.f32.mxu1 %vm5149_vm1, %v5148_v0  ;;  %3839 = vmatpush1.msra.mxu1 %v3749_v56  ;;  %v3715_v38 = vld [vmem:[%s7575_s13 + $0x68] sm:$0xff] }
 0x4e6   : > { %3840 = vmatprep.subr.mxu1 %v5148_v0  ;;  %v3747_v6 = vld [vmem:[%s7575_s13 + $0x168] sm:$0xff] }
 0x4e7   : > { %v3086_v22 = vpop.permute.xlu1 %3085  ;;  %v3001_v5 = vpop.permute.xlu0 %3000  ;;  %v3210_v49 = vsel %vm1004_vm0, %v3207_v51, %v3209_v11  ;;  %v3732_v51 = vld [vmem:[%s7575_s13 + $0xf0] sm:$0xff]  ;;  %3841 = vmatpush1.msra.mxu1 %v3748_v58 }
 0x4e8   : > { %v3147_v25 = vsel %vm1506_vm9, %v3129_v9, %v3086_v22  ;;  %4887 = vmatmul.mubr.msk.f32.gmra.mxu1 %vm1597_vm10, %v3210_v49  ;;  %v3130_v24 = vsel %vm1487_vm8, %v6813_v2, %v3001_v5  ;;  %4576 = vmatprep.subr.mxu0 %v3732_v51  ;;  %v3714_v9 = vld [vmem:[%s7575_s13 + $0x60] sm:$0xff]  ;;  %v3729_v5 = vld [vmem:[%s7575_s13 + $0xd8] sm:$0xff] }
 0x4e9   : > { %v3211_v12 = vrot.slane %v3147_v25, 4  ;;  %4889 = vmatprep.mubr.msk.f32.mxu1 %vm5149_vm1, %v5148_v0  ;;  %3842 = vmatprep.subr.mxu1 %v5148_v0  ;;  %v3746_v22 = vld [vmem:[%s7575_s13 + $0x160] sm:$0xff]  ;;  %v3713_v49 = vld [vmem:[%s7575_s13 + $0x58] sm:$0xff] }
 0x4ea   : > { %3843 = vmatpush1.msra.mxu1 %v3747_v6  ;;  %v3745_v25 = vld [vmem:[%s7575_s13 + $0x158] sm:$0xff] }
 0x4eb   : > { %v3088_v44 = vpop.permute.xlu1 %3087  ;;  %v3003_v15 = vpop.permute.xlu0 %3002  ;;  %v3212_v1 = vsel %vm1004_vm0, %v3209_v11, %v3211_v12  ;;  %v3730_v11 = vld [vmem:[%s7575_s13 + $0xe0] sm:$0xff]  ;;  %3844 = vmatprep.subr.mxu1 %v5148_v0 }
 0x4ec   : > { %v3148_v63 = vsel %vm1506_vm9, %v3130_v24, %v3088_v44  ;;  %4890 = vmatmul.mubr.msk.f32.gmra.mxu1 %vm1597_vm10, %v3212_v1  ;;  %v3131_v60 = vsel %vm1487_vm8, %v6829_v40, %v3003_v15  ;;  %v3744_v24 = vld [vmem:[%s7575_s13 + $0x150] sm:$0xff]  ;;  %v3727_v15 = vld [vmem:[%s7575_s13 + $0xc8] sm:$0xff] }
 0x4ed   : > { %v3213_v34 = vrot.slane %v3148_v63, 4  ;;  %4892 = vmatprep.mubr.msk.f32.mxu1 %vm5149_vm1, %v5148_v0  ;;  %3845 = vmatpush1.msra.mxu1 %v3746_v22  ;;  %v3712_v44 = vld [vmem:[%s7575_s13 + $0x50] sm:$0xff]  ;;  %v3743_v1 = vld [vmem:[%s7575_s13 + $0x148] sm:$0xff] }
 0x4ee   : > { %3846 = vmatprep.subr.mxu1 %v5148_v0  ;;  %v3711_v63 = vld [vmem:[%s7575_s13 + $0x48] sm:$0xff] }
 0x4ef   : > { %v3090_v37 = vpop.permute.xlu1 %3089  ;;  %v3005_v41 = vpop.permute.xlu0 %3004  ;;  %v3214_v10 = vsel %vm1004_vm0, %v3211_v12, %v3213_v34  ;;  %v3728_v12 = vld [vmem:[%s7575_s13 + $0xd0] sm:$0xff]  ;;  %3847 = vmatpush1.msra.mxu1 %v3745_v25 }
 0x4f0   : > { %v3149_v2 = vsel %vm1506_vm9, %v3131_v60, %v3090_v37  ;;  %4893 = vmatmul.mubr.msk.f32.gmra.mxu1 %vm1597_vm10, %v3214_v10  ;;  %v3132_v55 = vsel %vm1487_vm8, %v6845_v45, %v3005_v41  ;;  %3848 = vmatprep.subr.mxu1 %v5148_v0  ;;  %v3742_v60 = vld [vmem:[%s7575_s13 + $0x140] sm:$0xff]  ;;  %v3725_v41 = vld [vmem:[%s7575_s13 + $0xb8] sm:$0xff] }
 0x4f1   : > { %v3215_v29 = vrot.slane %v3149_v2, 4  ;;  %4895 = vmatprep.mubr.msk.f32.mxu1 %vm5149_vm1, %v5148_v0  ;;  %3849 = vmatpush1.msra.mxu1 %v3744_v24  ;;  %v3710_v37 = vld [vmem:[%s7575_s13 + $0x40] sm:$0xff]  ;;  %v3741_v10 = vld [vmem:[%s7575_s13 + $0x138] sm:$0xff] }
 0x4f2   : > { %3850 = vmatprep.subr.mxu1 %v5148_v0  ;;  %v3709_v2 = vld [vmem:[%s7575_s13 + $0x38] sm:$0xff] }
 0x4f3   : > { %v3092_v17 = vpop.permute.xlu1 %3091  ;;  %v3007_v33 = vpop.permute.xlu0 %3006  ;;  %v3216_v61 = vsel %vm1004_vm0, %v3213_v34, %v3215_v29  ;;  %v3726_v34 = vld [vmem:[%s7575_s13 + $0xc0] sm:$0xff]  ;;  %3851 = vmatpush1.msra.mxu1 %v3743_v1 }
 0x4f4   : > { %v3150_v40 = vsel %vm1506_vm9, %v3132_v55, %v3092_v17  ;;  %4896 = vmatmul.mubr.msk.f32.gmra.mxu1 %vm1597_vm10, %v3216_v61  ;;  %v3133_v31 = vsel %vm1487_vm8, %v6861_v19, %v3007_v33  ;;  %3852 = vmatprep.subr.mxu1 %v5148_v0  ;;  %v3740_v55 = vld [vmem:[%s7575_s13 + $0x130] sm:$0xff]  ;;  %v3723_v33 = vld [vmem:[%s7575_s13 + $0xa8] sm:$0xff] }
 0x4f5   : > { %v3217_v13 = vrot.slane %v3150_v40, 4  ;;  %4898 = vmatprep.mubr.msk.f32.mxu1 %vm5149_vm1, %v5148_v0  ;;  %3853 = vmatpush1.msra.mxu1 %v3742_v60  ;;  %v3708_v17 = vld [vmem:[%s7575_s13 + $0x30] sm:$0xff]  ;;  %v3739_v61 = vld [vmem:[%s7575_s13 + $0x128] sm:$0xff] }
 0x4f6   : > { %3854 = vmatprep.subr.mxu1 %v5148_v0  ;;  %v3707_v40 = vld [vmem:[%s7575_s13 + $0x28] sm:$0xff] }
 0x4f7   : > { %v3094_v27 = vpop.permute.xlu1 %3093  ;;  %v3009_v21 = vpop.permute.xlu0 %3008  ;;  %v3218_v28 = vsel %vm1004_vm0, %v3215_v29, %v3217_v13  ;;  %v3724_v29 = vld [vmem:[%s7575_s13 + $0xb0] sm:$0xff]  ;;  %3855 = vmatpush1.msra.mxu1 %v3741_v10 }
 0x4f8   : > { %v3151_v45 = vsel %vm1506_vm9, %v3133_v31, %v3094_v27  ;;  %4899 = vmatmul.mubr.msk.f32.gmra.mxu1 %vm1597_vm10, %v3218_v28  ;;  %v3134_v35 = vsel %vm1487_vm8, %v6873_v8, %v3009_v21  ;;  %3856 = vmatprep.subr.mxu1 %v5148_v0  ;;  %v3738_v31 = vld [vmem:[%s7575_s13 + $0x120] sm:$0xff]  ;;  %v3721_v21 = vld [vmem:[%s7575_s13 + $0x98] sm:$0xff] }
 0x4f9   : > { %v3219_v3 = vrot.slane %v3151_v45, 4  ;;  %4901 = vmatprep.mubr.msk.f32.mxu1 %vm5149_vm1, %v5148_v0  ;;  %3857 = vmatpush1.msra.mxu1 %v3740_v55  ;;  %v3706_v27 = vld [vmem:[%s7575_s13 + $0x20] sm:$0xff]  ;;  %v3737_v28 = vld [vmem:[%s7575_s13 + $0x118] sm:$0xff] }
 0x4fa   : > { %3858 = vmatprep.subr.mxu1 %v5148_v0  ;;  %v3705_v45 = vld [vmem:[%s7575_s13 + $0x18] sm:$0xff] }
 0x4fb   : > { %v3096_v43 = vpop.permute.xlu1 %3095  ;;  %v3011_v42 = vpop.permute.xlu0 %3010  ;;  %v3220_v32 = vsel %vm1004_vm0, %v3217_v13, %v3219_v3  ;;  %v3722_v13 = vld [vmem:[%s7575_s13 + $0xa0] sm:$0xff]  ;;  %3859 = vmatpush1.msra.mxu1 %v3739_v61 }
 0x4fc   : > { %v3152_v19 = vsel %vm1506_vm9, %v3134_v35, %v3096_v43  ;;  %4902 = vmatmul.mubr.msk.f32.gmra.mxu1 %vm1597_vm10, %v3220_v32  ;;  %v3135_v47 = vsel %vm1487_vm8, %v6884_v46, %v3011_v42  ;;  %3860 = vmatprep.subr.mxu1 %v5148_v0  ;;  %v3720_v35 = vld [vmem:[%s7575_s13 + $0x90] sm:$0xff]  ;;  %v3719_v32 = vld [vmem:[%s7575_s13 + $0x88] sm:$0xff] }
 0x4fd   : > { %v3221_v16 = vrot.slane %v3152_v19, 4  ;;  %4904 = vmatprep.mubr.msk.f32.mxu1 %vm5149_vm1, %v5148_v0  ;;  %3861 = vmatpush1.msra.mxu1 %v3738_v31  ;;  %v3736_v43 = vld [vmem:[%s7575_s13 + $0x110] sm:$0xff]  ;;  %v3735_v19 = vld [vmem:[%s7575_s13 + $0x108] sm:$0xff] }
 0x4fe   : > { %3862 = vmatprep.subr.mxu1 %v5148_v0  ;;  %v3704_v42 = vld [vmem:[%s7575_s13 + $0x10] sm:$0xff] }
 0x4ff   : > { %v3098_v50 = vpop.permute.xlu1 %3097  ;;  %v3222_v39 = vsel %vm1004_vm0, %v3219_v3, %v3221_v16  ;;  %v3013_v54 = vpop.permute.xlu0 %3012  ;;  %3863 = vmatpush1.msra.mxu1 %v3737_v28 }
 0x500   : > { %v3153_v8 = vsel %vm1506_vm9, %v3135_v47, %v3098_v50  ;;  %4905 = vmatmul.mubr.msk.f32.gmra.mxu1 %vm1597_vm10, %v3222_v39  ;;  %v3136_v59 = vsel %vm1487_vm8, %v6892_v30, %v3013_v54  ;;  %v2219_v30 = vadd.f32 %v6672_v57, %v4372_v48  ;;  %v3716_v57 = vld [vmem:[%s7575_s13 + $0x70] sm:$0xff]  ;;  %3864 = vmatprep.subr.mxu1 %v5148_v0  ;;  %v3757_v50 = vld [vmem:[%s7575_s13 + $0x1b8] sm:$0xff]  ;;  %v3755_v54 = vld [vmem:[%s7575_s13 + $0x1a8] sm:$0xff] }
 0x501   : > { %v3223_v26 = vrot.slane %v3153_v8, 4  ;;  %4907 = vmatprep.mubr.msk.f32.mxu1 %vm5149_vm1, %v5148_v0  ;;  %4577 = vmatpush3.msra.mxu0 %v3716_v57  ;;  %v3756_v8 = vld [vmem:[%s7575_s13 + $0x1b0] sm:$0xff] }
 0x502   : > { %4578 = vmatprep.subr.mxu0 %v3731_v18  ;;  %3865 = vmatpush1.msra.mxu1 %v3736_v43 }
 0x503   : > { %v3100_v62 = vpop.permute.xlu1 %3099  ;;  %v3224_v4 = vsel %vm1004_vm0, %v3221_v16, %v3223_v26  ;;  %4579 = vmatpush3.msra.mxu0 %v3715_v38  ;;  %3866 = vmatprep.subr.mxu1 %v5148_v0  ;;  %v3734_v16 = vld [vmem:[%s7575_s13 + $0x100] sm:$0xff] }
 0x504   : > { %v3154_v46 = vsel %vm1506_vm9, %v3136_v59, %v3100_v62  ;;  %4908 = vmatmul.mubr.msk.f32.gmra.mxu1 %vm1597_vm10, %v3224_v4  ;;  %4580 = vmatprep.subr.mxu0 %v3730_v11 }
 0x505   : > { %v3225_v20 = vrot.slane %v3154_v46, 4  ;;  %4910 = vmatprep.mubr.msk.f32.mxu1 %vm5149_vm1, %v5148_v0  ;;  %4581 = vmatpush3.msra.mxu0 %v3714_v9  ;;  %v7248_v46 = vld [vmem:[%s7574_s12] ss:$0 sm:$0xff] }
 0x506   : > { %4582 = vmatprep.subr.mxu0 %v3729_v5  ;;  %3867 = vmatpush1.msra.mxu1 %v3735_v19 }
 0x507   : > { %v3226_v23 = vsel %vm1004_vm0, %v3223_v26, %v3225_v20  ;;  %4583 = vmatpush3.msra.mxu0 %v3713_v49  ;;  %3868 = vmatprep.subr.mxu1 %v5148_v0 }
 0x508   : > { %4911 = vmatmul.mubr.msk.f32.gmra.mxu1 %vm1597_vm10, %v3226_v23  ;;  %4584 = vmatprep.subr.mxu0 %v3728_v12 }
 0x509   : > { %4585 = vmatpush3.msra.mxu0 %v3712_v44  ;;  %3869 = vmatpush1.msra.mxu1 %v3734_v16 }
 0x50a   : > { %4586 = vmatprep.subr.mxu0 %v3727_v15  ;;  %3886 = vmatprep.subr.mxu1 %v5148_v0 }
 0x50b   : > { %4587 = vmatpush3.msra.mxu0 %v3711_v63  ;;  %3887 = vmatpush2.msra.mxu1 %v3757_v50 }
 0x50c   : > { %4588 = vmatprep.subr.mxu0 %v3726_v34  ;;  %v3445_v3 = vpop.permute.xlu0 %3444  ;;  %3888 = vmatprep.subr.mxu1 %v5148_v0 }
 0x50d   : > { %4589 = vmatpush3.msra.mxu0 %v3710_v37  ;;  %3889 = vmatpush2.msra.mxu1 %v3756_v8 }
 0x50e   : > { %4590 = vmatprep.subr.mxu0 %v3725_v41  ;;  %3890 = vmatprep.subr.mxu1 %v5148_v0 }
 0x50f   : > { %4591 = vmatpush3.msra.mxu0 %v3709_v2  ;;  %3891 = vmatpush2.msra.mxu1 %v3755_v54 }
 0x510   : > { %4592 = vmatprep.subr.mxu0 %v3724_v29  ;;  %v3465_v47 = vpop.permute.xlu0 %3464  ;;  %v3455_v39 = vpop.permute.xlu1 %3454  ;;  %3892 = vmatprep.subr.mxu1 %v5148_v0 }
 0x511   : > { %4593 = vmatpush3.msra.mxu0 %v3708_v17 }
 0x512   : > { %4594 = vmatprep.subr.mxu0 %v3723_v33 }
 0x513   : > { %4595 = vmatpush3.msra.mxu0 %v3707_v40 }
 0x514   : > { %4596 = vmatprep.subr.mxu0 %v3722_v13  ;;  %v7242_v26 = vpop.permute.xlu0 %3484  ;;  %v3475_v62 = vpop.permute.xlu1 %3474 }
 0x515   : > { %4597 = vmatpush3.msra.mxu0 %v3706_v27 }
 0x516   : > { %4598 = vmatprep.subr.mxu0 %v3721_v21 }
 0x517   : > { %4599 = vmatpush3.msra.mxu0 %v3705_v45 }
 0x518   : > { %4600 = vmatprep.subr.mxu0 %v3720_v35  ;;  %v7252_v48 = vpop.permute.xlu0 %3504 }
 0x519   : > { %4601 = vmatpush3.msra.mxu0 %v3704_v42 }
 0x51a   : > { %4602 = vmatprep.subr.mxu0 %v3719_v32 }
 0x51c   : > { %v2288_v53 = vpop.f32.mrf.mxu1  ;;  %v3450_v18 = vpop.permute.xlu0 %3449 }
 0x51d   : > { %v7079_v52 = vadd.f32 %v2288_v53, %v2219_v30 }
 0x51e   : > { %v2290_v36 = vpop.f32.mrf.mxu1 }
 0x51f   : > { %v7254_v36 = vpop.permute.xlu1 %3494 }
 0x520   : > { %v3470_v55 = vpop.permute.xlu0 %3469 }
 0x523   : > { %v7259_v11 = vpop.permute.xlu1 %3514 }
 0x524   : > { %v3490_v54 = vpop.permute.xlu0 %3489 }
 0x527   : > { %v3460_v44 = vpop.permute.xlu1 %3459 }
 0x588   : > { %v3327_v59 = vpop.f32.mrf.mxu1 }
 0x58a   : > { %v4864_v4 = vpop.f32.mrf.mxu1 }
 0x58c   : > { %v3331_v20 = vpop.f32.mrf.mxu1 }
 0x58d   : > { %v3332_v23 = vadd.f32 %v7248_v46, %v3331_v20 }
 0x58e   : > { %v4867_v30 = vpop.f32.mrf.mxu1 }
 0x58f   : > { %v3410_v53 = vmax.f32 %v3332_v23, 0.0 }
 0x590   : > { %v3336_v14 = vpop.f32.mrf.mxu1 }
 0x591   : > { %v3522_v7 = vmul.f32 %v3445_v3, %v3410_v53  ;;  %v3337_v51 = vadd.f32 %v7248_v46, %v3336_v14  ;;  %v3480_v3 = vpop.permute.xlu1 %3479 }
 0x592   : > { %v4870_v57 = vpop.f32.mrf.mxu1 }
 0x593   : > { %3538 = vst.msk [vmem:[#allocation2] sm:$0xff] %vm1487_vm8, %v3522_v7  ;;  %v3411_v56 = vmax.f32 %v3337_v51, 0.0 }
 0x594   : > { %v3341_v58 = vpop.f32.mrf.mxu1 }
 0x595   : > { %v3523_v38 = vmul.f32 %v3450_v18, %v3411_v56  ;;  %v3342_v6 = vadd.f32 %v7248_v46, %v3341_v58  ;;  %v3500_v51 = vpop.permute.xlu1 %3499 }
 0x596   : > { %v4873_v9 = vpop.f32.mrf.mxu1 }
 0x597   : > { %3539 = vst.msk [vmem:[#allocation2 + $0x8] sm:$0xff] %vm1487_vm8, %v3523_v38  ;;  %v3412_v22 = vmax.f32 %v3342_v6, 0.0 }
 0x598   : > { %v3346_v5 = vpop.f32.mrf.mxu1 }
 0x599   : > { %v3524_v49 = vmul.f32 %v3455_v39, %v3412_v22  ;;  %v3347_v25 = vadd.f32 %v7248_v46, %v3346_v5 }
 0x59a   : > { %v4876_v12 = vpop.f32.mrf.mxu1 }
 0x59b   : > { %3540 = vst.msk [vmem:[#allocation2 + $0x10] sm:$0xff] %vm1487_vm8, %v3524_v49  ;;  %v3413_v24 = vmax.f32 %v3347_v25, 0.0  ;;  %v3510_v49 = vpop.permute.xlu0 %3509 }
 0x59c   : > { %v3351_v15 = vpop.f32.mrf.mxu1 }
 0x59d   : > { %v3525_v1 = vmul.f32 %v3460_v44, %v3413_v24  ;;  %v3352_v63 = vadd.f32 %v7248_v46, %v3351_v15 }
 0x59e   : > { %v4879_v34 = vpop.f32.mrf.mxu1 }
 0x59f   : > { %3541 = vst.msk [vmem:[#allocation2 + $0x18] sm:$0xff] %vm1487_vm8, %v3525_v1  ;;  %v3414_v60 = vmax.f32 %v3352_v63, 0.0 }
 0x5a0   : > { %v3356_v37 = vpop.f32.mrf.mxu1 }
 0x5a1   : > { %v3526_v41 = vmul.f32 %v3465_v47, %v3414_v60  ;;  %v3357_v10 = vadd.f32 %v7248_v46, %v3356_v37 }
 0x5a2   : > { %v4882_v2 = vpop.f32.mrf.mxu1 }
 0x5a3   : > { %3542 = vst.msk [vmem:[#allocation2 + $0x20] sm:$0xff] %vm1487_vm8, %v3526_v41  ;;  %v3415_v29 = vmax.f32 %v3357_v10, 0.0 }
 0x5a4   : > { %v3361_v17 = vpop.f32.mrf.mxu1 }
 0x5a5   : > { %v3527_v33 = vmul.f32 %v3470_v55, %v3415_v29  ;;  %v3362_v61 = vadd.f32 %v7248_v46, %v3361_v17  ;;  %v3520_v29 = vpop.permute.xlu1 %3519  ;;  %v3568_v55 = vld [vmem:[#allocation2 + $0x2] ss:$16 sm:$0x3] }
 0x5a6   : > { %v4885_v40 = vpop.f32.mrf.mxu1 }
 0x5a7   : > { %3543 = vst.msk [vmem:[#allocation2 + $0x28] sm:$0xff] %vm1487_vm8, %v3527_v33  ;;  %v3416_v13 = vmax.f32 %v3362_v61, 0.0  ;;  %v3596_v33 = vld [vmem:[#allocation2 + $0x6] ss:$16 sm:$0x3] }
 0x5a8   : > { %v3366_v31 = vpop.f32.mrf.mxu1 }
 0x5a9   : > { %v3528_v27 = vmul.f32 %v3475_v62, %v3416_v13  ;;  %v3367_v21 = vadd.f32 %v7248_v46, %v3366_v31  ;;  %v3561_v13 = vld [vmem:[#allocation2 + $0x1] ss:$16 sm:$0x3]  ;;  %v3589_v31 = vld [vmem:[#allocation2 + $0x5] ss:$16 sm:$0x3] }
 0x5aa   : > { %v4888_v28 = vpop.f32.mrf.mxu1 }
 0x5ab   : > { %3544 = vst.msk [vmem:[#allocation2 + $0x30] sm:$0xff] %vm1487_vm8, %v3528_v27  ;;  %v3417_v45 = vmax.f32 %v3367_v21, 0.0  ;;  %v3754_v21 = vld [vmem:[%s7575_s13 + $0x1a0] sm:$0xff] }
 0x5ac   : > { %v3371_v35 = vpop.f32.mrf.mxu1  ;;  %v3718_v28 = vld [vmem:[%s7575_s13 + $0x80] sm:$0xff]  ;;  %3893 = vmatpush2.msra.mxu1 %v3754_v21 }
 0x5ad   : > { %v3529_v43 = vmul.f32 %v3480_v3, %v3417_v45  ;;  %v3372_v42 = vadd.f32 %v7248_v46, %v3371_v35  ;;  %v3753_v3 = vld [vmem:[%s7575_s13 + $0x198] sm:$0xff]  ;;  %3894 = vmatprep.subr.mxu1 %v5148_v0 }
 0x5ae   : > { %v4891_v32 = vpop.f32.mrf.mxu1  ;;  %3895 = vmatpush2.msra.mxu1 %v3753_v3 }
 0x5af   : > { %3545 = vst.msk [vmem:[#allocation2 + $0x38] sm:$0xff] %vm1487_vm8, %v3529_v43  ;;  %v3418_v19 = vmax.f32 %v3372_v42, 0.0  ;;  %v3575_v32 = vld [vmem:[#allocation2 + $0x3] ss:$16 sm:$0x3]  ;;  %3896 = vmatprep.subr.mxu1 %v5148_v0 }
 0x5b0   : > { %v3376_v16 = vpop.f32.mrf.mxu1 }
 0x5b1   : > { %v3530_v47 = vmul.f32 %v7242_v26, %v3418_v19  ;;  %v3377_v50 = vadd.f32 %v7248_v46, %v3376_v16  ;;  %v3702_v19 = vld [vmem:[%s7575_s13] sm:$0xff]  ;;  %v3752_v16 = vld [vmem:[%s7575_s13 + $0x190] sm:$0xff] }
 0x5b2   : > { %v4894_v39 = vpop.f32.mrf.mxu1  ;;  %v3569_v60 = vld [vmem:[#allocation2 + $0x2] ss:$16 sm:$0xc]  ;;  %v3597_v37 = vld [vmem:[#allocation2 + $0x6] ss:$16 sm:$0xc]  ;;  %3897 = vmatpush2.msra.mxu1 %v3752_v16 }
 0x5b3   : > { %3546 = vst.msk [vmem:[#allocation2 + $0x40] sm:$0xff] %vm1487_vm8, %v3530_v47  ;;  %v3419_v8 = vmax.f32 %v3377_v50, 0.0  ;;  %v3562_v10 = vld [vmem:[#allocation2 + $0x1] ss:$16 sm:$0xc]  ;;  %v3570_v35 = vor.u32 %v3569_v60, %v3568_v55  ;;  %v3598_v43 = vor.u32 %v3597_v37, %v3596_v33  ;;  %3898 = vmatprep.subr.mxu1 %v5148_v0 }
 0x5b4   : > { %v3381_v59 = vpop.f32.mrf.mxu1  ;;  %v3590_v2 = vld [vmem:[#allocation2 + $0x5] ss:$16 sm:$0xc]  ;;  %v3576_v27 = vld [vmem:[#allocation2 + $0x3] ss:$16 sm:$0xc]  ;;  %v3563_v47 = vor.u32 %v3562_v10, %v3561_v13 }
 0x5b5   : > { %v3531_v62 = vmul.f32 %v3490_v54, %v3419_v8  ;;  %v3382_v4 = vadd.f32 %v7248_v46, %v3381_v59  ;;  %v3591_v50 = vor.u32 %v3590_v2, %v3589_v31  ;;  %v3603_v39 = vld [vmem:[#allocation2 + $0x7] ss:$16 sm:$0x3]  ;;  %v3645_v60 = vld [vmem:[#allocation2 + $0xd] ss:$16 sm:$0x3] }
 0x5b6   : > { %v4897_v20 = vpop.f32.mrf.mxu1  ;;  %v3618_v8 = vld [vmem:[#allocation2 + $0x9] ss:$16 sm:$0xc]  ;;  %v3750_v55 = vld [vmem:[%s7575_s13 + $0x180] sm:$0xff] }
 0x5b7   : > { %3547 = vst.msk [vmem:[#allocation2 + $0x48] sm:$0xff] %vm1487_vm8, %v3531_v62  ;;  %v3420_v23 = vmax.f32 %v3382_v4, 0.0  ;;  %v3632_v31 = vld [vmem:[#allocation2 + $0xb] ss:$16 sm:$0xc] }
 0x5b8   : > { %v3386_v30 = vpop.f32.mrf.mxu1  ;;  %v3582_v16 = vld [vmem:[#allocation2 + $0x4] ss:$16 sm:$0x3] }
 0x5b9   : > { %v3532_v53 = vmul.f32 %v7254_v36, %v3420_v23  ;;  %v3387_v26 = vadd.f32 %v7248_v46, %v3386_v30 }
 0x5ba   : > { %v4900_v14 = vpop.f32.mrf.mxu1 }
 0x5bb   : > { %3548 = vst.msk [vmem:[#allocation2 + $0x50] sm:$0xff] %vm1487_vm8, %v3532_v53  ;;  %v3421_v7 = vmax.f32 %v3387_v26, 0.0  ;;  %v3577_v26 = vor.u32 %v3576_v27, %v3575_v32  ;;  %v3583_v32 = vld [vmem:[#allocation2 + $0x4] ss:$16 sm:$0xc] }
 0x5bc   : > { %v3391_v57 = vpop.f32.mrf.mxu1 }
 0x5bd   : > { %v3533_v56 = vmul.f32 %v3500_v51, %v3421_v7  ;;  %v3392_v18 = vadd.f32 %v7248_v46, %v3391_v57  ;;  %v3617_v7 = vld [vmem:[#allocation2 + $0x9] ss:$16 sm:$0x3] }
 0x5be   : > { %v4903_v58 = vpop.f32.mrf.mxu1 }
 0x5bf   : > { %3549 = vst.msk [vmem:[#allocation2 + $0x58] sm:$0xff] %vm1487_vm8, %v3533_v56  ;;  %v3422_v38 = vmax.f32 %v3392_v18, 0.0 }
 0x5c0   : > { %v3396_v6 = vpop.f32.mrf.mxu1 }
 0x5c1   : > { %v3534_v9 = vmul.f32 %v7252_v48, %v3422_v38  ;;  %v3397_v36 = vadd.f32 %v7248_v46, %v3396_v6 }
 0x5c2   : > { %v4906_v22 = vpop.f32.mrf.mxu1  ;;  %v3571_v17 = vld [vmem:[#allocation2 + $0x2] ss:$16 sm:$0x30]  ;;  %v3599_v61 = vld [vmem:[#allocation2 + $0x6] ss:$16 sm:$0x30] }
 0x5c3   : > { %3550 = vst.msk [vmem:[#allocation2 + $0x60] sm:$0xff] %vm1487_vm8, %v3534_v9  ;;  %v3423_v5 = vmax.f32 %v3397_v36, 0.0  ;;  %v3564_v45 = vld [vmem:[#allocation2 + $0x1] ss:$16 sm:$0x30]  ;;  %v3572_v54 = vor.u32 %v3571_v17, %v3570_v35  ;;  %v3600_v59 = vor.u32 %v3599_v61, %v3598_v43 }
 0x5c4   : > { %v3401_v25 = vpop.f32.mrf.mxu1  ;;  %v3592_v42 = vld [vmem:[#allocation2 + $0x5] ss:$16 sm:$0x30]  ;;  %v3578_v62 = vld [vmem:[#allocation2 + $0x3] ss:$16 sm:$0x30]  ;;  %v3565_v30 = vor.u32 %v3564_v45, %v3563_v47 }
 0x5c5   : > { %v3535_v12 = vmul.f32 %v3510_v49, %v3423_v5  ;;  %v3402_v24 = vadd.f32 %v7248_v46, %v3401_v25  ;;  %v3606_v4 = vld [vmem:[#allocation2 + $0x7] ss:$16 sm:$0x30]  ;;  %v3593_v53 = vor.u32 %v3592_v42, %v3591_v50  ;;  %v3579_v9 = vor.u32 %v3578_v62, %v3577_v26  ;;  %v3555_v42 = vld [vmem:[#allocation2] ss:$16 sm:$0xc] }
 0x5c6   : > { %v4909_v44 = vpop.f32.mrf.mxu1  ;;  %v3620_v51 = vld [vmem:[#allocation2 + $0x9] ss:$16 sm:$0x30]  ;;  %v3619_v25 = vor.u32 %v3618_v8, %v3617_v7  ;;  %v3648_v37 = vld [vmem:[#allocation2 + $0xd] ss:$16 sm:$0x30]  ;;  %v3584_v8 = vor.u32 %v3583_v32, %v3582_v16 }
 0x5c7   : > { %3551 = vst.msk [vmem:[#allocation2 + $0x68] sm:$0xff] %vm1487_vm8, %v3535_v12  ;;  %v3424_v15 = vmax.f32 %v3402_v24, 0.0  ;;  %v3627_v10 = vld [vmem:[#allocation2 + $0xa] ss:$16 sm:$0x30] }
 0x5c8   : > { %v3406_v1 = vpop.f32.mrf.mxu1  ;;  %v3634_v21 = vld [vmem:[#allocation2 + $0xb] ss:$16 sm:$0x30]  ;;  %v3557_v47 = vld [vmem:[#allocation2] ss:$16 sm:$0x30] }
 0x5c9   : > { %v3536_v63 = vmul.f32 %v7259_v11, %v3424_v15  ;;  %v3407_v48 = vadd.f32 %v7248_v46, %v3406_v1  ;;  %v3604_v11 = vld [vmem:[#allocation2 + $0x7] ss:$16 sm:$0xc]  ;;  %v3703_v46 = vld [vmem:[%s7575_s13 + $0x8] sm:$0xff]  ;;  %v2295_v32 = vld [vmem:[%s7577_s15 + $0x18] sm:$0xff] }
 0x5ca   : > { %v4912_v34 = vpop.f32.mrf.mxu1  ;;  %4603 = vmatpush3.msra.mxu0 %v3703_v46  ;;  %v3605_v14 = vor.u32 %v3604_v11, %v3603_v39  ;;  %v3646_v1 = vld [vmem:[#allocation2 + $0xd] ss:$16 sm:$0xc]  ;;  %v3631_v46 = vld [vmem:[#allocation2 + $0xb] ss:$16 sm:$0x3] }
 0x5cb   : > { %3552 = vst.msk [vmem:[#allocation2 + $0x70] sm:$0xff] %vm1487_vm8, %v3536_v63  ;;  %v3425_v41 = vmax.f32 %v3407_v48, 0.0  ;;  %4604 = vmatprep.subr.mxu0 %v3718_v28  ;;  %v3621_v63 = vor.u32 %v3620_v51, %v3619_v25  ;;  %v3624_v48 = vld [vmem:[#allocation2 + $0xa] ss:$16 sm:$0x3]  ;;  %v3647_v2 = vor.u32 %v3646_v1, %v3645_v60  ;;  %v3633_v45 = vor.u32 %v3632_v31, %v3631_v46  ;;  %v4432_v31 = vld [vmem:[%s7577_s15 + $0x30] sm:$0xff] }
 0x5cc   : > { %4605 = vmatpush3.msra.mxu0 %v3702_v19  ;;  %v3607_v22 = vor.u32 %v3606_v4, %v3605_v14  ;;  %v3625_v34 = vld [vmem:[#allocation2 + $0xa] ss:$16 sm:$0xc]  ;;  %v3554_v19 = vld [vmem:[#allocation2] ss:$16 sm:$0x3] }
 0x5cd   : > { %v3537_v40 = vmul.f32 %v3520_v29, %v3425_v41  ;;  %4913 = vmatprep.subr.mxu0 %v5148_v0  ;;  %v3751_v29 = vld [vmem:[%s7575_s13 + $0x188] sm:$0xff]  ;;  %v3626_v33 = vor.u32 %v3625_v34, %v3624_v48  ;;  %v3649_v13 = vor.u32 %v3648_v37, %v3647_v2  ;;  %v3635_v35 = vor.u32 %v3634_v21, %v3633_v45  ;;  %v3585_v50 = vld [vmem:[#allocation2 + $0x4] ss:$16 sm:$0x30] }
 0x5ce   : > { %3899 = vmatpush2.msra.mxu1 %v3751_v29  ;;  %v3556_v39 = vor.u32 %v3555_v42, %v3554_v19  ;;  %v3638_v7 = vld [vmem:[#allocation2 + $0xc] ss:$16 sm:$0x3]  ;;  %v2294_v19 = vld [vmem:[%s7577_s15 + $0x10] sm:$0xff] }
 0x5cf   : > { %3553 = vst.msk [vmem:[#allocation2 + $0x78] sm:$0xff] %vm1487_vm8, %v3537_v40  ;;  %3900 = vmatprep.subr.mxu1 %v5148_v0  ;;  %v3628_v27 = vor.u32 %v3627_v10, %v3626_v33  ;;  %v3641_v51 = vld [vmem:[#allocation2 + $0xc] ss:$16 sm:$0x30] }
 0x5d0   : > { %3901 = vmatpush2.msra.mxu1 %v3750_v55  ;;  %v3558_v4 = vor.u32 %v3557_v47, %v3556_v39  ;;  %v2293_v16 = vld [vmem:[%s7577_s15 + $0x8] sm:$0xff]  ;;  %v2292_v47 = vld [vmem:[%s7577_s15] sm:$0xff]  ;;  %v4082_v39 = vld [vmem:[%s7579_s17 + $0x70] sm:$0xff] }
 0x5d1   : > { %4970 = vmatprep.subr.mxu1 %v5148_v0 }
 0x5d2   : > { %v3573_v20 = vld [vmem:[#allocation2 + $0x2] ss:$16 sm:$0xc0]  ;;  %v3601_v23 = vld [vmem:[#allocation2 + $0x6] ss:$16 sm:$0xc0] }
 0x5d3   : > { %v3574_v57 = vor.u32 %v3573_v20, %v3572_v54  ;;  %v3602_v56 = vor.u32 %v3601_v23, %v3600_v59  ;;  %v3566_v18 = vld [vmem:[#allocation2 + $0x1] ss:$16 sm:$0xc0]  ;;  %v3594_v58 = vld [vmem:[#allocation2 + $0x5] ss:$16 sm:$0xc0]  ;;  %v3586_v23 = vor.u32 %v3585_v50, %v3584_v8 }
 0x5d4   : > { %v3567_v38 = vor.u32 %v3566_v18, %v3565_v30  ;;  %v3595_v6 = vor.u32 %v3594_v58, %v3593_v53  ;;  %v3580_v36 = vld [vmem:[#allocation2 + $0x3] ss:$16 sm:$0xc0]  ;;  %v3608_v5 = vld [vmem:[#allocation2 + $0x7] ss:$16 sm:$0xc0] }
 0x5d5   : > { %v5075_v49 = vpack.i.bf16 %v3574_v57, %v3602_v56  ;;  %v3581_v24 = vor.u32 %v3580_v36, %v3579_v9  ;;  %v3609_v44 = vor.u32 %v3608_v5, %v3607_v22  ;;  %v3559_v54 = vld [vmem:[#allocation2] ss:$16 sm:$0xc0]  ;;  %v3587_v59 = vld [vmem:[#allocation2 + $0x4] ss:$16 sm:$0xc0] }
 0x5d6   : > { %v5070_v12 = vpack.i.bf16 %v3567_v38, %v3595_v6  ;;  %v3622_v15 = vld [vmem:[#allocation2 + $0x9] ss:$16 sm:$0xc0]  ;;  %v3650_v61 = vld [vmem:[#allocation2 + $0xd] ss:$16 sm:$0xc0]  ;;  %v3560_v53 = vor.u32 %v3559_v54, %v3558_v4  ;;  %v3588_v57 = vor.u32 %v3587_v59, %v3586_v23 }
 0x5d7   : > { %5076 = vrot.lane.b32.xlu1 %v5075_v49, %s7633_s27  ;;  %v3623_v41 = vor.u32 %v3622_v15, %v3621_v63  ;;  %v5080_v17 = vpack.i.bf16 %v3581_v24, %v3609_v44  ;;  %v3629_v40 = vld [vmem:[#allocation2 + $0xa] ss:$16 sm:$0xc0]  ;;  %v3651_v11 = vor.u32 %v3650_v61, %v3649_v13  ;;  %v3636_v3 = vld [vmem:[#allocation2 + $0xb] ss:$16 sm:$0xc0] }
 0x5d8   : > { %5071 = vrot.lane.b32.xlu0 %v5070_v12, %s7632_s28  ;;  %v3630_v28 = vor.u32 %v3629_v40, %v3628_v27  ;;  %v3637_v43 = vor.u32 %v3636_v3, %v3635_v35  ;;  %v3639_v20 = vld [vmem:[#allocation2 + $0xc] ss:$16 sm:$0xc]  ;;  %v3611_v58 = vld [vmem:[#allocation2 + $0x8] ss:$16 sm:$0xc] }
 0x5d9   : > { %v3640_v38 = vor.u32 %v3639_v20, %v3638_v7  ;;  %v3643_v36 = vld [vmem:[#allocation2 + $0xc] ss:$16 sm:$0xc0]  ;;  %v3610_v5 = vld [vmem:[#allocation2 + $0x8] ss:$16 sm:$0x3] }
 0x5da   : > { %v3613_v49 = vld [vmem:[#allocation2 + $0x8] ss:$16 sm:$0x30]  ;;  %v3612_v24 = vor.u32 %v3611_v58, %v3610_v5  ;;  %v4078_v59 = vld [vmem:[%s7579_s17 + $0x50] sm:$0xff]  ;;  %v4076_v4 = vld [vmem:[%s7579_s17 + $0x40] sm:$0xff] }
 0x5db   : > { %3677 = vrot.lane.b32.xlu1 %v3623_v41, %s7632_s28  ;;  %v3642_v12 = vor.u32 %v3641_v51, %v3640_v38  ;;  %v3615_v1 = vld [vmem:[#allocation2 + $0x8] ss:$16 sm:$0xc0]  ;;  %v4074_v23 = vld [vmem:[%s7579_s17 + $0x30] sm:$0xff]  ;;  %v4174_v58 = vld [vmem:[%s7581_s19 + $0x60] sm:$0xff] }
 0x5dc   : > { %5081 = vrot.lane.b32.xlu0 %v5080_v17, %s7638_s24  ;;  %v3614_v60 = vor.u32 %v3613_v49, %v3612_v24  ;;  %v4433_v13 = vld [vmem:[%s7577_s15 + $0x38] sm:$0xff]  ;;  %v4431_v27 = vld [vmem:[%s7577_s15 + $0x28] sm:$0xff]  ;;  %v4168_v5 = vld [vmem:[%s7581_s19 + $0x30] sm:$0xff] }
 0x5dd   : > { %v3644_v63 = vor.u32 %v3643_v36, %v3642_v12  ;;  %v4083_v50 = vld [vmem:[%s7579_s17 + $0x78] sm:$0xff]  ;;  %v4081_v8 = vld [vmem:[%s7579_s17 + $0x68] sm:$0xff]  ;;  %v4170_v36 = vld [vmem:[%s7581_s19 + $0x40] sm:$0xff] }
 0x5de   : > { %v3616_v55 = vor.u32 %v3615_v1, %v3614_v60  ;;  %v4079_v54 = vld [vmem:[%s7579_s17 + $0x58] sm:$0xff]  ;;  %v4069_v7 = vld [vmem:[%s7579_s17 + $0x8] sm:$0xff]  ;;  %v4436_v1 = vld [vmem:[%s7578_s16] ss:$0 sm:$0xff] }
 0x5df   : > { %3689 = vrot.lane.b32.xlu1 %v3651_v11, %s7632_s28  ;;  %v4430_v11 = vld [vmem:[%s7577_s15 + $0x20] sm:$0xff]  ;;  %v4075_v20 = vld [vmem:[%s7579_s17 + $0x38] sm:$0xff]  ;;  %v4167_v49 = vld [vmem:[%s7581_s19 + $0x28] sm:$0xff]  ;;  %s4440_s28 = sshll.u32 %s5288_s3, 7  ;;  %s5090_s3 = sshll.u32 %s5156_s2, 4  ;;  %s5091_s3 = int_to_ptr.vmem [resolvable:$false] %s5090_s3 }
 0x5e0   : > { %3681 = vrot.lane.b32.xlu0 %v3630_v28, %s7633_s27  ;;  %v4428_v28 = vld [vmem:[%s7576_s14] ss:$0 sm:$0xff]  ;;  %v4177_v51 = vld [vmem:[%s7581_s19 + $0x78] sm:$0xff]  ;;  %s649_s27 = scalar_lea.vmem [#allocation3], %s4333_s22  ;;  %s7527_s4 = scalar_lea.hbm %s7640_s6, %s4440_s28 }
 0x5e1   : > { %v4173_v38 = vld [vmem:[%s7581_s19 + $0x58] sm:$0xff]  ;;  %s5092_s22 = scalar_lea.vmem %s5091_s3, 256 }
 0x5e2   : > { %v4165_v12 = vld [vmem:[%s7581_s19 + $0x18] sm:$0xff] }
 0x5e4   : > { %3685 = vrot.lane.b32.xlu0 %v3637_v43, %s7638_s24  ;;  %s4270_s24 = sshll.u32 %s649_s27, 4  ;;  %s4271_s24 = int_to_ptr.vmem [resolvable:$true] %s4270_s24 }
 0x5e5   : > { %s5086_s7 = scalar_lea.vmem %s4271_s24, 128  ;;  %p5093_p0 = scmp.lt.s32.totalorder %s4271_s24, %s5091_s3 }
 0x5e6   : > { %p5087_p11 = scmp.ne.s32.totalorder %s4271_s24, %s5086_s7  ;;  %p5094_p1 = scmp.lt.s32.totalorder %s5092_s22, %s5086_s7 }
 0x5e8   : > { %p5088_p12 = pnand %p5087_p11, %p5305_p5  ;;  %p5095_p2 = por %p5094_p1, %p5093_p0 }
 0x5ea   : > { %p5089_p13 = pneg %p5088_p12 }
 0x5ec   : > { %p5096_p3 = pnand %p5095_p2, %p5089_p13 }
 0x649   : > { %v5077_v62 = vpop.permute.xlu1 %5076 }
 0x64a   : > { %v5072_v30 = vpop.permute.xlu0 %5071  ;;  %v5079_v56 = vunpack.i.h.bf16 %v5077_v62  ;;  %v5078_v18 = vunpack.i.l.bf16 %v5077_v62  ;;  %v4077_v62 = vld [vmem:[%s7579_s17 + $0x48] sm:$0xff] }
 0x64b   : > { %v5074_v26 = vunpack.i.h.bf16 %v5072_v30  ;;  %v5073_v14 = vunpack.i.l.bf16 %v5072_v30  ;;  %v4073_v30 = vld [vmem:[%s7579_s17 + $0x28] sm:$0xff] }
 0x64d   : > { %v3692_v6 = vsel %vm1487_vm8, %v3560_v53, %v5074_v26  ;;  %v3678_v9 = vpop.permute.xlu1 %3677  ;;  %v3695_v22 = vsel %vm1487_vm8, %v3588_v57, %v5073_v14  ;;  %v4072_v53 = vld [vmem:[%s7579_s17 + $0x20] sm:$0xff]  ;;  %v4071_v26 = vld [vmem:[%s7579_s17 + $0x18] sm:$0xff]  ;;  %v4070_v14 = vld [vmem:[%s7579_s17 + $0x10] sm:$0xff] }
 0x64e   : > { %v5082_v25 = vpop.permute.xlu0 %5081  ;;  %v3696_v48 = vsel %vm1506_vm9, %v3695_v22, %v5078_v18  ;;  %v3693_v34 = vsel %vm1506_vm9, %v3692_v6, %v5079_v56  ;;  %v3698_v17 = vsel %vm1487_vm8, %v3616_v55, %v3678_v9  ;;  %v4176_v57 = vld [vmem:[%s7581_s19 + $0x70] sm:$0xff]  ;;  %v4068_v56 = vld [vmem:[%s7579_s17] sm:$0xff]  ;;  %v4175_v18 = vld [vmem:[%s7581_s19 + $0x68] sm:$0xff] }
 0x64f   : > { %v5084_v44 = vunpack.i.h.bf16 %v5082_v25  ;;  %v5083_v15 = vunpack.i.l.bf16 %v5082_v25  ;;  %v4172_v6 = vld [vmem:[%s7581_s19 + $0x50] sm:$0xff]  ;;  %v4171_v9 = vld [vmem:[%s7581_s19 + $0x48] sm:$0xff]  ;;  %v4169_v22 = vld [vmem:[%s7581_s19 + $0x38] sm:$0xff] }
 0x650   : > { %v4166_v25 = vld [vmem:[%s7581_s19 + $0x20] sm:$0xff] }
 0x651   : > { %v3690_v37 = vpop.permute.xlu1 %3689  ;;  %v3697_v41 = vsel %vm1597_vm10, %v3696_v48, %v5083_v15  ;;  %v3694_v10 = vsel %vm1597_vm10, %v3693_v34, %v5084_v44 }
 0x652   : > { %v3701_v2 = vsel %vm1487_vm8, %v3644_v63, %v3690_v37  ;;  %v3682_v29 = vpop.permute.xlu0 %3681  ;;  %3832 = vmatprep.mubr.f32.mxu0 %v3697_v41  ;;  %v4164_v37 = vld [vmem:[%s7581_s19 + $0x10] sm:$0xff]  ;;  %v4163_v41 = vld [vmem:[%s7581_s19 + $0x8] sm:$0xff] }
 0x653   : > { %3833 = vmatmul.mubr.f32.vlgmr.msra.gmra.mxu0 %v3694_v10  ;;  %4429 = vmatprep.mubr.msk.f32.mxu1 %vm1506_vm9, %v3701_v2  ;;  %v3699_v33 = vsel %vm1506_vm9, %v3698_v17, %v3682_v29  ;;  %v4162_v10 = vld [vmem:[%s7581_s19] sm:$0xff] }
 0x654   : > { %4921 = vmatprep.mubr.msk.f32.mxu0 %vm5149_vm1, %v5148_v0  ;;  %4914 = vmatpush3.msra.mxu0 %v4433_v13  ;;  %v4437_v2 = vld [vmem:[%s7580_s18] ss:$0 sm:$0xff] }
 0x655   : > { %4915 = vmatprep.subr.mxu0 %v5148_v0 }
 0x656   : > { %v3686_v61 = vpop.permute.xlu0 %3685  ;;  %4916 = vmatpush3.msra.mxu0 %v4432_v31 }
 0x657   : > { %v3700_v40 = vsel %vm1597_vm10, %v3699_v33, %v3686_v61  ;;  %4917 = vmatprep.subr.mxu0 %v5148_v0  ;;  %v4438_v61 = vld [vmem:[%s7639_s1] ss:$0 sm:$0xff] }
 0x658   : > { %3903 = vmatmul.mubr.f32.vlgmr.msra.gmra.mxu1 %v3700_v40  ;;  %4918 = vmatpush3.msra.mxu0 %v4431_v27 }
 0x659   : > { %5002 = vmatprep.mubr.msk.f32.mxu1 %vm5149_vm1, %v5148_v0  ;;  %4919 = vmatprep.subr.mxu0 %v5148_v0 }
 0x65a   : > { %4920 = vmatpush3.msra.mxu0 %v4430_v11  ;;  %4971 = vmatpush3.msra.mxu1 %v4177_v51 }
 0x65b   : > { %4924 = vmatprep.subr.mxu0 %v5148_v0  ;;  %4972 = vmatprep.subr.mxu1 %v5148_v0 }
 0x65c   : > { %4973 = vmatpush3.msra.mxu1 %v4176_v57 }
 0x65d   : > { %4974 = vmatprep.subr.mxu1 %v5148_v0 }
 0x65e   : > { %4975 = vmatpush3.msra.mxu1 %v4175_v18 }
 0x65f   : > { %4976 = vmatprep.subr.mxu1 %v5148_v0 }
 0x660   : > { %4977 = vmatpush3.msra.mxu1 %v4174_v58 }
 0x661   : > { %4978 = vmatprep.subr.mxu1 %v5148_v0 }
 0x662   : > { %4979 = vmatpush3.msra.mxu1 %v4173_v38 }
 0x663   : > { %4980 = vmatprep.subr.mxu1 %v5148_v0 }
 0x664   : > { %4981 = vmatpush3.msra.mxu1 %v4172_v6 }
 0x665   : > { %4982 = vmatprep.subr.mxu1 %v5148_v0 }
 0x666   : > { %4983 = vmatpush3.msra.mxu1 %v4171_v9 }
 0x667   : > { %4984 = vmatprep.subr.mxu1 %v5148_v0 }
 0x668   : > { %4985 = vmatpush3.msra.mxu1 %v4170_v36 }
 0x669   : > { %4986 = vmatprep.subr.mxu1 %v5148_v0 }
 0x66a   : > { %4987 = vmatpush3.msra.mxu1 %v4169_v22 }
 0x66b   : > { %4988 = vmatprep.subr.mxu1 %v5148_v0 }
 0x66c   : > { %4989 = vmatpush3.msra.mxu1 %v4168_v5 }
 0x66d   : > { %4990 = vmatprep.subr.mxu1 %v5148_v0 }
 0x66e   : > { %4991 = vmatpush3.msra.mxu1 %v4167_v49 }
 0x66f   : > { %4992 = vmatprep.subr.mxu1 %v5148_v0 }
 0x670   : > { %4993 = vmatpush3.msra.mxu1 %v4166_v25 }
 0x671   : > { %4994 = vmatprep.subr.mxu1 %v5148_v0 }
 0x672   : > { %4995 = vmatpush3.msra.mxu1 %v4165_v12 }
 0x673   : > { %4996 = vmatprep.subr.mxu1 %v5148_v0 }
 0x674   : > { %4997 = vmatpush3.msra.mxu1 %v4164_v37 }
 0x675   : > { %4998 = vmatprep.subr.mxu1 %v5148_v0 }
 0x676   : > { %4999 = vmatpush3.msra.mxu1 %v4163_v41 }
 0x677   : > { %5000 = vmatprep.subr.mxu1 %v5148_v0 }
 0x678   : > { %5001 = vmatpush3.msra.mxu1 %v4162_v10 }
 0x713   : > { %v4606_v46 = vpop.f32.mrf.mxu0 }
 0x715   : > { %v4607_v21 = vpop.f32.mrf.mxu0 }
 0x716   : > { %v4608_v45 = vadd.f32 %v4607_v21, %v4606_v46 }
 0x718   : > { %v3835_v3 = vadd.f32 %v4608_v45, %v4428_v28  ;;  %v3904_v35 = vpop.f32.mrf.mxu1 }
 0x71a   : > { %v3905_v43 = vadd.f32 %v3904_v35, %v3835_v3  ;;  %v3906_v42 = vpop.f32.mrf.mxu1 }
 0x71c   : > { %4922 = vmatmul.mubr.msk.f32.vlgmr.msra.gmra.mxu0 %vm1487_vm8, %v3905_v43 }
 0x71d   : > { %4925 = vmatpush3.msra.mxu0 %v2295_v32  ;;  %4932 = vmatprep.mubr.msk.f32.mxu0 %vm5149_vm1, %v5148_v0 }
 0x71e   : > { %4926 = vmatprep.subr.mxu0 %v5148_v0 }
 0x71f   : > { %4927 = vmatpush3.msra.mxu0 %v2294_v19 }
 0x720   : > { %4928 = vmatprep.subr.mxu0 %v5148_v0 }
 0x721   : > { %4929 = vmatpush3.msra.mxu0 %v2293_v16 }
 0x722   : > { %4930 = vmatprep.subr.mxu0 %v5148_v0 }
 0x723   : > { %4931 = vmatpush3.msra.mxu0 %v2292_v47 }
 0x724   : > { %4933 = vmatmul.mubr.msk.f32.vlgmr.msra.gmra.mxu0 %vm1487_vm8, %v7079_v52  ;;  %4935 = vmatprep.subr.mxu0 %v5148_v0  ;;  %v4080_v52 = vld [vmem:[%s7579_s17 + $0x60] sm:$0xff] }
 0x725   : > { %4936 = vmatpush3.msra.mxu0 %v4083_v50  ;;  %4967 = vmatprep.mubr.msk.f32.mxu0 %vm5149_vm1, %v5148_v0 }
 0x726   : > { %4937 = vmatprep.subr.mxu0 %v5148_v0 }
 0x727   : > { %4938 = vmatpush3.msra.mxu0 %v4082_v39 }
 0x728   : > { %4939 = vmatprep.subr.mxu0 %v5148_v0 }
 0x729   : > { %4940 = vmatpush3.msra.mxu0 %v4081_v8 }
 0x72a   : > { %4941 = vmatprep.subr.mxu0 %v5148_v0 }
 0x72b   : > { %4942 = vmatpush3.msra.mxu0 %v4080_v52 }
 0x72c   : > { %4943 = vmatprep.subr.mxu0 %v5148_v0 }
 0x72d   : > { %4944 = vmatpush3.msra.mxu0 %v4079_v54 }
 0x72e   : > { %4945 = vmatprep.subr.mxu0 %v5148_v0 }
 0x72f   : > { %4946 = vmatpush3.msra.mxu0 %v4078_v59 }
 0x730   : > { %4947 = vmatprep.subr.mxu0 %v5148_v0 }
 0x731   : > { %4948 = vmatpush3.msra.mxu0 %v4077_v62 }
 0x732   : > { %4949 = vmatprep.subr.mxu0 %v5148_v0 }
 0x733   : > { %4950 = vmatpush3.msra.mxu0 %v4076_v4 }
 0x734   : > { %4951 = vmatprep.subr.mxu0 %v5148_v0 }
 0x735   : > { %4952 = vmatpush3.msra.mxu0 %v4075_v20 }
 0x736   : > { %4953 = vmatprep.subr.mxu0 %v5148_v0 }
 0x737   : > { %4954 = vmatpush3.msra.mxu0 %v4074_v23 }
 0x738   : > { %4955 = vmatprep.subr.mxu0 %v5148_v0 }
 0x739   : > { %4956 = vmatpush3.msra.mxu0 %v4073_v30 }
 0x73a   : > { %4957 = vmatprep.subr.mxu0 %v5148_v0 }
 0x73b   : > { %4958 = vmatpush3.msra.mxu0 %v4072_v53 }
 0x73c   : > { %4959 = vmatprep.subr.mxu0 %v5148_v0 }
 0x73d   : > { %4960 = vmatpush3.msra.mxu0 %v4071_v26 }
 0x73e   : > { %4961 = vmatprep.subr.mxu0 %v5148_v0 }
 0x73f   : > { %4962 = vmatpush3.msra.mxu0 %v4070_v14 }
 0x740   : > { %4963 = vmatprep.subr.mxu0 %v5148_v0 }
 0x741   : > { %4964 = vmatpush3.msra.mxu0 %v4069_v7 }
 0x742   : > { %4965 = vmatprep.subr.mxu0 %v5148_v0 }
 0x743   : > { %4966 = vmatpush3.msra.mxu0 %v4068_v56 }
 0x7dc   : > { %v3982_v24 = vpop.f32.mrf.mxu0 }
 0x7de   : > { %v4923_v44 = vpop.f32.mrf.mxu0 }
 0x7e4   : > { %v4055_v15 = vpop.f32.mrf.mxu0 }
 0x7e5   : > { %v4056_v63 = vadd.f32 %v4055_v15, %v3982_v24 }
 0x7e6   : > { %v4934_v48 = vpop.f32.mrf.mxu0 }
 0x7e7   : > { %v4066_v34 = vadd.f32 %v4436_v1, %v4056_v63 }
 0x7e9   : > { %v4067_v60 = vmax.f32 %v4066_v34, 0.0 }
 0x7eb   : > { %4968 = vmatmul.mubr.f32.vlgmr.msra.gmra.mxu0 %v4067_v60 }
 0x8ab   : > { %v4157_v29 = vpop.f32.mrf.mxu0 }
 0x8ac   : > { %v4158_v55 = vadd.f32 %v4437_v2, %v4157_v29 }
 0x8ad   : > { %v4969_v17 = vpop.f32.mrf.mxu0 }
 0x8ae   : > { %v4161_v33 = vmax.f32 %v4158_v55, 0.0 }
 0x8b0   : > { %5003 = vmatmul.mubr.f32.vlgmr.msra.gmra.mxu1 %v4161_v33 }
 0x970   : > { %v4251_v0 = vpop.f32.mrf.mxu1 }
 0x971   : > { %v4252_v40 = vadd.f32 %v4438_v61, %v4251_v0 }
 0x972   : > { %v5004_v13 = vpop.f32.mrf.mxu1 }
 0x973   : > { %4255 = vst [vmem:[%s649_s27] sm:$0xff] %v4252_v40 }
 0x974   : > { %5099 = shalt.err (!%p5096_p3)
}
 0x975   : > { %s5100_s29 = scalar_lea.hbm %s7527_s4, 128  ;;  %s5104_s28 = scalar_lea.hbm %s7640_s6, 256 }
 0x976   : > { %p5101_p4 = scmp.ne.s32.totalorder %s7527_s4, %s5100_s29  ;;  %p5105_p9 = scmp.lt.s32.totalorder %s7527_s4, %s7640_s6 }
 0x977   : > { %p5106_p10 = scmp.lt.s32.totalorder %s5104_s28, %s5100_s29 }
 0x978   : > { %p5102_p7 = pnand %p5101_p4, %p5305_p5 }
 0x979   : > { %p5107_p11 = por %p5106_p10, %p5105_p9 }
 0x97a   : > { %p5103_p8 = pneg %p5102_p7 }
 0x97c   : > { %p5108_p12 = pnand %p5107_p11, %p5103_p8 }
 0x97e   : > { %5111 = shalt.err (!%p5108_p12)
}
 0x97f   : > { %5006 = dma.vmem_to_hbm [thread:$0]  (%p5305_p5), %s4271_s24, 128, %s7527_s4, %s4257_s21  }
 0x980 PF: > { %s7641_s7 = sld [smem:[#allocation8_spill]] }
 0x981   : > { %s7642_s0 = sld [smem:[#allocation6_spill]] }
 0x986   : > { %p5012_p13 = scmp.ge.s32.totalorder %s7641_s7, 2 }
 0x987   : > { %s4282_s3 = sand.u32 1, %s7642_s0  }
 0x988   : > { %p5009_p0 = pnand %p5012_p13, %p5309_p6  ;;  %s4283_s22 = scalar_lea.sflag [#allocation4], %s4282_s3 }
 0x98a   : > { %p5010_p1 = pneg %p5009_p0 }
 0x98c   : > { %5129 = dma.done.wait (%p5010_p1), %s4283_s22, 128  }
 0x98d   : > { %5131 = vsyncadd (%p5010_p1), %s4283_s22, 4294967168  ;;  %s7644_s27 = sld [smem:[#allocation9_spill]]  ;;  %s7647_s2 = smov %s5138_s25 }
 0x98e   : > { %s7645_s29 = sld [smem:[#allocation7_spill]] }
 0x98f   : > { %s7646_s26 = sld [smem:[#allocation10_spill]] }
 0x993   : > { %p31_p2 = scmp.ge.s32.totalorder %s7644_s27, 4  }
 0x994   : > { %s7648_s25 = smov %s7645_s29 }
 0x995   :  { %33 = sbr.rel (!%p31_p2) target bundleno = 14 (0xe), region = 154 }
 0x99a   :  { %4288 = vsyncpa [#allocation4], 1 }
 0x99b   :  { %4290 = vsyncpa [#allocation4 + $0x1], 1 }

</bundles_post_ra>
